<compile_context>
chip_gen: v7x
topology: tpu7x:2x2x1
jax: 0.10.0
libtpu: 0.0.40
codegen_flags: <defaults>
</compile_context>

<pallas_src>
import functools

import jax
import jax.numpy as jnp
from jax.experimental import pallas as pl
from jax.experimental.pallas import tpu as pltpu


def _resblock_kernel(x_ref, w1_ref, w2_ref, mask_ref, o_ref,
                     pad_ref, patch_ref, y_ref, *,
                     Nb, C, H, W, Wp, L, pad_len, eps):
    # x_ref    : (Nb*C, H*W)     compact NCHW rows; image i -> rows [i*C, (i+1)*C)
    # w1/w2    : (C, 25*C)       w[c_out, (dy*5+dx)*C + c_in]
    # mask_ref : (1, L)          1.0 where the flattened padded-row column x < W
    # o_ref    : (Nb*C, H*W)     compact output
    # pad_ref  : (Nb*C, pad_len) zero-padded image slab, flattened row-major (width Wp)
    # patch_ref: (25*C, L)       im2col slab (rebuilt per image per conv)
    # y_ref    : (Nb*C, L)       raw conv outputs in row-padded flat layout
    R = Nb * C
    interior = 2 * Wp + 2           # flat offset of output pixel (0,0) in the slab
    inv_n = 1.0 / float(H * W)
    mask = mask_ref[...]            # hoisted once; reused by both norms

    # ---- rebuild the zero frame (halos + inter-row padding + tail) ----------
    # One dense store over the whole slab is only a few unmasked vst's and is
    # cheaper than the ~30 masked partial stores of a "surgical" zeroing.  No
    # reliance on scratch persistence across (possibly core-sharded) steps.
    pad_ref[...] = jnp.zeros((R, pad_len), jnp.float32)

    # ---- scatter compact x rows into the padded slab (conv1 input) ----------
    for y in range(H):
        base = interior + y * Wp
        pad_ref[:, base:base + W] = x_ref[:, y * W:(y + 1) * W]

    def conv5x5(rows, w_ref):
        # im2col in VMEM: 25 lane-shifted copies of the padded rows, then a
        # single channel-mix matmul with contraction depth 25*C on the MXU.
        for dy in range(5):
            for dx in range(5):
                k = dy * 5 + dx
                off = dy * Wp + dx
                patch_ref[k * C:(k + 1) * C, :] = pad_ref[rows, off:off + L]
        return jnp.dot(w_ref[...], patch_ref[...],
                       preferred_element_type=jnp.float32)

    def masked_stats(v):
        # One-pass masked IN statistics (biased variance over H*W valid pixels).
        vm = v * mask
        mean = jnp.sum(vm, axis=-1, keepdims=True) * inv_n
        ex2 = jnp.sum(vm * vm, axis=-1, keepdims=True) * inv_n
        var = jnp.maximum(ex2 - mean * mean, 0.0)
        return mean, jax.lax.rsqrt(var + eps)         # rsqrt -> EUP slot

    # ---- conv1 per image, then IN1 + relu batched over all Nb*C rows --------
    for i in range(Nb):
        rows = slice(i * C, (i + 1) * C)
        y_ref[rows, :] = conv5x5(rows, w1_ref)
    v1 = y_ref[...]
    mean1, rstd1 = masked_stats(v1)
    # Masked so the garbage columns written back into the slab (= conv2's zero
    # padding between rows) are exactly zero.
    pad_ref[:, interior:interior + L] = jnp.maximum((v1 - mean1) * rstd1, 0.0) * mask

    # ---- conv2 per image, then IN2 + residual + relu, compacted -------------
    for i in range(Nb):
        rows = slice(i * C, (i + 1) * C)
        y_ref[rows, :] = conv5x5(rows, w2_ref)
    v2 = y_ref[...]
    mean2, rstd2 = masked_stats(v2)
    y2n = (v2 - mean2) * rstd2                         # one (R, L) pass
    for y in range(H):                                 # drop the per-row pad lanes
        o_ref[:, y * W:(y + 1) * W] = jnp.maximum(
            y2n[:, y * Wp:y * Wp + W] + x_ref[:, y * W:(y + 1) * W],
            0.0).astype(o_ref.dtype)


def _choose_batch_block(N, C):
    """Smallest batch block with a sublane-aligned row count (Nb*C % 8 == 0)."""
    for nb in range(1, N + 1):
        if N % nb == 0 and (nb * C) % 8 == 0:
            return nb
    return N


def resblock_pallas(x, w1, w2, *, eps=1e-5, batch_block=None):
    """x: (N, C, H, W) float32.  w1, w2: (C, C, 5, 5) PyTorch conv weights."""
    N, C, H, W = x.shape
    P = 2                                    # conv padding (kernel 5, pad 2)
    Hp, Wp = H + 2 * P, W + 2 * P
    L = H * Wp                               # row-padded flat length of the output
    HW = H * W
    # Largest tap read index is 4*Wp + 4 + L - 1 = Hp*Wp + 3.
    pad_len = ((Hp * Wp + 4 + 127) // 128) * 128

    Nb = batch_block or _choose_batch_block(N, C)
    assert N % Nb == 0
    R = Nb * C

    x = jnp.asarray(x, jnp.float32)
    xf = x.reshape(N * C, HW)                # contiguous reshape -> no data movement

    def prep_w(w):
        w = jnp.asarray(w, jnp.float32)
        # (C_out, C_in, 5, 5) -> (C_out, 25*C_in) with col = (dy*5+dx)*C + c_in
        return jnp.transpose(w, (0, 2, 3, 1)).reshape(C, 25 * C)

    w1m, w2m = prep_w(w1), prep_w(w2)

    col = jnp.arange(L, dtype=jnp.int32) % Wp
    mask = (col < W).astype(jnp.float32).reshape(1, L)

    kernel = functools.partial(_resblock_kernel, Nb=Nb, C=C, H=H, W=W, Wp=Wp,
                               L=L, pad_len=pad_len, eps=float(eps))

    out_flat = pl.pallas_call(
        kernel,
        out_shape=jax.ShapeDtypeStruct((N * C, HW), x.dtype),
        grid_spec=pltpu.PrefetchScalarGridSpec(
            num_scalar_prefetch=0,
            grid=(N // Nb,),
            in_specs=[
                pl.BlockSpec((R, HW), lambda n: (n, 0)),        # compact x rows
                pl.BlockSpec((C, 25 * C), lambda n: (0, 0)),    # conv1 weights (resident)
                pl.BlockSpec((C, 25 * C), lambda n: (0, 0)),    # conv2 weights (resident)
                pl.BlockSpec((1, L), lambda n: (0, 0)),         # valid-column mask
            ],
            out_specs=pl.BlockSpec((R, HW), lambda n: (n, 0)),
            scratch_shapes=[
                pltpu.VMEM((R, pad_len), jnp.float32),          # padded image slab
                pltpu.VMEM((25 * C, L), jnp.float32),           # im2col patch slab
                pltpu.VMEM((R, L), jnp.float32),                # raw conv outputs
            ],
        ),
        compiler_params=pltpu.CompilerParams(
            dimension_semantics=("parallel",)),
    )(xf, w1m, w2m, mask)

    return out_flat.reshape(N, C, H, W)      # contiguous reshape -> no data movement


def resblock_reference(x, w1, w2, *, eps=1e-5):
    """Pure-JAX reference mirroring the PyTorch forward exactly."""
    def conv(v, w):
        return jax.lax.conv_general_dilated(
            v, w, window_strides=(1, 1), padding=((2, 2), (2, 2)),
            dimension_numbers=("NCHW", "OIHW", "NCHW"))

    def inorm(v):
        mean = jnp.mean(v, axis=(2, 3), keepdims=True)
        var = jnp.var(v, axis=(2, 3), keepdims=True)   # biased, like InstanceNorm2d
        return (v - mean) / jnp.sqrt(var + eps)

    out = jax.nn.relu(inorm(conv(x, w1)))
    out = inorm(conv(out, w2))
    return jax.nn.relu(out + x)


if __name__ == "__main__":
    N, C, H, W = 2, 4, 16, 16

    key = jax.random.PRNGKey(0)
    kx, k1, k2 = jax.random.split(key, 3)
    x = jax.random.normal(kx, (N, C, H, W), dtype=jnp.float32)
    fan_in = C * 5 * 5
    w1 = jax.random.normal(k1, (C, C, 5, 5), dtype=jnp.float32) / jnp.sqrt(fan_in)
    w2 = jax.random.normal(k2, (C, C, 5, 5), dtype=jnp.float32) / jnp.sqrt(fan_in)

    out = resblock_pallas(x, w1, w2)
    jax.block_until_ready(out)

    ref = resblock_reference(x, w1, w2)
    assert out.shape == (N, C, H, W)
    assert jnp.allclose(out, ref, atol=1e-3, rtol=1e-3), \
        float(jnp.max(jnp.abs(out - ref)))

    print("KERNEL_OK")
</pallas_src>

<mosaic_0001>
module attributes {stable_mosaic.version = 11 : i64} {
  func.func @_resblock_kernel(%arg0: i32, %arg1: memref<8x256xf32, #tpu.memory_space<vmem>>, %arg2: memref<4x100xf32, #tpu.memory_space<vmem>>, %arg3: memref<4x100xf32, #tpu.memory_space<vmem>>, %arg4: memref<1x320xf32, #tpu.memory_space<vmem>>, %arg5: memref<8x256xf32, #tpu.memory_space<vmem>>, %arg6: memref<8x512xf32, #tpu.memory_space<vmem>>, %arg7: memref<100x320xf32, #tpu.memory_space<vmem>>, %arg8: memref<8x320xf32, #tpu.memory_space<vmem>>) attributes {dimension_semantics = [#tpu.dimension_semantics<parallel>], iteration_bounds = array<i64: 1>, scalar_prefetch = 0 : i64, scratch_operands = 3 : i64, tpu.core_type = #tpu.core_type<tc>, window_params = [{transform_indices = @transform_0, window_bounds = array<i64: 8, 256>}, {pipeline_mode = #tpu.pipeline_mode<synchronous>, transform_indices = @transform_1, window_bounds = array<i64: 4, 100>}, {pipeline_mode = #tpu.pipeline_mode<synchronous>, transform_indices = @transform_2, window_bounds = array<i64: 4, 100>}, {pipeline_mode = #tpu.pipeline_mode<synchronous>, transform_indices = @transform_3, window_bounds = array<i64: 1, 320>}, {transform_indices = @transform_4, window_bounds = array<i64: 8, 256>}]} {
    %c0 = arith.constant 0 : index
    %c0_0 = arith.constant 0 : index
    %0 = vector.load %arg4[%c0, %c0_0] : memref<1x320xf32, #tpu.memory_space<vmem>>, vector<1x320xf32>
    %cst = arith.constant 0.000000e+00 : f32
    %1 = vector.broadcast %cst : f32 to vector<8x512xf32>
    %c0_1 = arith.constant 0 : index
    %c0_2 = arith.constant 0 : index
    %2 = vector.load %arg6[%c0_1, %c0_2] : memref<8x512xf32, #tpu.memory_space<vmem>>, vector<8x512xf32>
    tpu.vector_store %arg6[%c0_1, %c0_2], %1 {strides = array<i32>} : memref<8x512xf32, #tpu.memory_space<vmem>>, vector<8x512xf32>,
    %c0_3 = arith.constant 0 : index
    %c0_4 = arith.constant 0 : index
    %3 = vector.load %arg1[%c0_3, %c0_4] : memref<8x256xf32, #tpu.memory_space<vmem>>, vector<8x16xf32>
    %c0_5 = arith.constant 0 : index
    %c42 = arith.constant 42 : index
    %4 = vector.load %arg6[%c0_5, %c42] : memref<8x512xf32, #tpu.memory_space<vmem>>, vector<8x16xf32>
    tpu.vector_store %arg6[%c0_5, %c42], %3 {strides = array<i32>} : memref<8x512xf32, #tpu.memory_space<vmem>>, vector<8x16xf32>,
    %c0_6 = arith.constant 0 : index
    %c16 = arith.constant 16 : index
    %5 = vector.load %arg1[%c0_6, %c16] : memref<8x256xf32, #tpu.memory_space<vmem>>, vector<8x16xf32>
    %c0_7 = arith.constant 0 : index
    %c62 = arith.constant 62 : index
    %6 = vector.load %arg6[%c0_7, %c62] : memref<8x512xf32, #tpu.memory_space<vmem>>, vector<8x16xf32>
    tpu.vector_store %arg6[%c0_7, %c62], %5 {strides = array<i32>} : memref<8x512xf32, #tpu.memory_space<vmem>>, vector<8x16xf32>,
    %c0_8 = arith.constant 0 : index
    %c32 = arith.constant 32 : index
    %7 = vector.load %arg1[%c0_8, %c32] : memref<8x256xf32, #tpu.memory_space<vmem>>, vector<8x16xf32>
    %c0_9 = arith.constant 0 : index
    %c82 = arith.constant 82 : index
    %8 = vector.load %arg6[%c0_9, %c82] : memref<8x512xf32, #tpu.memory_space<vmem>>, vector<8x16xf32>
    tpu.vector_store %arg6[%c0_9, %c82], %7 {strides = array<i32>} : memref<8x512xf32, #tpu.memory_space<vmem>>, vector<8x16xf32>,
    %c0_10 = arith.constant 0 : index
    %c48 = arith.constant 48 : index
    %9 = vector.load %arg1[%c0_10, %c48] : memref<8x256xf32, #tpu.memory_space<vmem>>, vector<8x16xf32>
    %c0_11 = arith.constant 0 : index
    %c102 = arith.constant 102 : index
    %10 = vector.load %arg6[%c0_11, %c102] : memref<8x512xf32, #tpu.memory_space<vmem>>, vector<8x16xf32>
    tpu.vector_store %arg6[%c0_11, %c102], %9 {strides = array<i32>} : memref<8x512xf32, #tpu.memory_space<vmem>>, vector<8x16xf32>,
    %c0_12 = arith.constant 0 : index
    %c64 = arith.constant 64 : index
    %11 = vector.load %arg1[%c0_12, %c64] : memref<8x256xf32, #tpu.memory_space<vmem>>, vector<8x16xf32>
    %c0_13 = arith.constant 0 : index
    %c122 = arith.constant 122 : index
    %12 = vector.load %arg6[%c0_13, %c122] : memref<8x512xf32, #tpu.memory_space<vmem>>, vector<8x16xf32>
    tpu.vector_store %arg6[%c0_13, %c122], %11 {strides = array<i32>} : memref<8x512xf32, #tpu.memory_space<vmem>>, vector<8x16xf32>,
    %c0_14 = arith.constant 0 : index
    %c80 = arith.constant 80 : index
    %13 = vector.load %arg1[%c0_14, %c80] : memref<8x256xf32, #tpu.memory_space<vmem>>, vector<8x16xf32>
    %c0_15 = arith.constant 0 : index
    %c142 = arith.constant 142 : index
    %14 = vector.load %arg6[%c0_15, %c142] : memref<8x512xf32, #tpu.memory_space<vmem>>, vector<8x16xf32>
    tpu.vector_store %arg6[%c0_15, %c142], %13 {strides = array<i32>} : memref<8x512xf32, #tpu.memory_space<vmem>>, vector<8x16xf32>,
    %c0_16 = arith.constant 0 : index
    %c96 = arith.constant 96 : index
    %15 = vector.load %arg1[%c0_16, %c96] : memref<8x256xf32, #tpu.memory_space<vmem>>, vector<8x16xf32>
    %c0_17 = arith.constant 0 : index
    %c162 = arith.constant 162 : index
    %16 = vector.load %arg6[%c0_17, %c162] : memref<8x512xf32, #tpu.memory_space<vmem>>, vector<8x16xf32>
    tpu.vector_store %arg6[%c0_17, %c162], %15 {strides = array<i32>} : memref<8x512xf32, #tpu.memory_space<vmem>>, vector<8x16xf32>,
    %c0_18 = arith.constant 0 : index
    %c112 = arith.constant 112 : index
    %17 = vector.load %arg1[%c0_18, %c112] : memref<8x256xf32, #tpu.memory_space<vmem>>, vector<8x16xf32>
    %c0_19 = arith.constant 0 : index
    %c182 = arith.constant 182 : index
    %18 = vector.load %arg6[%c0_19, %c182] : memref<8x512xf32, #tpu.memory_space<vmem>>, vector<8x16xf32>
    tpu.vector_store %arg6[%c0_19, %c182], %17 {strides = array<i32>} : memref<8x512xf32, #tpu.memory_space<vmem>>, vector<8x16xf32>,
    %c0_20 = arith.constant 0 : index
    %c128 = arith.constant 128 : index
    %19 = vector.load %arg1[%c0_20, %c128] : memref<8x256xf32, #tpu.memory_space<vmem>>, vector<8x16xf32>
    %c0_21 = arith.constant 0 : index
    %c202 = arith.constant 202 : index
    %20 = vector.load %arg6[%c0_21, %c202] : memref<8x512xf32, #tpu.memory_space<vmem>>, vector<8x16xf32>
    tpu.vector_store %arg6[%c0_21, %c202], %19 {strides = array<i32>} : memref<8x512xf32, #tpu.memory_space<vmem>>, vector<8x16xf32>,
    %c0_22 = arith.constant 0 : index
    %c144 = arith.constant 144 : index
    %21 = vector.load %arg1[%c0_22, %c144] : memref<8x256xf32, #tpu.memory_space<vmem>>, vector<8x16xf32>
    %c0_23 = arith.constant 0 : index
    %c222 = arith.constant 222 : index
    %22 = vector.load %arg6[%c0_23, %c222] : memref<8x512xf32, #tpu.memory_space<vmem>>, vector<8x16xf32>
    tpu.vector_store %arg6[%c0_23, %c222], %21 {strides = array<i32>} : memref<8x512xf32, #tpu.memory_space<vmem>>, vector<8x16xf32>,
    %c0_24 = arith.constant 0 : index
    %c160 = arith.constant 160 : index
    %23 = vector.load %arg1[%c0_24, %c160] : memref<8x256xf32, #tpu.memory_space<vmem>>, vector<8x16xf32>
    %c0_25 = arith.constant 0 : index
    %c242 = arith.constant 242 : index
    %24 = vector.load %arg6[%c0_25, %c242] : memref<8x512xf32, #tpu.memory_space<vmem>>, vector<8x16xf32>
    tpu.vector_store %arg6[%c0_25, %c242], %23 {strides = array<i32>} : memref<8x512xf32, #tpu.memory_space<vmem>>, vector<8x16xf32>,
    %c0_26 = arith.constant 0 : index
    %c176 = arith.constant 176 : index
    %25 = vector.load %arg1[%c0_26, %c176] : memref<8x256xf32, #tpu.memory_space<vmem>>, vector<8x16xf32>
    %c0_27 = arith.constant 0 : index
    %c262 = arith.constant 262 : index
    %26 = vector.load %arg6[%c0_27, %c262] : memref<8x512xf32, #tpu.memory_space<vmem>>, vector<8x16xf32>
    tpu.vector_store %arg6[%c0_27, %c262], %25 {strides = array<i32>} : memref<8x512xf32, #tpu.memory_space<vmem>>, vector<8x16xf32>,
    %c0_28 = arith.constant 0 : index
    %c192 = arith.constant 192 : index
    %27 = vector.load %arg1[%c0_28, %c192] : memref<8x256xf32, #tpu.memory_space<vmem>>, vector<8x16xf32>
    %c0_29 = arith.constant 0 : index
    %c282 = arith.constant 282 : index
    %28 = vector.load %arg6[%c0_29, %c282] : memref<8x512xf32, #tpu.memory_space<vmem>>, vector<8x16xf32>
    tpu.vector_store %arg6[%c0_29, %c282], %27 {strides = array<i32>} : memref<8x512xf32, #tpu.memory_space<vmem>>, vector<8x16xf32>,
    %c0_30 = arith.constant 0 : index
    %c208 = arith.constant 208 : index
    %29 = vector.load %arg1[%c0_30, %c208] : memref<8x256xf32, #tpu.memory_space<vmem>>, vector<8x16xf32>
    %c0_31 = arith.constant 0 : index
    %c302 = arith.constant 302 : index
    %30 = vector.load %arg6[%c0_31, %c302] : memref<8x512xf32, #tpu.memory_space<vmem>>, vector<8x16xf32>
    tpu.vector_store %arg6[%c0_31, %c302], %29 {strides = array<i32>} : memref<8x512xf32, #tpu.memory_space<vmem>>, vector<8x16xf32>,
    %c0_32 = arith.constant 0 : index
    %c224 = arith.constant 224 : index
    %31 = vector.load %arg1[%c0_32, %c224] : memref<8x256xf32, #tpu.memory_space<vmem>>, vector<8x16xf32>
    %c0_33 = arith.constant 0 : index
    %c322 = arith.constant 322 : index
    %32 = vector.load %arg6[%c0_33, %c322] : memref<8x512xf32, #tpu.memory_space<vmem>>, vector<8x16xf32>
    tpu.vector_store %arg6[%c0_33, %c322], %31 {strides = array<i32>} : memref<8x512xf32, #tpu.memory_space<vmem>>, vector<8x16xf32>,
    %c0_34 = arith.constant 0 : index
    %c240 = arith.constant 240 : index
    %33 = vector.load %arg1[%c0_34, %c240] : memref<8x256xf32, #tpu.memory_space<vmem>>, vector<8x16xf32>
    %c0_35 = arith.constant 0 : index
    %c342 = arith.constant 342 : index
    %34 = vector.load %arg6[%c0_35, %c342] : memref<8x512xf32, #tpu.memory_space<vmem>>, vector<8x16xf32>
    tpu.vector_store %arg6[%c0_35, %c342], %33 {strides = array<i32>} : memref<8x512xf32, #tpu.memory_space<vmem>>, vector<8x16xf32>,
    %c0_36 = arith.constant 0 : index
    %c0_37 = arith.constant 0 : index
    %35 = vector.load %arg6[%c0_36, %c0_37] : memref<8x512xf32, #tpu.memory_space<vmem>>, vector<4x320xf32>
    %c0_38 = arith.constant 0 : index
    %c0_39 = arith.constant 0 : index
    %36 = vector.load %arg7[%c0_38, %c0_39] : memref<100x320xf32, #tpu.memory_space<vmem>>, vector<4x320xf32>
    tpu.vector_store %arg7[%c0_38, %c0_39], %35 {strides = array<i32>} : memref<100x320xf32, #tpu.memory_space<vmem>>, vector<4x320xf32>,
    %c0_40 = arith.constant 0 : index
    %c1 = arith.constant 1 : index
    %37 = vector.load %arg6[%c0_40, %c1] : memref<8x512xf32, #tpu.memory_space<vmem>>, vector<4x320xf32>
    %c4 = arith.constant 4 : index
    %c0_41 = arith.constant 0 : index
    %38 = vector.load %arg7[%c4, %c0_41] : memref<100x320xf32, #tpu.memory_space<vmem>>, vector<4x320xf32>
    tpu.vector_store %arg7[%c4, %c0_41], %37 {strides = array<i32>} : memref<100x320xf32, #tpu.memory_space<vmem>>, vector<4x320xf32>,
    %c0_42 = arith.constant 0 : index
    %c2 = arith.constant 2 : index
    %39 = vector.load %arg6[%c0_42, %c2] : memref<8x512xf32, #tpu.memory_space<vmem>>, vector<4x320xf32>
    %c8 = arith.constant 8 : index
    %c0_43 = arith.constant 0 : index
    %40 = vector.load %arg7[%c8, %c0_43] : memref<100x320xf32, #tpu.memory_space<vmem>>, vector<4x320xf32>
    tpu.vector_store %arg7[%c8, %c0_43], %39 {strides = array<i32>} : memref<100x320xf32, #tpu.memory_space<vmem>>, vector<4x320xf32>,
    %c0_44 = arith.constant 0 : index
    %c3 = arith.constant 3 : index
    %41 = vector.load %arg6[%c0_44, %c3] : memref<8x512xf32, #tpu.memory_space<vmem>>, vector<4x320xf32>
    %c12 = arith.constant 12 : index
    %c0_45 = arith.constant 0 : index
    %42 = vector.load %arg7[%c12, %c0_45] : memref<100x320xf32, #tpu.memory_space<vmem>>, vector<4x320xf32>
    tpu.vector_store %arg7[%c12, %c0_45], %41 {strides = array<i32>} : memref<100x320xf32, #tpu.memory_space<vmem>>, vector<4x320xf32>,
    %c0_46 = arith.constant 0 : index
    %c4_47 = arith.constant 4 : index
    %43 = vector.load %arg6[%c0_46, %c4_47] : memref<8x512xf32, #tpu.memory_space<vmem>>, vector<4x320xf32>
    %c16_48 = arith.constant 16 : index
    %c0_49 = arith.constant 0 : index
    %44 = vector.load %arg7[%c16_48, %c0_49] : memref<100x320xf32, #tpu.memory_space<vmem>>, vector<4x320xf32>
    tpu.vector_store %arg7[%c16_48, %c0_49], %43 {strides = array<i32>} : memref<100x320xf32, #tpu.memory_space<vmem>>, vector<4x320xf32>,
    %c0_50 = arith.constant 0 : index
    %c20 = arith.constant 20 : index
    %45 = vector.load %arg6[%c0_50, %c20] : memref<8x512xf32, #tpu.memory_space<vmem>>, vector<4x320xf32>
    %c20_51 = arith.constant 20 : index
    %c0_52 = arith.constant 0 : index
    %46 = vector.load %arg7[%c20_51, %c0_52] : memref<100x320xf32, #tpu.memory_space<vmem>>, vector<4x320xf32>
    tpu.vector_store %arg7[%c20_51, %c0_52], %45 {strides = array<i32>} : memref<100x320xf32, #tpu.memory_space<vmem>>, vector<4x320xf32>,
    %c0_53 = arith.constant 0 : index
    %c21 = arith.constant 21 : index
    %47 = vector.load %arg6[%c0_53, %c21] : memref<8x512xf32, #tpu.memory_space<vmem>>, vector<4x320xf32>
    %c24 = arith.constant 24 : index
    %c0_54 = arith.constant 0 : index
    %48 = vector.load %arg7[%c24, %c0_54] : memref<100x320xf32, #tpu.memory_space<vmem>>, vector<4x320xf32>
    tpu.vector_store %arg7[%c24, %c0_54], %47 {strides = array<i32>} : memref<100x320xf32, #tpu.memory_space<vmem>>, vector<4x320xf32>,
    %c0_55 = arith.constant 0 : index
    %c22 = arith.constant 22 : index
    %49 = vector.load %arg6[%c0_55, %c22] : memref<8x512xf32, #tpu.memory_space<vmem>>, vector<4x320xf32>
    %c28 = arith.constant 28 : index
    %c0_56 = arith.constant 0 : index
    %50 = vector.load %arg7[%c28, %c0_56] : memref<100x320xf32, #tpu.memory_space<vmem>>, vector<4x320xf32>
    tpu.vector_store %arg7[%c28, %c0_56], %49 {strides = array<i32>} : memref<100x320xf32, #tpu.memory_space<vmem>>, vector<4x320xf32>,
    %c0_57 = arith.constant 0 : index
    %c23 = arith.constant 23 : index
    %51 = vector.load %arg6[%c0_57, %c23] : memref<8x512xf32, #tpu.memory_space<vmem>>, vector<4x320xf32>
    %c32_58 = arith.constant 32 : index
    %c0_59 = arith.constant 0 : index
    %52 = vector.load %arg7[%c32_58, %c0_59] : memref<100x320xf32, #tpu.memory_space<vmem>>, vector<4x320xf32>
    tpu.vector_store %arg7[%c32_58, %c0_59], %51 {strides = array<i32>} : memref<100x320xf32, #tpu.memory_space<vmem>>, vector<4x320xf32>,
    %c0_60 = arith.constant 0 : index
    %c24_61 = arith.constant 24 : index
    %53 = vector.load %arg6[%c0_60, %c24_61] : memref<8x512xf32, #tpu.memory_space<vmem>>, vector<4x320xf32>
    %c36 = arith.constant 36 : index
    %c0_62 = arith.constant 0 : index
    %54 = vector.load %arg7[%c36, %c0_62] : memref<100x320xf32, #tpu.memory_space<vmem>>, vector<4x320xf32>
    tpu.vector_store %arg7[%c36, %c0_62], %53 {strides = array<i32>} : memref<100x320xf32, #tpu.memory_space<vmem>>, vector<4x320xf32>,
    %c0_63 = arith.constant 0 : index
    %c40 = arith.constant 40 : index
    %55 = vector.load %arg6[%c0_63, %c40] : memref<8x512xf32, #tpu.memory_space<vmem>>, vector<4x320xf32>
    %c40_64 = arith.constant 40 : index
    %c0_65 = arith.constant 0 : index
    %56 = vector.load %arg7[%c40_64, %c0_65] : memref<100x320xf32, #tpu.memory_space<vmem>>, vector<4x320xf32>
    tpu.vector_store %arg7[%c40_64, %c0_65], %55 {strides = array<i32>} : memref<100x320xf32, #tpu.memory_space<vmem>>, vector<4x320xf32>,
    %c0_66 = arith.constant 0 : index
    %c41 = arith.constant 41 : index
    %57 = vector.load %arg6[%c0_66, %c41] : memref<8x512xf32, #tpu.memory_space<vmem>>, vector<4x320xf32>
    %c44 = arith.constant 44 : index
    %c0_67 = arith.constant 0 : index
    %58 = vector.load %arg7[%c44, %c0_67] : memref<100x320xf32, #tpu.memory_space<vmem>>, vector<4x320xf32>
    tpu.vector_store %arg7[%c44, %c0_67], %57 {strides = array<i32>} : memref<100x320xf32, #tpu.memory_space<vmem>>, vector<4x320xf32>,
    %c0_68 = arith.constant 0 : index
    %c42_69 = arith.constant 42 : index
    %59 = vector.load %arg6[%c0_68, %c42_69] : memref<8x512xf32, #tpu.memory_space<vmem>>, vector<4x320xf32>
    %c48_70 = arith.constant 48 : index
    %c0_71 = arith.constant 0 : index
    %60 = vector.load %arg7[%c48_70, %c0_71] : memref<100x320xf32, #tpu.memory_space<vmem>>, vector<4x320xf32>
    tpu.vector_store %arg7[%c48_70, %c0_71], %59 {strides = array<i32>} : memref<100x320xf32, #tpu.memory_space<vmem>>, vector<4x320xf32>,
    %c0_72 = arith.constant 0 : index
    %c43 = arith.constant 43 : index
    %61 = vector.load %arg6[%c0_72, %c43] : memref<8x512xf32, #tpu.memory_space<vmem>>, vector<4x320xf32>
    %c52 = arith.constant 52 : index
    %c0_73 = arith.constant 0 : index
    %62 = vector.load %arg7[%c52, %c0_73] : memref<100x320xf32, #tpu.memory_space<vmem>>, vector<4x320xf32>
    tpu.vector_store %arg7[%c52, %c0_73], %61 {strides = array<i32>} : memref<100x320xf32, #tpu.memory_space<vmem>>, vector<4x320xf32>,
    %c0_74 = arith.constant 0 : index
    %c44_75 = arith.constant 44 : index
    %63 = vector.load %arg6[%c0_74, %c44_75] : memref<8x512xf32, #tpu.memory_space<vmem>>, vector<4x320xf32>
    %c56 = arith.constant 56 : index
    %c0_76 = arith.constant 0 : index
    %64 = vector.load %arg7[%c56, %c0_76] : memref<100x320xf32, #tpu.memory_space<vmem>>, vector<4x320xf32>
    tpu.vector_store %arg7[%c56, %c0_76], %63 {strides = array<i32>} : memref<100x320xf32, #tpu.memory_space<vmem>>, vector<4x320xf32>,
    %c0_77 = arith.constant 0 : index
    %c60 = arith.constant 60 : index
    %65 = vector.load %arg6[%c0_77, %c60] : memref<8x512xf32, #tpu.memory_space<vmem>>, vector<4x320xf32>
    %c60_78 = arith.constant 60 : index
    %c0_79 = arith.constant 0 : index
    %66 = vector.load %arg7[%c60_78, %c0_79] : memref<100x320xf32, #tpu.memory_space<vmem>>, vector<4x320xf32>
    tpu.vector_store %arg7[%c60_78, %c0_79], %65 {strides = array<i32>} : memref<100x320xf32, #tpu.memory_space<vmem>>, vector<4x320xf32>,
    %c0_80 = arith.constant 0 : index
    %c61 = arith.constant 61 : index
    %67 = vector.load %arg6[%c0_80, %c61] : memref<8x512xf32, #tpu.memory_space<vmem>>, vector<4x320xf32>
    %c64_81 = arith.constant 64 : index
    %c0_82 = arith.constant 0 : index
    %68 = vector.load %arg7[%c64_81, %c0_82] : memref<100x320xf32, #tpu.memory_space<vmem>>, vector<4x320xf32>
    tpu.vector_store %arg7[%c64_81, %c0_82], %67 {strides = array<i32>} : memref<100x320xf32, #tpu.memory_space<vmem>>, vector<4x320xf32>,
    %c0_83 = arith.constant 0 : index
    %c62_84 = arith.constant 62 : index
    %69 = vector.load %arg6[%c0_83, %c62_84] : memref<8x512xf32, #tpu.memory_space<vmem>>, vector<4x320xf32>
    %c68 = arith.constant 68 : index
    %c0_85 = arith.constant 0 : index
    %70 = vector.load %arg7[%c68, %c0_85] : memref<100x320xf32, #tpu.memory_space<vmem>>, vector<4x320xf32>
    tpu.vector_store %arg7[%c68, %c0_85], %69 {strides = array<i32>} : memref<100x320xf32, #tpu.memory_space<vmem>>, vector<4x320xf32>,
    %c0_86 = arith.constant 0 : index
    %c63 = arith.constant 63 : index
    %71 = vector.load %arg6[%c0_86, %c63] : memref<8x512xf32, #tpu.memory_space<vmem>>, vector<4x320xf32>
    %c72 = arith.constant 72 : index
    %c0_87 = arith.constant 0 : index
    %72 = vector.load %arg7[%c72, %c0_87] : memref<100x320xf32, #tpu.memory_space<vmem>>, vector<4x320xf32>
    tpu.vector_store %arg7[%c72, %c0_87], %71 {strides = array<i32>} : memref<100x320xf32, #tpu.memory_space<vmem>>, vector<4x320xf32>,
    %c0_88 = arith.constant 0 : index
    %c64_89 = arith.constant 64 : index
    %73 = vector.load %arg6[%c0_88, %c64_89] : memref<8x512xf32, #tpu.memory_space<vmem>>, vector<4x320xf32>
    %c76 = arith.constant 76 : index
    %c0_90 = arith.constant 0 : index
    %74 = vector.load %arg7[%c76, %c0_90] : memref<100x320xf32, #tpu.memory_space<vmem>>, vector<4x320xf32>
    tpu.vector_store %arg7[%c76, %c0_90], %73 {strides = array<i32>} : memref<100x320xf32, #tpu.memory_space<vmem>>, vector<4x320xf32>,
    %c0_91 = arith.constant 0 : index
    %c80_92 = arith.constant 80 : index
    %75 = vector.load %arg6[%c0_91, %c80_92] : memref<8x512xf32, #tpu.memory_space<vmem>>, vector<4x320xf32>
    %c80_93 = arith.constant 80 : index
    %c0_94 = arith.constant 0 : index
    %76 = vector.load %arg7[%c80_93, %c0_94] : memref<100x320xf32, #tpu.memory_space<vmem>>, vector<4x320xf32>
    tpu.vector_store %arg7[%c80_93, %c0_94], %75 {strides = array<i32>} : memref<100x320xf32, #tpu.memory_space<vmem>>, vector<4x320xf32>,
    %c0_95 = arith.constant 0 : index
    %c81 = arith.constant 81 : index
    %77 = vector.load %arg6[%c0_95, %c81] : memref<8x512xf32, #tpu.memory_space<vmem>>, vector<4x320xf32>
    %c84 = arith.constant 84 : index
    %c0_96 = arith.constant 0 : index
    %78 = vector.load %arg7[%c84, %c0_96] : memref<100x320xf32, #tpu.memory_space<vmem>>, vector<4x320xf32>
    tpu.vector_store %arg7[%c84, %c0_96], %77 {strides = array<i32>} : memref<100x320xf32, #tpu.memory_space<vmem>>, vector<4x320xf32>,
    %c0_97 = arith.constant 0 : index
    %c82_98 = arith.constant 82 : index
    %79 = vector.load %arg6[%c0_97, %c82_98] : memref<8x512xf32, #tpu.memory_space<vmem>>, vector<4x320xf32>
    %c88 = arith.constant 88 : index
    %c0_99 = arith.constant 0 : index
    %80 = vector.load %arg7[%c88, %c0_99] : memref<100x320xf32, #tpu.memory_space<vmem>>, vector<4x320xf32>
    tpu.vector_store %arg7[%c88, %c0_99], %79 {strides = array<i32>} : memref<100x320xf32, #tpu.memory_space<vmem>>, vector<4x320xf32>,
    %c0_100 = arith.constant 0 : index
    %c83 = arith.constant 83 : index
    %81 = vector.load %arg6[%c0_100, %c83] : memref<8x512xf32, #tpu.memory_space<vmem>>, vector<4x320xf32>
    %c92 = arith.constant 92 : index
    %c0_101 = arith.constant 0 : index
    %82 = vector.load %arg7[%c92, %c0_101] : memref<100x320xf32, #tpu.memory_space<vmem>>, vector<4x320xf32>
    tpu.vector_store %arg7[%c92, %c0_101], %81 {strides = array<i32>} : memref<100x320xf32, #tpu.memory_space<vmem>>, vector<4x320xf32>,
    %c0_102 = arith.constant 0 : index
    %c84_103 = arith.constant 84 : index
    %83 = vector.load %arg6[%c0_102, %c84_103] : memref<8x512xf32, #tpu.memory_space<vmem>>, vector<4x320xf32>
    %c96_104 = arith.constant 96 : index
    %c0_105 = arith.constant 0 : index
    %84 = vector.load %arg7[%c96_104, %c0_105] : memref<100x320xf32, #tpu.memory_space<vmem>>, vector<4x320xf32>
    tpu.vector_store %arg7[%c96_104, %c0_105], %83 {strides = array<i32>} : memref<100x320xf32, #tpu.memory_space<vmem>>, vector<4x320xf32>,
    %c0_106 = arith.constant 0 : index
    %c0_107 = arith.constant 0 : index
    %85 = vector.load %arg2[%c0_106, %c0_107] : memref<4x100xf32, #tpu.memory_space<vmem>>, vector<4x100xf32>
    %c0_108 = arith.constant 0 : index
    %c0_109 = arith.constant 0 : index
    %86 = vector.load %arg7[%c0_108, %c0_109] : memref<100x320xf32, #tpu.memory_space<vmem>>, vector<100x320xf32>
    %cst_110 = arith.constant dense<0.000000e+00> : vector<4x320xf32>
    %87 = tpu.matmul %85, %86, %cst_110 {dimension_numbers = #tpu.dot_dimension_numbers<[1], [0], [0], [1], [0, 0, 1, 1], [], []>} : vector<4x100xf32>, vector<100x320xf32>, vector<4x320xf32> -> vector<4x320xf32>
    %c0_111 = arith.constant 0 : index
    %c0_112 = arith.constant 0 : index
    %88 = vector.load %arg8[%c0_111, %c0_112] : memref<8x320xf32, #tpu.memory_space<vmem>>, vector<4x320xf32>
    tpu.vector_store %arg8[%c0_111, %c0_112], %87 {strides = array<i32>} : memref<8x320xf32, #tpu.memory_space<vmem>>, vector<4x320xf32>,
    %c4_113 = arith.constant 4 : index
    %c0_114 = arith.constant 0 : index
    %89 = vector.load %arg6[%c4_113, %c0_114] : memref<8x512xf32, #tpu.memory_space<vmem>>, vector<4x320xf32>
    %c0_115 = arith.constant 0 : index
    %c0_116 = arith.constant 0 : index
    %90 = vector.load %arg7[%c0_115, %c0_116] : memref<100x320xf32, #tpu.memory_space<vmem>>, vector<4x320xf32>
    tpu.vector_store %arg7[%c0_115, %c0_116], %89 {strides = array<i32>} : memref<100x320xf32, #tpu.memory_space<vmem>>, vector<4x320xf32>,
    %c4_117 = arith.constant 4 : index
    %c1_118 = arith.constant 1 : index
    %91 = vector.load %arg6[%c4_117, %c1_118] : memref<8x512xf32, #tpu.memory_space<vmem>>, vector<4x320xf32>
    %c4_119 = arith.constant 4 : index
    %c0_120 = arith.constant 0 : index
    %92 = vector.load %arg7[%c4_119, %c0_120] : memref<100x320xf32, #tpu.memory_space<vmem>>, vector<4x320xf32>
    tpu.vector_store %arg7[%c4_119, %c0_120], %91 {strides = array<i32>} : memref<100x320xf32, #tpu.memory_space<vmem>>, vector<4x320xf32>,
    %c4_121 = arith.constant 4 : index
    %c2_122 = arith.constant 2 : index
    %93 = vector.load %arg6[%c4_121, %c2_122] : memref<8x512xf32, #tpu.memory_space<vmem>>, vector<4x320xf32>
    %c8_123 = arith.constant 8 : index
    %c0_124 = arith.constant 0 : index
    %94 = vector.load %arg7[%c8_123, %c0_124] : memref<100x320xf32, #tpu.memory_space<vmem>>, vector<4x320xf32>
    tpu.vector_store %arg7[%c8_123, %c0_124], %93 {strides = array<i32>} : memref<100x320xf32, #tpu.memory_space<vmem>>, vector<4x320xf32>,
    %c4_125 = arith.constant 4 : index
    %c3_126 = arith.constant 3 : index
    %95 = vector.load %arg6[%c4_125, %c3_126] : memref<8x512xf32, #tpu.memory_space<vmem>>, vector<4x320xf32>
    %c12_127 = arith.constant 12 : index
    %c0_128 = arith.constant 0 : index
    %96 = vector.load %arg7[%c12_127, %c0_128] : memref<100x320xf32, #tpu.memory_space<vmem>>, vector<4x320xf32>
    tpu.vector_store %arg7[%c12_127, %c0_128], %95 {strides = array<i32>} : memref<100x320xf32, #tpu.memory_space<vmem>>, vector<4x320xf32>,
    %c4_129 = arith.constant 4 : index
    %c4_130 = arith.constant 4 : index
    %97 = vector.load %arg6[%c4_129, %c4_130] : memref<8x512xf32, #tpu.memory_space<vmem>>, vector<4x320xf32>
    %c16_131 = arith.constant 16 : index
    %c0_132 = arith.constant 0 : index
    %98 = vector.load %arg7[%c16_131, %c0_132] : memref<100x320xf32, #tpu.memory_space<vmem>>, vector<4x320xf32>
    tpu.vector_store %arg7[%c16_131, %c0_132], %97 {strides = array<i32>} : memref<100x320xf32, #tpu.memory_space<vmem>>, vector<4x320xf32>,
    %c4_133 = arith.constant 4 : index
    %c20_134 = arith.constant 20 : index
    %99 = vector.load %arg6[%c4_133, %c20_134] : memref<8x512xf32, #tpu.memory_space<vmem>>, vector<4x320xf32>
    %c20_135 = arith.constant 20 : index
    %c0_136 = arith.constant 0 : index
    %100 = vector.load %arg7[%c20_135, %c0_136] : memref<100x320xf32, #tpu.memory_space<vmem>>, vector<4x320xf32>
    tpu.vector_store %arg7[%c20_135, %c0_136], %99 {strides = array<i32>} : memref<100x320xf32, #tpu.memory_space<vmem>>, vector<4x320xf32>,
    %c4_137 = arith.constant 4 : index
    %c21_138 = arith.constant 21 : index
    %101 = vector.load %arg6[%c4_137, %c21_138] : memref<8x512xf32, #tpu.memory_space<vmem>>, vector<4x320xf32>
    %c24_139 = arith.constant 24 : index
    %c0_140 = arith.constant 0 : index
    %102 = vector.load %arg7[%c24_139, %c0_140] : memref<100x320xf32, #tpu.memory_space<vmem>>, vector<4x320xf32>
    tpu.vector_store %arg7[%c24_139, %c0_140], %101 {strides = array<i32>} : memref<100x320xf32, #tpu.memory_space<vmem>>, vector<4x320xf32>,
    %c4_141 = arith.constant 4 : index
    %c22_142 = arith.constant 22 : index
    %103 = vector.load %arg6[%c4_141, %c22_142] : memref<8x512xf32, #tpu.memory_space<vmem>>, vector<4x320xf32>
    %c28_143 = arith.constant 28 : index
    %c0_144 = arith.constant 0 : index
    %104 = vector.load %arg7[%c28_143, %c0_144] : memref<100x320xf32, #tpu.memory_space<vmem>>, vector<4x320xf32>
    tpu.vector_store %arg7[%c28_143, %c0_144], %103 {strides = array<i32>} : memref<100x320xf32, #tpu.memory_space<vmem>>, vector<4x320xf32>,
    %c4_145 = arith.constant 4 : index
    %c23_146 = arith.constant 23 : index
    %105 = vector.load %arg6[%c4_145, %c23_146] : memref<8x512xf32, #tpu.memory_space<vmem>>, vector<4x320xf32>
    %c32_147 = arith.constant 32 : index
    %c0_148 = arith.constant 0 : index
    %106 = vector.load %arg7[%c32_147, %c0_148] : memref<100x320xf32, #tpu.memory_space<vmem>>, vector<4x320xf32>
    tpu.vector_store %arg7[%c32_147, %c0_148], %105 {strides = array<i32>} : memref<100x320xf32, #tpu.memory_space<vmem>>, vector<4x320xf32>,
    %c4_149 = arith.constant 4 : index
    %c24_150 = arith.constant 24 : index
    %107 = vector.load %arg6[%c4_149, %c24_150] : memref<8x512xf32, #tpu.memory_space<vmem>>, vector<4x320xf32>
    %c36_151 = arith.constant 36 : index
    %c0_152 = arith.constant 0 : index
    %108 = vector.load %arg7[%c36_151, %c0_152] : memref<100x320xf32, #tpu.memory_space<vmem>>, vector<4x320xf32>
    tpu.vector_store %arg7[%c36_151, %c0_152], %107 {strides = array<i32>} : memref<100x320xf32, #tpu.memory_space<vmem>>, vector<4x320xf32>,
    %c4_153 = arith.constant 4 : index
    %c40_154 = arith.constant 40 : index
    %109 = vector.load %arg6[%c4_153, %c40_154] : memref<8x512xf32, #tpu.memory_space<vmem>>, vector<4x320xf32>
    %c40_155 = arith.constant 40 : index
    %c0_156 = arith.constant 0 : index
    %110 = vector.load %arg7[%c40_155, %c0_156] : memref<100x320xf32, #tpu.memory_space<vmem>>, vector<4x320xf32>
    tpu.vector_store %arg7[%c40_155, %c0_156], %109 {strides = array<i32>} : memref<100x320xf32, #tpu.memory_space<vmem>>, vector<4x320xf32>,
    %c4_157 = arith.constant 4 : index
    %c41_158 = arith.constant 41 : index
    %111 = vector.load %arg6[%c4_157, %c41_158] : memref<8x512xf32, #tpu.memory_space<vmem>>, vector<4x320xf32>
    %c44_159 = arith.constant 44 : index
    %c0_160 = arith.constant 0 : index
    %112 = vector.load %arg7[%c44_159, %c0_160] : memref<100x320xf32, #tpu.memory_space<vmem>>, vector<4x320xf32>
    tpu.vector_store %arg7[%c44_159, %c0_160], %111 {strides = array<i32>} : memref<100x320xf32, #tpu.memory_space<vmem>>, vector<4x320xf32>,
    %c4_161 = arith.constant 4 : index
    %c42_162 = arith.constant 42 : index
    %113 = vector.load %arg6[%c4_161, %c42_162] : memref<8x512xf32, #tpu.memory_space<vmem>>, vector<4x320xf32>
    %c48_163 = arith.constant 48 : index
    %c0_164 = arith.constant 0 : index
    %114 = vector.load %arg7[%c48_163, %c0_164] : memref<100x320xf32, #tpu.memory_space<vmem>>, vector<4x320xf32>
    tpu.vector_store %arg7[%c48_163, %c0_164], %113 {strides = array<i32>} : memref<100x320xf32, #tpu.memory_space<vmem>>, vector<4x320xf32>,
    %c4_165 = arith.constant 4 : index
    %c43_166 = arith.constant 43 : index
    %115 = vector.load %arg6[%c4_165, %c43_166] : memref<8x512xf32, #tpu.memory_space<vmem>>, vector<4x320xf32>
    %c52_167 = arith.constant 52 : index
    %c0_168 = arith.constant 0 : index
    %116 = vector.load %arg7[%c52_167, %c0_168] : memref<100x320xf32, #tpu.memory_space<vmem>>, vector<4x320xf32>
    tpu.vector_store %arg7[%c52_167, %c0_168], %115 {strides = array<i32>} : memref<100x320xf32, #tpu.memory_space<vmem>>, vector<4x320xf32>,
    %c4_169 = arith.constant 4 : index
    %c44_170 = arith.constant 44 : index
    %117 = vector.load %arg6[%c4_169, %c44_170] : memref<8x512xf32, #tpu.memory_space<vmem>>, vector<4x320xf32>
    %c56_171 = arith.constant 56 : index
    %c0_172 = arith.constant 0 : index
    %118 = vector.load %arg7[%c56_171, %c0_172] : memref<100x320xf32, #tpu.memory_space<vmem>>, vector<4x320xf32>
    tpu.vector_store %arg7[%c56_171, %c0_172], %117 {strides = array<i32>} : memref<100x320xf32, #tpu.memory_space<vmem>>, vector<4x320xf32>,
    %c4_173 = arith.constant 4 : index
    %c60_174 = arith.constant 60 : index
    %119 = vector.load %arg6[%c4_173, %c60_174] : memref<8x512xf32, #tpu.memory_space<vmem>>, vector<4x320xf32>
    %c60_175 = arith.constant 60 : index
    %c0_176 = arith.constant 0 : index
    %120 = vector.load %arg7[%c60_175, %c0_176] : memref<100x320xf32, #tpu.memory_space<vmem>>, vector<4x320xf32>
    tpu.vector_store %arg7[%c60_175, %c0_176], %119 {strides = array<i32>} : memref<100x320xf32, #tpu.memory_space<vmem>>, vector<4x320xf32>,
    %c4_177 = arith.constant 4 : index
    %c61_178 = arith.constant 61 : index
    %121 = vector.load %arg6[%c4_177, %c61_178] : memref<8x512xf32, #tpu.memory_space<vmem>>, vector<4x320xf32>
    %c64_179 = arith.constant 64 : index
    %c0_180 = arith.constant 0 : index
    %122 = vector.load %arg7[%c64_179, %c0_180] : memref<100x320xf32, #tpu.memory_space<vmem>>, vector<4x320xf32>
    tpu.vector_store %arg7[%c64_179, %c0_180], %121 {strides = array<i32>} : memref<100x320xf32, #tpu.memory_space<vmem>>, vector<4x320xf32>,
    %c4_181 = arith.constant 4 : index
    %c62_182 = arith.constant 62 : index
    %123 = vector.load %arg6[%c4_181, %c62_182] : memref<8x512xf32, #tpu.memory_space<vmem>>, vector<4x320xf32>
    %c68_183 = arith.constant 68 : index
    %c0_184 = arith.constant 0 : index
    %124 = vector.load %arg7[%c68_183, %c0_184] : memref<100x320xf32, #tpu.memory_space<vmem>>, vector<4x320xf32>
    tpu.vector_store %arg7[%c68_183, %c0_184], %123 {strides = array<i32>} : memref<100x320xf32, #tpu.memory_space<vmem>>, vector<4x320xf32>,
    %c4_185 = arith.constant 4 : index
    %c63_186 = arith.constant 63 : index
    %125 = vector.load %arg6[%c4_185, %c63_186] : memref<8x512xf32, #tpu.memory_space<vmem>>, vector<4x320xf32>
    %c72_187 = arith.constant 72 : index
    %c0_188 = arith.constant 0 : index
    %126 = vector.load %arg7[%c72_187, %c0_188] : memref<100x320xf32, #tpu.memory_space<vmem>>, vector<4x320xf32>
    tpu.vector_store %arg7[%c72_187, %c0_188], %125 {strides = array<i32>} : memref<100x320xf32, #tpu.memory_space<vmem>>, vector<4x320xf32>,
    %c4_189 = arith.constant 4 : index
    %c64_190 = arith.constant 64 : index
    %127 = vector.load %arg6[%c4_189, %c64_190] : memref<8x512xf32, #tpu.memory_space<vmem>>, vector<4x320xf32>
    %c76_191 = arith.constant 76 : index
    %c0_192 = arith.constant 0 : index
    %128 = vector.load %arg7[%c76_191, %c0_192] : memref<100x320xf32, #tpu.memory_space<vmem>>, vector<4x320xf32>
    tpu.vector_store %arg7[%c76_191, %c0_192], %127 {strides = array<i32>} : memref<100x320xf32, #tpu.memory_space<vmem>>, vector<4x320xf32>,
    %c4_193 = arith.constant 4 : index
    %c80_194 = arith.constant 80 : index
    %129 = vector.load %arg6[%c4_193, %c80_194] : memref<8x512xf32, #tpu.memory_space<vmem>>, vector<4x320xf32>
    %c80_195 = arith.constant 80 : index
    %c0_196 = arith.constant 0 : index
    %130 = vector.load %arg7[%c80_195, %c0_196] : memref<100x320xf32, #tpu.memory_space<vmem>>, vector<4x320xf32>
    tpu.vector_store %arg7[%c80_195, %c0_196], %129 {strides = array<i32>} : memref<100x320xf32, #tpu.memory_space<vmem>>, vector<4x320xf32>,
    %c4_197 = arith.constant 4 : index
    %c81_198 = arith.constant 81 : index
    %131 = vector.load %arg6[%c4_197, %c81_198] : memref<8x512xf32, #tpu.memory_space<vmem>>, vector<4x320xf32>
    %c84_199 = arith.constant 84 : index
    %c0_200 = arith.constant 0 : index
    %132 = vector.load %arg7[%c84_199, %c0_200] : memref<100x320xf32, #tpu.memory_space<vmem>>, vector<4x320xf32>
    tpu.vector_store %arg7[%c84_199, %c0_200], %131 {strides = array<i32>} : memref<100x320xf32, #tpu.memory_space<vmem>>, vector<4x320xf32>,
    %c4_201 = arith.constant 4 : index
    %c82_202 = arith.constant 82 : index
    %133 = vector.load %arg6[%c4_201, %c82_202] : memref<8x512xf32, #tpu.memory_space<vmem>>, vector<4x320xf32>
    %c88_203 = arith.constant 88 : index
    %c0_204 = arith.constant 0 : index
    %134 = vector.load %arg7[%c88_203, %c0_204] : memref<100x320xf32, #tpu.memory_space<vmem>>, vector<4x320xf32>
    tpu.vector_store %arg7[%c88_203, %c0_204], %133 {strides = array<i32>} : memref<100x320xf32, #tpu.memory_space<vmem>>, vector<4x320xf32>,
    %c4_205 = arith.constant 4 : index
    %c83_206 = arith.constant 83 : index
    %135 = vector.load %arg6[%c4_205, %c83_206] : memref<8x512xf32, #tpu.memory_space<vmem>>, vector<4x320xf32>
    %c92_207 = arith.constant 92 : index
    %c0_208 = arith.constant 0 : index
    %136 = vector.load %arg7[%c92_207, %c0_208] : memref<100x320xf32, #tpu.memory_space<vmem>>, vector<4x320xf32>
    tpu.vector_store %arg7[%c92_207, %c0_208], %135 {strides = array<i32>} : memref<100x320xf32, #tpu.memory_space<vmem>>, vector<4x320xf32>,
    %c4_209 = arith.constant 4 : index
    %c84_210 = arith.constant 84 : index
    %137 = vector.load %arg6[%c4_209, %c84_210] : memref<8x512xf32, #tpu.memory_space<vmem>>, vector<4x320xf32>
    %c96_211 = arith.constant 96 : index
    %c0_212 = arith.constant 0 : index
    %138 = vector.load %arg7[%c96_211, %c0_212] : memref<100x320xf32, #tpu.memory_space<vmem>>, vector<4x320xf32>
    tpu.vector_store %arg7[%c96_211, %c0_212], %137 {strides = array<i32>} : memref<100x320xf32, #tpu.memory_space<vmem>>, vector<4x320xf32>,
    %c0_213 = arith.constant 0 : index
    %c0_214 = arith.constant 0 : index
    %139 = vector.load %arg2[%c0_213, %c0_214] : memref<4x100xf32, #tpu.memory_space<vmem>>, vector<4x100xf32>
    %c0_215 = arith.constant 0 : index
    %c0_216 = arith.constant 0 : index
    %140 = vector.load %arg7[%c0_215, %c0_216] : memref<100x320xf32, #tpu.memory_space<vmem>>, vector<100x320xf32>
    %cst_217 = arith.constant dense<0.000000e+00> : vector<4x320xf32>
    %141 = tpu.matmul %139, %140, %cst_217 {dimension_numbers = #tpu.dot_dimension_numbers<[1], [0], [0], [1], [0, 0, 1, 1], [], []>} : vector<4x100xf32>, vector<100x320xf32>, vector<4x320xf32> -> vector<4x320xf32>
    %c4_218 = arith.constant 4 : index
    %c0_219 = arith.constant 0 : index
    %142 = vector.load %arg8[%c4_218, %c0_219] : memref<8x320xf32, #tpu.memory_space<vmem>>, vector<4x320xf32>
    tpu.vector_store %arg8[%c4_218, %c0_219], %141 {strides = array<i32>} : memref<8x320xf32, #tpu.memory_space<vmem>>, vector<4x320xf32>,
    %c0_220 = arith.constant 0 : index
    %c0_221 = arith.constant 0 : index
    %143 = vector.load %arg8[%c0_220, %c0_221] : memref<8x320xf32, #tpu.memory_space<vmem>>, vector<8x320xf32>
    %144 = vector.broadcast %0 : vector<1x320xf32> to vector<8x320xf32>
    %145 = arith.mulf %143, %144 : vector<8x320xf32>
    %cst_222 = arith.constant dense<0.000000e+00> : vector<8xf32>
    %146 = vector.multi_reduction <add>, %145, %cst_222 [1] : vector<8x320xf32> to vector<8xf32>
    %147 = vector.shape_cast %146 : vector<8xf32> to vector<8x1xf32>
    %cst_223 = arith.constant 3.906250e-03 : f32
    %148 = vector.broadcast %cst_223 : f32 to vector<8x1xf32>
    %149 = arith.mulf %147, %148 : vector<8x1xf32>
    %150 = arith.mulf %145, %145 : vector<8x320xf32>
    %cst_224 = arith.constant dense<0.000000e+00> : vector<8xf32>
    %151 = vector.multi_reduction <add>, %150, %cst_224 [1] : vector<8x320xf32> to vector<8xf32>
    %152 = vector.shape_cast %151 : vector<8xf32> to vector<8x1xf32>
    %cst_225 = arith.constant 3.906250e-03 : f32
    %153 = vector.broadcast %cst_225 : f32 to vector<8x1xf32>
    %154 = arith.mulf %152, %153 : vector<8x1xf32>
    %155 = arith.mulf %149, %149 : vector<8x1xf32>
    %156 = arith.subf %154, %155 : vector<8x1xf32>
    %cst_226 = arith.constant 0.000000e+00 : f32
    %157 = vector.broadcast %cst_226 : f32 to vector<8x1xf32>
    %158 = arith.maximumf %156, %157 : vector<8x1xf32>
    %cst_227 = arith.constant 9.99999974E-6 : f32
    %159 = vector.broadcast %cst_227 : f32 to vector<8x1xf32>
    %160 = arith.addf %158, %159 : vector<8x1xf32>
    %161 = math.rsqrt %160 : vector<8x1xf32>
    %162 = vector.broadcast %149 : vector<8x1xf32> to vector<8x320xf32>
    %163 = arith.subf %143, %162 : vector<8x320xf32>
    %164 = vector.broadcast %161 : vector<8x1xf32> to vector<8x320xf32>
    %165 = arith.mulf %163, %164 : vector<8x320xf32>
    %cst_228 = arith.constant 0.000000e+00 : f32
    %166 = vector.broadcast %cst_228 : f32 to vector<8x320xf32>
    %167 = arith.maximumf %165, %166 : vector<8x320xf32>
    %168 = vector.broadcast %0 : vector<1x320xf32> to vector<8x320xf32>
    %169 = arith.mulf %167, %168 : vector<8x320xf32>
    %c0_229 = arith.constant 0 : index
    %c42_230 = arith.constant 42 : index
    %170 = vector.load %arg6[%c0_229, %c42_230] : memref<8x512xf32, #tpu.memory_space<vmem>>, vector<8x320xf32>
    tpu.vector_store %arg6[%c0_229, %c42_230], %169 {strides = array<i32>} : memref<8x512xf32, #tpu.memory_space<vmem>>, vector<8x320xf32>,
    %c0_231 = arith.constant 0 : index
    %c0_232 = arith.constant 0 : index
    %171 = vector.load %arg6[%c0_231, %c0_232] : memref<8x512xf32, #tpu.memory_space<vmem>>, vector<4x320xf32>
    %c0_233 = arith.constant 0 : index
    %c0_234 = arith.constant 0 : index
    %172 = vector.load %arg7[%c0_233, %c0_234] : memref<100x320xf32, #tpu.memory_space<vmem>>, vector<4x320xf32>
    tpu.vector_store %arg7[%c0_233, %c0_234], %171 {strides = array<i32>} : memref<100x320xf32, #tpu.memory_space<vmem>>, vector<4x320xf32>,
    %c0_235 = arith.constant 0 : index
    %c1_236 = arith.constant 1 : index
    %173 = vector.load %arg6[%c0_235, %c1_236] : memref<8x512xf32, #tpu.memory_space<vmem>>, vector<4x320xf32>
    %c4_237 = arith.constant 4 : index
    %c0_238 = arith.constant 0 : index
    %174 = vector.load %arg7[%c4_237, %c0_238] : memref<100x320xf32, #tpu.memory_space<vmem>>, vector<4x320xf32>
    tpu.vector_store %arg7[%c4_237, %c0_238], %173 {strides = array<i32>} : memref<100x320xf32, #tpu.memory_space<vmem>>, vector<4x320xf32>,
    %c0_239 = arith.constant 0 : index
    %c2_240 = arith.constant 2 : index
    %175 = vector.load %arg6[%c0_239, %c2_240] : memref<8x512xf32, #tpu.memory_space<vmem>>, vector<4x320xf32>
    %c8_241 = arith.constant 8 : index
    %c0_242 = arith.constant 0 : index
    %176 = vector.load %arg7[%c8_241, %c0_242] : memref<100x320xf32, #tpu.memory_space<vmem>>, vector<4x320xf32>
    tpu.vector_store %arg7[%c8_241, %c0_242], %175 {strides = array<i32>} : memref<100x320xf32, #tpu.memory_space<vmem>>, vector<4x320xf32>,
    %c0_243 = arith.constant 0 : index
    %c3_244 = arith.constant 3 : index
    %177 = vector.load %arg6[%c0_243, %c3_244] : memref<8x512xf32, #tpu.memory_space<vmem>>, vector<4x320xf32>
    %c12_245 = arith.constant 12 : index
    %c0_246 = arith.constant 0 : index
    %178 = vector.load %arg7[%c12_245, %c0_246] : memref<100x320xf32, #tpu.memory_space<vmem>>, vector<4x320xf32>
    tpu.vector_store %arg7[%c12_245, %c0_246], %177 {strides = array<i32>} : memref<100x320xf32, #tpu.memory_space<vmem>>, vector<4x320xf32>,
    %c0_247 = arith.constant 0 : index
    %c4_248 = arith.constant 4 : index
    %179 = vector.load %arg6[%c0_247, %c4_248] : memref<8x512xf32, #tpu.memory_space<vmem>>, vector<4x320xf32>
    %c16_249 = arith.constant 16 : index
    %c0_250 = arith.constant 0 : index
    %180 = vector.load %arg7[%c16_249, %c0_250] : memref<100x320xf32, #tpu.memory_space<vmem>>, vector<4x320xf32>
    tpu.vector_store %arg7[%c16_249, %c0_250], %179 {strides = array<i32>} : memref<100x320xf32, #tpu.memory_space<vmem>>, vector<4x320xf32>,
    %c0_251 = arith.constant 0 : index
    %c20_252 = arith.constant 20 : index
    %181 = vector.load %arg6[%c0_251, %c20_252] : memref<8x512xf32, #tpu.memory_space<vmem>>, vector<4x320xf32>
    %c20_253 = arith.constant 20 : index
    %c0_254 = arith.constant 0 : index
    %182 = vector.load %arg7[%c20_253, %c0_254] : memref<100x320xf32, #tpu.memory_space<vmem>>, vector<4x320xf32>
    tpu.vector_store %arg7[%c20_253, %c0_254], %181 {strides = array<i32>} : memref<100x320xf32, #tpu.memory_space<vmem>>, vector<4x320xf32>,
    %c0_255 = arith.constant 0 : index
    %c21_256 = arith.constant 21 : index
    %183 = vector.load %arg6[%c0_255, %c21_256] : memref<8x512xf32, #tpu.memory_space<vmem>>, vector<4x320xf32>
    %c24_257 = arith.constant 24 : index
    %c0_258 = arith.constant 0 : index
    %184 = vector.load %arg7[%c24_257, %c0_258] : memref<100x320xf32, #tpu.memory_space<vmem>>, vector<4x320xf32>
    tpu.vector_store %arg7[%c24_257, %c0_258], %183 {strides = array<i32>} : memref<100x320xf32, #tpu.memory_space<vmem>>, vector<4x320xf32>,
    %c0_259 = arith.constant 0 : index
    %c22_260 = arith.constant 22 : index
    %185 = vector.load %arg6[%c0_259, %c22_260] : memref<8x512xf32, #tpu.memory_space<vmem>>, vector<4x320xf32>
    %c28_261 = arith.constant 28 : index
    %c0_262 = arith.constant 0 : index
    %186 = vector.load %arg7[%c28_261, %c0_262] : memref<100x320xf32, #tpu.memory_space<vmem>>, vector<4x320xf32>
    tpu.vector_store %arg7[%c28_261, %c0_262], %185 {strides = array<i32>} : memref<100x320xf32, #tpu.memory_space<vmem>>, vector<4x320xf32>,
    %c0_263 = arith.constant 0 : index
    %c23_264 = arith.constant 23 : index
    %187 = vector.load %arg6[%c0_263, %c23_264] : memref<8x512xf32, #tpu.memory_space<vmem>>, vector<4x320xf32>
    %c32_265 = arith.constant 32 : index
    %c0_266 = arith.constant 0 : index
    %188 = vector.load %arg7[%c32_265, %c0_266] : memref<100x320xf32, #tpu.memory_space<vmem>>, vector<4x320xf32>
    tpu.vector_store %arg7[%c32_265, %c0_266], %187 {strides = array<i32>} : memref<100x320xf32, #tpu.memory_space<vmem>>, vector<4x320xf32>,
    %c0_267 = arith.constant 0 : index
    %c24_268 = arith.constant 24 : index
    %189 = vector.load %arg6[%c0_267, %c24_268] : memref<8x512xf32, #tpu.memory_space<vmem>>, vector<4x320xf32>
    %c36_269 = arith.constant 36 : index
    %c0_270 = arith.constant 0 : index
    %190 = vector.load %arg7[%c36_269, %c0_270] : memref<100x320xf32, #tpu.memory_space<vmem>>, vector<4x320xf32>
    tpu.vector_store %arg7[%c36_269, %c0_270], %189 {strides = array<i32>} : memref<100x320xf32, #tpu.memory_space<vmem>>, vector<4x320xf32>,
    %c0_271 = arith.constant 0 : index
    %c40_272 = arith.constant 40 : index
    %191 = vector.load %arg6[%c0_271, %c40_272] : memref<8x512xf32, #tpu.memory_space<vmem>>, vector<4x320xf32>
    %c40_273 = arith.constant 40 : index
    %c0_274 = arith.constant 0 : index
    %192 = vector.load %arg7[%c40_273, %c0_274] : memref<100x320xf32, #tpu.memory_space<vmem>>, vector<4x320xf32>
    tpu.vector_store %arg7[%c40_273, %c0_274], %191 {strides = array<i32>} : memref<100x320xf32, #tpu.memory_space<vmem>>, vector<4x320xf32>,
    %c0_275 = arith.constant 0 : index
    %c41_276 = arith.constant 41 : index
    %193 = vector.load %arg6[%c0_275, %c41_276] : memref<8x512xf32, #tpu.memory_space<vmem>>, vector<4x320xf32>
    %c44_277 = arith.constant 44 : index
    %c0_278 = arith.constant 0 : index
    %194 = vector.load %arg7[%c44_277, %c0_278] : memref<100x320xf32, #tpu.memory_space<vmem>>, vector<4x320xf32>
    tpu.vector_store %arg7[%c44_277, %c0_278], %193 {strides = array<i32>} : memref<100x320xf32, #tpu.memory_space<vmem>>, vector<4x320xf32>,
    %c0_279 = arith.constant 0 : index
    %c42_280 = arith.constant 42 : index
    %195 = vector.load %arg6[%c0_279, %c42_280] : memref<8x512xf32, #tpu.memory_space<vmem>>, vector<4x320xf32>
    %c48_281 = arith.constant 48 : index
    %c0_282 = arith.constant 0 : index
    %196 = vector.load %arg7[%c48_281, %c0_282] : memref<100x320xf32, #tpu.memory_space<vmem>>, vector<4x320xf32>
    tpu.vector_store %arg7[%c48_281, %c0_282], %195 {strides = array<i32>} : memref<100x320xf32, #tpu.memory_space<vmem>>, vector<4x320xf32>,
    %c0_283 = arith.constant 0 : index
    %c43_284 = arith.constant 43 : index
    %197 = vector.load %arg6[%c0_283, %c43_284] : memref<8x512xf32, #tpu.memory_space<vmem>>, vector<4x320xf32>
    %c52_285 = arith.constant 52 : index
    %c0_286 = arith.constant 0 : index
    %198 = vector.load %arg7[%c52_285, %c0_286] : memref<100x320xf32, #tpu.memory_space<vmem>>, vector<4x320xf32>
    tpu.vector_store %arg7[%c52_285, %c0_286], %197 {strides = array<i32>} : memref<100x320xf32, #tpu.memory_space<vmem>>, vector<4x320xf32>,
    %c0_287 = arith.constant 0 : index
    %c44_288 = arith.constant 44 : index
    %199 = vector.load %arg6[%c0_287, %c44_288] : memref<8x512xf32, #tpu.memory_space<vmem>>, vector<4x320xf32>
    %c56_289 = arith.constant 56 : index
    %c0_290 = arith.constant 0 : index
    %200 = vector.load %arg7[%c56_289, %c0_290] : memref<100x320xf32, #tpu.memory_space<vmem>>, vector<4x320xf32>
    tpu.vector_store %arg7[%c56_289, %c0_290], %199 {strides = array<i32>} : memref<100x320xf32, #tpu.memory_space<vmem>>, vector<4x320xf32>,
    %c0_291 = arith.constant 0 : index
    %c60_292 = arith.constant 60 : index
    %201 = vector.load %arg6[%c0_291, %c60_292] : memref<8x512xf32, #tpu.memory_space<vmem>>, vector<4x320xf32>
    %c60_293 = arith.constant 60 : index
    %c0_294 = arith.constant 0 : index
    %202 = vector.load %arg7[%c60_293, %c0_294] : memref<100x320xf32, #tpu.memory_space<vmem>>, vector<4x320xf32>
    tpu.vector_store %arg7[%c60_293, %c0_294], %201 {strides = array<i32>} : memref<100x320xf32, #tpu.memory_space<vmem>>, vector<4x320xf32>,
    %c0_295 = arith.constant 0 : index
    %c61_296 = arith.constant 61 : index
    %203 = vector.load %arg6[%c0_295, %c61_296] : memref<8x512xf32, #tpu.memory_space<vmem>>, vector<4x320xf32>
    %c64_297 = arith.constant 64 : index
    %c0_298 = arith.constant 0 : index
    %204 = vector.load %arg7[%c64_297, %c0_298] : memref<100x320xf32, #tpu.memory_space<vmem>>, vector<4x320xf32>
    tpu.vector_store %arg7[%c64_297, %c0_298], %203 {strides = array<i32>} : memref<100x320xf32, #tpu.memory_space<vmem>>, vector<4x320xf32>,
    %c0_299 = arith.constant 0 : index
    %c62_300 = arith.constant 62 : index
    %205 = vector.load %arg6[%c0_299, %c62_300] : memref<8x512xf32, #tpu.memory_space<vmem>>, vector<4x320xf32>
    %c68_301 = arith.constant 68 : index
    %c0_302 = arith.constant 0 : index
    %206 = vector.load %arg7[%c68_301, %c0_302] : memref<100x320xf32, #tpu.memory_space<vmem>>, vector<4x320xf32>
    tpu.vector_store %arg7[%c68_301, %c0_302], %205 {strides = array<i32>} : memref<100x320xf32, #tpu.memory_space<vmem>>, vector<4x320xf32>,
    %c0_303 = arith.constant 0 : index
    %c63_304 = arith.constant 63 : index
    %207 = vector.load %arg6[%c0_303, %c63_304] : memref<8x512xf32, #tpu.memory_space<vmem>>, vector<4x320xf32>
    %c72_305 = arith.constant 72 : index
    %c0_306 = arith.constant 0 : index
    %208 = vector.load %arg7[%c72_305, %c0_306] : memref<100x320xf32, #tpu.memory_space<vmem>>, vector<4x320xf32>
    tpu.vector_store %arg7[%c72_305, %c0_306], %207 {strides = array<i32>} : memref<100x320xf32, #tpu.memory_space<vmem>>, vector<4x320xf32>,
    %c0_307 = arith.constant 0 : index
    %c64_308 = arith.constant 64 : index
    %209 = vector.load %arg6[%c0_307, %c64_308] : memref<8x512xf32, #tpu.memory_space<vmem>>, vector<4x320xf32>
    %c76_309 = arith.constant 76 : index
    %c0_310 = arith.constant 0 : index
    %210 = vector.load %arg7[%c76_309, %c0_310] : memref<100x320xf32, #tpu.memory_space<vmem>>, vector<4x320xf32>
    tpu.vector_store %arg7[%c76_309, %c0_310], %209 {strides = array<i32>} : memref<100x320xf32, #tpu.memory_space<vmem>>, vector<4x320xf32>,
    %c0_311 = arith.constant 0 : index
    %c80_312 = arith.constant 80 : index
    %211 = vector.load %arg6[%c0_311, %c80_312] : memref<8x512xf32, #tpu.memory_space<vmem>>, vector<4x320xf32>
    %c80_313 = arith.constant 80 : index
    %c0_314 = arith.constant 0 : index
    %212 = vector.load %arg7[%c80_313, %c0_314] : memref<100x320xf32, #tpu.memory_space<vmem>>, vector<4x320xf32>
    tpu.vector_store %arg7[%c80_313, %c0_314], %211 {strides = array<i32>} : memref<100x320xf32, #tpu.memory_space<vmem>>, vector<4x320xf32>,
    %c0_315 = arith.constant 0 : index
    %c81_316 = arith.constant 81 : index
    %213 = vector.load %arg6[%c0_315, %c81_316] : memref<8x512xf32, #tpu.memory_space<vmem>>, vector<4x320xf32>
    %c84_317 = arith.constant 84 : index
    %c0_318 = arith.constant 0 : index
    %214 = vector.load %arg7[%c84_317, %c0_318] : memref<100x320xf32, #tpu.memory_space<vmem>>, vector<4x320xf32>
    tpu.vector_store %arg7[%c84_317, %c0_318], %213 {strides = array<i32>} : memref<100x320xf32, #tpu.memory_space<vmem>>, vector<4x320xf32>,
    %c0_319 = arith.constant 0 : index
    %c82_320 = arith.constant 82 : index
    %215 = vector.load %arg6[%c0_319, %c82_320] : memref<8x512xf32, #tpu.memory_space<vmem>>, vector<4x320xf32>
    %c88_321 = arith.constant 88 : index
    %c0_322 = arith.constant 0 : index
    %216 = vector.load %arg7[%c88_321, %c0_322] : memref<100x320xf32, #tpu.memory_space<vmem>>, vector<4x320xf32>
    tpu.vector_store %arg7[%c88_321, %c0_322], %215 {strides = array<i32>} : memref<100x320xf32, #tpu.memory_space<vmem>>, vector<4x320xf32>,
    %c0_323 = arith.constant 0 : index
    %c83_324 = arith.constant 83 : index
    %217 = vector.load %arg6[%c0_323, %c83_324] : memref<8x512xf32, #tpu.memory_space<vmem>>, vector<4x320xf32>
    %c92_325 = arith.constant 92 : index
    %c0_326 = arith.constant 0 : index
    %218 = vector.load %arg7[%c92_325, %c0_326] : memref<100x320xf32, #tpu.memory_space<vmem>>, vector<4x320xf32>
    tpu.vector_store %arg7[%c92_325, %c0_326], %217 {strides = array<i32>} : memref<100x320xf32, #tpu.memory_space<vmem>>, vector<4x320xf32>,
    %c0_327 = arith.constant 0 : index
    %c84_328 = arith.constant 84 : index
    %219 = vector.load %arg6[%c0_327, %c84_328] : memref<8x512xf32, #tpu.memory_space<vmem>>, vector<4x320xf32>
    %c96_329 = arith.constant 96 : index
    %c0_330 = arith.constant 0 : index
    %220 = vector.load %arg7[%c96_329, %c0_330] : memref<100x320xf32, #tpu.memory_space<vmem>>, vector<4x320xf32>
    tpu.vector_store %arg7[%c96_329, %c0_330], %219 {strides = array<i32>} : memref<100x320xf32, #tpu.memory_space<vmem>>, vector<4x320xf32>,
    %c0_331 = arith.constant 0 : index
    %c0_332 = arith.constant 0 : index
    %221 = vector.load %arg3[%c0_331, %c0_332] : memref<4x100xf32, #tpu.memory_space<vmem>>, vector<4x100xf32>
    %c0_333 = arith.constant 0 : index
    %c0_334 = arith.constant 0 : index
    %222 = vector.load %arg7[%c0_333, %c0_334] : memref<100x320xf32, #tpu.memory_space<vmem>>, vector<100x320xf32>
    %cst_335 = arith.constant dense<0.000000e+00> : vector<4x320xf32>
    %223 = tpu.matmul %221, %222, %cst_335 {dimension_numbers = #tpu.dot_dimension_numbers<[1], [0], [0], [1], [0, 0, 1, 1], [], []>} : vector<4x100xf32>, vector<100x320xf32>, vector<4x320xf32> -> vector<4x320xf32>
    %c0_336 = arith.constant 0 : index
    %c0_337 = arith.constant 0 : index
    %224 = vector.load %arg8[%c0_336, %c0_337] : memref<8x320xf32, #tpu.memory_space<vmem>>, vector<4x320xf32>
    tpu.vector_store %arg8[%c0_336, %c0_337], %223 {strides = array<i32>} : memref<8x320xf32, #tpu.memory_space<vmem>>, vector<4x320xf32>,
    %c4_338 = arith.constant 4 : index
    %c0_339 = arith.constant 0 : index
    %225 = vector.load %arg6[%c4_338, %c0_339] : memref<8x512xf32, #tpu.memory_space<vmem>>, vector<4x320xf32>
    %c0_340 = arith.constant 0 : index
    %c0_341 = arith.constant 0 : index
    %226 = vector.load %arg7[%c0_340, %c0_341] : memref<100x320xf32, #tpu.memory_space<vmem>>, vector<4x320xf32>
    tpu.vector_store %arg7[%c0_340, %c0_341], %225 {strides = array<i32>} : memref<100x320xf32, #tpu.memory_space<vmem>>, vector<4x320xf32>,
    %c4_342 = arith.constant 4 : index
    %c1_343 = arith.constant 1 : index
    %227 = vector.load %arg6[%c4_342, %c1_343] : memref<8x512xf32, #tpu.memory_space<vmem>>, vector<4x320xf32>
    %c4_344 = arith.constant 4 : index
    %c0_345 = arith.constant 0 : index
    %228 = vector.load %arg7[%c4_344, %c0_345] : memref<100x320xf32, #tpu.memory_space<vmem>>, vector<4x320xf32>
    tpu.vector_store %arg7[%c4_344, %c0_345], %227 {strides = array<i32>} : memref<100x320xf32, #tpu.memory_space<vmem>>, vector<4x320xf32>,
    %c4_346 = arith.constant 4 : index
    %c2_347 = arith.constant 2 : index
    %229 = vector.load %arg6[%c4_346, %c2_347] : memref<8x512xf32, #tpu.memory_space<vmem>>, vector<4x320xf32>
    %c8_348 = arith.constant 8 : index
    %c0_349 = arith.constant 0 : index
    %230 = vector.load %arg7[%c8_348, %c0_349] : memref<100x320xf32, #tpu.memory_space<vmem>>, vector<4x320xf32>
    tpu.vector_store %arg7[%c8_348, %c0_349], %229 {strides = array<i32>} : memref<100x320xf32, #tpu.memory_space<vmem>>, vector<4x320xf32>,
    %c4_350 = arith.constant 4 : index
    %c3_351 = arith.constant 3 : index
    %231 = vector.load %arg6[%c4_350, %c3_351] : memref<8x512xf32, #tpu.memory_space<vmem>>, vector<4x320xf32>
    %c12_352 = arith.constant 12 : index
    %c0_353 = arith.constant 0 : index
    %232 = vector.load %arg7[%c12_352, %c0_353] : memref<100x320xf32, #tpu.memory_space<vmem>>, vector<4x320xf32>
    tpu.vector_store %arg7[%c12_352, %c0_353], %231 {strides = array<i32>} : memref<100x320xf32, #tpu.memory_space<vmem>>, vector<4x320xf32>,
    %c4_354 = arith.constant 4 : index
    %c4_355 = arith.constant 4 : index
    %233 = vector.load %arg6[%c4_354, %c4_355] : memref<8x512xf32, #tpu.memory_space<vmem>>, vector<4x320xf32>
    %c16_356 = arith.constant 16 : index
    %c0_357 = arith.constant 0 : index
    %234 = vector.load %arg7[%c16_356, %c0_357] : memref<100x320xf32, #tpu.memory_space<vmem>>, vector<4x320xf32>
    tpu.vector_store %arg7[%c16_356, %c0_357], %233 {strides = array<i32>} : memref<100x320xf32, #tpu.memory_space<vmem>>, vector<4x320xf32>,
    %c4_358 = arith.constant 4 : index
    %c20_359 = arith.constant 20 : index
    %235 = vector.load %arg6[%c4_358, %c20_359] : memref<8x512xf32, #tpu.memory_space<vmem>>, vector<4x320xf32>
    %c20_360 = arith.constant 20 : index
    %c0_361 = arith.constant 0 : index
    %236 = vector.load %arg7[%c20_360, %c0_361] : memref<100x320xf32, #tpu.memory_space<vmem>>, vector<4x320xf32>
    tpu.vector_store %arg7[%c20_360, %c0_361], %235 {strides = array<i32>} : memref<100x320xf32, #tpu.memory_space<vmem>>, vector<4x320xf32>,
    %c4_362 = arith.constant 4 : index
    %c21_363 = arith.constant 21 : index
    %237 = vector.load %arg6[%c4_362, %c21_363] : memref<8x512xf32, #tpu.memory_space<vmem>>, vector<4x320xf32>
    %c24_364 = arith.constant 24 : index
    %c0_365 = arith.constant 0 : index
    %238 = vector.load %arg7[%c24_364, %c0_365] : memref<100x320xf32, #tpu.memory_space<vmem>>, vector<4x320xf32>
    tpu.vector_store %arg7[%c24_364, %c0_365], %237 {strides = array<i32>} : memref<100x320xf32, #tpu.memory_space<vmem>>, vector<4x320xf32>,
    %c4_366 = arith.constant 4 : index
    %c22_367 = arith.constant 22 : index
    %239 = vector.load %arg6[%c4_366, %c22_367] : memref<8x512xf32, #tpu.memory_space<vmem>>, vector<4x320xf32>
    %c28_368 = arith.constant 28 : index
    %c0_369 = arith.constant 0 : index
    %240 = vector.load %arg7[%c28_368, %c0_369] : memref<100x320xf32, #tpu.memory_space<vmem>>, vector<4x320xf32>
    tpu.vector_store %arg7[%c28_368, %c0_369], %239 {strides = array<i32>} : memref<100x320xf32, #tpu.memory_space<vmem>>, vector<4x320xf32>,
    %c4_370 = arith.constant 4 : index
    %c23_371 = arith.constant 23 : index
    %241 = vector.load %arg6[%c4_370, %c23_371] : memref<8x512xf32, #tpu.memory_space<vmem>>, vector<4x320xf32>
    %c32_372 = arith.constant 32 : index
    %c0_373 = arith.constant 0 : index
    %242 = vector.load %arg7[%c32_372, %c0_373] : memref<100x320xf32, #tpu.memory_space<vmem>>, vector<4x320xf32>
    tpu.vector_store %arg7[%c32_372, %c0_373], %241 {strides = array<i32>} : memref<100x320xf32, #tpu.memory_space<vmem>>, vector<4x320xf32>,
    %c4_374 = arith.constant 4 : index
    %c24_375 = arith.constant 24 : index
    %243 = vector.load %arg6[%c4_374, %c24_375] : memref<8x512xf32, #tpu.memory_space<vmem>>, vector<4x320xf32>
    %c36_376 = arith.constant 36 : index
    %c0_377 = arith.constant 0 : index
    %244 = vector.load %arg7[%c36_376, %c0_377] : memref<100x320xf32, #tpu.memory_space<vmem>>, vector<4x320xf32>
    tpu.vector_store %arg7[%c36_376, %c0_377], %243 {strides = array<i32>} : memref<100x320xf32, #tpu.memory_space<vmem>>, vector<4x320xf32>,
    %c4_378 = arith.constant 4 : index
    %c40_379 = arith.constant 40 : index
    %245 = vector.load %arg6[%c4_378, %c40_379] : memref<8x512xf32, #tpu.memory_space<vmem>>, vector<4x320xf32>
    %c40_380 = arith.constant 40 : index
    %c0_381 = arith.constant 0 : index
    %246 = vector.load %arg7[%c40_380, %c0_381] : memref<100x320xf32, #tpu.memory_space<vmem>>, vector<4x320xf32>
    tpu.vector_store %arg7[%c40_380, %c0_381], %245 {strides = array<i32>} : memref<100x320xf32, #tpu.memory_space<vmem>>, vector<4x320xf32>,
    %c4_382 = arith.constant 4 : index
    %c41_383 = arith.constant 41 : index
    %247 = vector.load %arg6[%c4_382, %c41_383] : memref<8x512xf32, #tpu.memory_space<vmem>>, vector<4x320xf32>
    %c44_384 = arith.constant 44 : index
    %c0_385 = arith.constant 0 : index
    %248 = vector.load %arg7[%c44_384, %c0_385] : memref<100x320xf32, #tpu.memory_space<vmem>>, vector<4x320xf32>
    tpu.vector_store %arg7[%c44_384, %c0_385], %247 {strides = array<i32>} : memref<100x320xf32, #tpu.memory_space<vmem>>, vector<4x320xf32>,
    %c4_386 = arith.constant 4 : index
    %c42_387 = arith.constant 42 : index
    %249 = vector.load %arg6[%c4_386, %c42_387] : memref<8x512xf32, #tpu.memory_space<vmem>>, vector<4x320xf32>
    %c48_388 = arith.constant 48 : index
    %c0_389 = arith.constant 0 : index
    %250 = vector.load %arg7[%c48_388, %c0_389] : memref<100x320xf32, #tpu.memory_space<vmem>>, vector<4x320xf32>
    tpu.vector_store %arg7[%c48_388, %c0_389], %249 {strides = array<i32>} : memref<100x320xf32, #tpu.memory_space<vmem>>, vector<4x320xf32>,
    %c4_390 = arith.constant 4 : index
    %c43_391 = arith.constant 43 : index
    %251 = vector.load %arg6[%c4_390, %c43_391] : memref<8x512xf32, #tpu.memory_space<vmem>>, vector<4x320xf32>
    %c52_392 = arith.constant 52 : index
    %c0_393 = arith.constant 0 : index
    %252 = vector.load %arg7[%c52_392, %c0_393] : memref<100x320xf32, #tpu.memory_space<vmem>>, vector<4x320xf32>
    tpu.vector_store %arg7[%c52_392, %c0_393], %251 {strides = array<i32>} : memref<100x320xf32, #tpu.memory_space<vmem>>, vector<4x320xf32>,
    %c4_394 = arith.constant 4 : index
    %c44_395 = arith.constant 44 : index
    %253 = vector.load %arg6[%c4_394, %c44_395] : memref<8x512xf32, #tpu.memory_space<vmem>>, vector<4x320xf32>
    %c56_396 = arith.constant 56 : index
    %c0_397 = arith.constant 0 : index
    %254 = vector.load %arg7[%c56_396, %c0_397] : memref<100x320xf32, #tpu.memory_space<vmem>>, vector<4x320xf32>
    tpu.vector_store %arg7[%c56_396, %c0_397], %253 {strides = array<i32>} : memref<100x320xf32, #tpu.memory_space<vmem>>, vector<4x320xf32>,
    %c4_398 = arith.constant 4 : index
    %c60_399 = arith.constant 60 : index
    %255 = vector.load %arg6[%c4_398, %c60_399] : memref<8x512xf32, #tpu.memory_space<vmem>>, vector<4x320xf32>
    %c60_400 = arith.constant 60 : index
    %c0_401 = arith.constant 0 : index
    %256 = vector.load %arg7[%c60_400, %c0_401] : memref<100x320xf32, #tpu.memory_space<vmem>>, vector<4x320xf32>
    tpu.vector_store %arg7[%c60_400, %c0_401], %255 {strides = array<i32>} : memref<100x320xf32, #tpu.memory_space<vmem>>, vector<4x320xf32>,
    %c4_402 = arith.constant 4 : index
    %c61_403 = arith.constant 61 : index
    %257 = vector.load %arg6[%c4_402, %c61_403] : memref<8x512xf32, #tpu.memory_space<vmem>>, vector<4x320xf32>
    %c64_404 = arith.constant 64 : index
    %c0_405 = arith.constant 0 : index
    %258 = vector.load %arg7[%c64_404, %c0_405] : memref<100x320xf32, #tpu.memory_space<vmem>>, vector<4x320xf32>
    tpu.vector_store %arg7[%c64_404, %c0_405], %257 {strides = array<i32>} : memref<100x320xf32, #tpu.memory_space<vmem>>, vector<4x320xf32>,
    %c4_406 = arith.constant 4 : index
    %c62_407 = arith.constant 62 : index
    %259 = vector.load %arg6[%c4_406, %c62_407] : memref<8x512xf32, #tpu.memory_space<vmem>>, vector<4x320xf32>
    %c68_408 = arith.constant 68 : index
    %c0_409 = arith.constant 0 : index
    %260 = vector.load %arg7[%c68_408, %c0_409] : memref<100x320xf32, #tpu.memory_space<vmem>>, vector<4x320xf32>
    tpu.vector_store %arg7[%c68_408, %c0_409], %259 {strides = array<i32>} : memref<100x320xf32, #tpu.memory_space<vmem>>, vector<4x320xf32>,
    %c4_410 = arith.constant 4 : index
    %c63_411 = arith.constant 63 : index
    %261 = vector.load %arg6[%c4_410, %c63_411] : memref<8x512xf32, #tpu.memory_space<vmem>>, vector<4x320xf32>
    %c72_412 = arith.constant 72 : index
    %c0_413 = arith.constant 0 : index
    %262 = vector.load %arg7[%c72_412, %c0_413] : memref<100x320xf32, #tpu.memory_space<vmem>>, vector<4x320xf32>
    tpu.vector_store %arg7[%c72_412, %c0_413], %261 {strides = array<i32>} : memref<100x320xf32, #tpu.memory_space<vmem>>, vector<4x320xf32>,
    %c4_414 = arith.constant 4 : index
    %c64_415 = arith.constant 64 : index
    %263 = vector.load %arg6[%c4_414, %c64_415] : memref<8x512xf32, #tpu.memory_space<vmem>>, vector<4x320xf32>
    %c76_416 = arith.constant 76 : index
    %c0_417 = arith.constant 0 : index
    %264 = vector.load %arg7[%c76_416, %c0_417] : memref<100x320xf32, #tpu.memory_space<vmem>>, vector<4x320xf32>
    tpu.vector_store %arg7[%c76_416, %c0_417], %263 {strides = array<i32>} : memref<100x320xf32, #tpu.memory_space<vmem>>, vector<4x320xf32>,
    %c4_418 = arith.constant 4 : index
    %c80_419 = arith.constant 80 : index
    %265 = vector.load %arg6[%c4_418, %c80_419] : memref<8x512xf32, #tpu.memory_space<vmem>>, vector<4x320xf32>
    %c80_420 = arith.constant 80 : index
    %c0_421 = arith.constant 0 : index
    %266 = vector.load %arg7[%c80_420, %c0_421] : memref<100x320xf32, #tpu.memory_space<vmem>>, vector<4x320xf32>
    tpu.vector_store %arg7[%c80_420, %c0_421], %265 {strides = array<i32>} : memref<100x320xf32, #tpu.memory_space<vmem>>, vector<4x320xf32>,
    %c4_422 = arith.constant 4 : index
    %c81_423 = arith.constant 81 : index
    %267 = vector.load %arg6[%c4_422, %c81_423] : memref<8x512xf32, #tpu.memory_space<vmem>>, vector<4x320xf32>
    %c84_424 = arith.constant 84 : index
    %c0_425 = arith.constant 0 : index
    %268 = vector.load %arg7[%c84_424, %c0_425] : memref<100x320xf32, #tpu.memory_space<vmem>>, vector<4x320xf32>
    tpu.vector_store %arg7[%c84_424, %c0_425], %267 {strides = array<i32>} : memref<100x320xf32, #tpu.memory_space<vmem>>, vector<4x320xf32>,
    %c4_426 = arith.constant 4 : index
    %c82_427 = arith.constant 82 : index
    %269 = vector.load %arg6[%c4_426, %c82_427] : memref<8x512xf32, #tpu.memory_space<vmem>>, vector<4x320xf32>
    %c88_428 = arith.constant 88 : index
    %c0_429 = arith.constant 0 : index
    %270 = vector.load %arg7[%c88_428, %c0_429] : memref<100x320xf32, #tpu.memory_space<vmem>>, vector<4x320xf32>
    tpu.vector_store %arg7[%c88_428, %c0_429], %269 {strides = array<i32>} : memref<100x320xf32, #tpu.memory_space<vmem>>, vector<4x320xf32>,
    %c4_430 = arith.constant 4 : index
    %c83_431 = arith.constant 83 : index
    %271 = vector.load %arg6[%c4_430, %c83_431] : memref<8x512xf32, #tpu.memory_space<vmem>>, vector<4x320xf32>
    %c92_432 = arith.constant 92 : index
    %c0_433 = arith.constant 0 : index
    %272 = vector.load %arg7[%c92_432, %c0_433] : memref<100x320xf32, #tpu.memory_space<vmem>>, vector<4x320xf32>
    tpu.vector_store %arg7[%c92_432, %c0_433], %271 {strides = array<i32>} : memref<100x320xf32, #tpu.memory_space<vmem>>, vector<4x320xf32>,
    %c4_434 = arith.constant 4 : index
    %c84_435 = arith.constant 84 : index
    %273 = vector.load %arg6[%c4_434, %c84_435] : memref<8x512xf32, #tpu.memory_space<vmem>>, vector<4x320xf32>
    %c96_436 = arith.constant 96 : index
    %c0_437 = arith.constant 0 : index
    %274 = vector.load %arg7[%c96_436, %c0_437] : memref<100x320xf32, #tpu.memory_space<vmem>>, vector<4x320xf32>
    tpu.vector_store %arg7[%c96_436, %c0_437], %273 {strides = array<i32>} : memref<100x320xf32, #tpu.memory_space<vmem>>, vector<4x320xf32>,
    %c0_438 = arith.constant 0 : index
    %c0_439 = arith.constant 0 : index
    %275 = vector.load %arg3[%c0_438, %c0_439] : memref<4x100xf32, #tpu.memory_space<vmem>>, vector<4x100xf32>
    %c0_440 = arith.constant 0 : index
    %c0_441 = arith.constant 0 : index
    %276 = vector.load %arg7[%c0_440, %c0_441] : memref<100x320xf32, #tpu.memory_space<vmem>>, vector<100x320xf32>
    %cst_442 = arith.constant dense<0.000000e+00> : vector<4x320xf32>
    %277 = tpu.matmul %275, %276, %cst_442 {dimension_numbers = #tpu.dot_dimension_numbers<[1], [0], [0], [1], [0, 0, 1, 1], [], []>} : vector<4x100xf32>, vector<100x320xf32>, vector<4x320xf32> -> vector<4x320xf32>
    %c4_443 = arith.constant 4 : index
    %c0_444 = arith.constant 0 : index
    %278 = vector.load %arg8[%c4_443, %c0_444] : memref<8x320xf32, #tpu.memory_space<vmem>>, vector<4x320xf32>
    tpu.vector_store %arg8[%c4_443, %c0_444], %277 {strides = array<i32>} : memref<8x320xf32, #tpu.memory_space<vmem>>, vector<4x320xf32>,
    %c0_445 = arith.constant 0 : index
    %c0_446 = arith.constant 0 : index
    %279 = vector.load %arg8[%c0_445, %c0_446] : memref<8x320xf32, #tpu.memory_space<vmem>>, vector<8x320xf32>
    %280 = vector.broadcast %0 : vector<1x320xf32> to vector<8x320xf32>
    %281 = arith.mulf %279, %280 : vector<8x320xf32>
    %cst_447 = arith.constant dense<0.000000e+00> : vector<8xf32>
    %282 = vector.multi_reduction <add>, %281, %cst_447 [1] : vector<8x320xf32> to vector<8xf32>
    %283 = vector.shape_cast %282 : vector<8xf32> to vector<8x1xf32>
    %cst_448 = arith.constant 3.906250e-03 : f32
    %284 = vector.broadcast %cst_448 : f32 to vector<8x1xf32>
    %285 = arith.mulf %283, %284 : vector<8x1xf32>
    %286 = arith.mulf %281, %281 : vector<8x320xf32>
    %cst_449 = arith.constant dense<0.000000e+00> : vector<8xf32>
    %287 = vector.multi_reduction <add>, %286, %cst_449 [1] : vector<8x320xf32> to vector<8xf32>
    %288 = vector.shape_cast %287 : vector<8xf32> to vector<8x1xf32>
    %cst_450 = arith.constant 3.906250e-03 : f32
    %289 = vector.broadcast %cst_450 : f32 to vector<8x1xf32>
    %290 = arith.mulf %288, %289 : vector<8x1xf32>
    %291 = arith.mulf %285, %285 : vector<8x1xf32>
    %292 = arith.subf %290, %291 : vector<8x1xf32>
    %cst_451 = arith.constant 0.000000e+00 : f32
    %293 = vector.broadcast %cst_451 : f32 to vector<8x1xf32>
    %294 = arith.maximumf %292, %293 : vector<8x1xf32>
    %cst_452 = arith.constant 9.99999974E-6 : f32
    %295 = vector.broadcast %cst_452 : f32 to vector<8x1xf32>
    %296 = arith.addf %294, %295 : vector<8x1xf32>
    %297 = math.rsqrt %296 : vector<8x1xf32>
    %298 = vector.broadcast %285 : vector<8x1xf32> to vector<8x320xf32>
    %299 = arith.subf %279, %298 : vector<8x320xf32>
    %300 = vector.broadcast %297 : vector<8x1xf32> to vector<8x320xf32>
    %301 = arith.mulf %299, %300 : vector<8x320xf32>
    %302 = vector.extract_strided_slice %301 {offsets = [0, 0], sizes = [8, 16], strides = [1, 1]} : vector<8x320xf32> to vector<8x16xf32>
    %c0_453 = arith.constant 0 : index
    %c0_454 = arith.constant 0 : index
    %303 = vector.load %arg1[%c0_453, %c0_454] : memref<8x256xf32, #tpu.memory_space<vmem>>, vector<8x16xf32>
    %304 = arith.addf %302, %303 : vector<8x16xf32>
    %cst_455 = arith.constant 0.000000e+00 : f32
    %305 = vector.broadcast %cst_455 : f32 to vector<8x16xf32>
    %306 = arith.maximumf %304, %305 : vector<8x16xf32>
    %c0_456 = arith.constant 0 : index
    %c0_457 = arith.constant 0 : index
    %307 = vector.load %arg5[%c0_456, %c0_457] : memref<8x256xf32, #tpu.memory_space<vmem>>, vector<8x16xf32>
    tpu.vector_store %arg5[%c0_456, %c0_457], %306 {strides = array<i32>} : memref<8x256xf32, #tpu.memory_space<vmem>>, vector<8x16xf32>,
    %308 = vector.extract_strided_slice %301 {offsets = [0, 20], sizes = [8, 16], strides = [1, 1]} : vector<8x320xf32> to vector<8x16xf32>
    %c0_458 = arith.constant 0 : index
    %c16_459 = arith.constant 16 : index
    %309 = vector.load %arg1[%c0_458, %c16_459] : memref<8x256xf32, #tpu.memory_space<vmem>>, vector<8x16xf32>
    %310 = arith.addf %308, %309 : vector<8x16xf32>
    %cst_460 = arith.constant 0.000000e+00 : f32
    %311 = vector.broadcast %cst_460 : f32 to vector<8x16xf32>
    %312 = arith.maximumf %310, %311 : vector<8x16xf32>
    %c0_461 = arith.constant 0 : index
    %c16_462 = arith.constant 16 : index
    %313 = vector.load %arg5[%c0_461, %c16_462] : memref<8x256xf32, #tpu.memory_space<vmem>>, vector<8x16xf32>
    tpu.vector_store %arg5[%c0_461, %c16_462], %312 {strides = array<i32>} : memref<8x256xf32, #tpu.memory_space<vmem>>, vector<8x16xf32>,
    %314 = vector.extract_strided_slice %301 {offsets = [0, 40], sizes = [8, 16], strides = [1, 1]} : vector<8x320xf32> to vector<8x16xf32>
    %c0_463 = arith.constant 0 : index
    %c32_464 = arith.constant 32 : index
    %315 = vector.load %arg1[%c0_463, %c32_464] : memref<8x256xf32, #tpu.memory_space<vmem>>, vector<8x16xf32>
    %316 = arith.addf %314, %315 : vector<8x16xf32>
    %cst_465 = arith.constant 0.000000e+00 : f32
    %317 = vector.broadcast %cst_465 : f32 to vector<8x16xf32>
    %318 = arith.maximumf %316, %317 : vector<8x16xf32>
    %c0_466 = arith.constant 0 : index
    %c32_467 = arith.constant 32 : index
    %319 = vector.load %arg5[%c0_466, %c32_467] : memref<8x256xf32, #tpu.memory_space<vmem>>, vector<8x16xf32>
    tpu.vector_store %arg5[%c0_466, %c32_467], %318 {strides = array<i32>} : memref<8x256xf32, #tpu.memory_space<vmem>>, vector<8x16xf32>,
    %320 = vector.extract_strided_slice %301 {offsets = [0, 60], sizes = [8, 16], strides = [1, 1]} : vector<8x320xf32> to vector<8x16xf32>
    %c0_468 = arith.constant 0 : index
    %c48_469 = arith.constant 48 : index
    %321 = vector.load %arg1[%c0_468, %c48_469] : memref<8x256xf32, #tpu.memory_space<vmem>>, vector<8x16xf32>
    %322 = arith.addf %320, %321 : vector<8x16xf32>
    %cst_470 = arith.constant 0.000000e+00 : f32
    %323 = vector.broadcast %cst_470 : f32 to vector<8x16xf32>
    %324 = arith.maximumf %322, %323 : vector<8x16xf32>
    %c0_471 = arith.constant 0 : index
    %c48_472 = arith.constant 48 : index
    %325 = vector.load %arg5[%c0_471, %c48_472] : memref<8x256xf32, #tpu.memory_space<vmem>>, vector<8x16xf32>
    tpu.vector_store %arg5[%c0_471, %c48_472], %324 {strides = array<i32>} : memref<8x256xf32, #tpu.memory_space<vmem>>, vector<8x16xf32>,
    %326 = vector.extract_strided_slice %301 {offsets = [0, 80], sizes = [8, 16], strides = [1, 1]} : vector<8x320xf32> to vector<8x16xf32>
    %c0_473 = arith.constant 0 : index
    %c64_474 = arith.constant 64 : index
    %327 = vector.load %arg1[%c0_473, %c64_474] : memref<8x256xf32, #tpu.memory_space<vmem>>, vector<8x16xf32>
    %328 = arith.addf %326, %327 : vector<8x16xf32>
    %cst_475 = arith.constant 0.000000e+00 : f32
    %329 = vector.broadcast %cst_475 : f32 to vector<8x16xf32>
    %330 = arith.maximumf %328, %329 : vector<8x16xf32>
    %c0_476 = arith.constant 0 : index
    %c64_477 = arith.constant 64 : index
    %331 = vector.load %arg5[%c0_476, %c64_477] : memref<8x256xf32, #tpu.memory_space<vmem>>, vector<8x16xf32>
    tpu.vector_store %arg5[%c0_476, %c64_477], %330 {strides = array<i32>} : memref<8x256xf32, #tpu.memory_space<vmem>>, vector<8x16xf32>,
    %332 = vector.extract_strided_slice %301 {offsets = [0, 100], sizes = [8, 16], strides = [1, 1]} : vector<8x320xf32> to vector<8x16xf32>
    %c0_478 = arith.constant 0 : index
    %c80_479 = arith.constant 80 : index
    %333 = vector.load %arg1[%c0_478, %c80_479] : memref<8x256xf32, #tpu.memory_space<vmem>>, vector<8x16xf32>
    %334 = arith.addf %332, %333 : vector<8x16xf32>
    %cst_480 = arith.constant 0.000000e+00 : f32
    %335 = vector.broadcast %cst_480 : f32 to vector<8x16xf32>
    %336 = arith.maximumf %334, %335 : vector<8x16xf32>
    %c0_481 = arith.constant 0 : index
    %c80_482 = arith.constant 80 : index
    %337 = vector.load %arg5[%c0_481, %c80_482] : memref<8x256xf32, #tpu.memory_space<vmem>>, vector<8x16xf32>
    tpu.vector_store %arg5[%c0_481, %c80_482], %336 {strides = array<i32>} : memref<8x256xf32, #tpu.memory_space<vmem>>, vector<8x16xf32>,
    %338 = vector.extract_strided_slice %301 {offsets = [0, 120], sizes = [8, 16], strides = [1, 1]} : vector<8x320xf32> to vector<8x16xf32>
    %c0_483 = arith.constant 0 : index
    %c96_484 = arith.constant 96 : index
    %339 = vector.load %arg1[%c0_483, %c96_484] : memref<8x256xf32, #tpu.memory_space<vmem>>, vector<8x16xf32>
    %340 = arith.addf %338, %339 : vector<8x16xf32>
    %cst_485 = arith.constant 0.000000e+00 : f32
    %341 = vector.broadcast %cst_485 : f32 to vector<8x16xf32>
    %342 = arith.maximumf %340, %341 : vector<8x16xf32>
    %c0_486 = arith.constant 0 : index
    %c96_487 = arith.constant 96 : index
    %343 = vector.load %arg5[%c0_486, %c96_487] : memref<8x256xf32, #tpu.memory_space<vmem>>, vector<8x16xf32>
    tpu.vector_store %arg5[%c0_486, %c96_487], %342 {strides = array<i32>} : memref<8x256xf32, #tpu.memory_space<vmem>>, vector<8x16xf32>,
    %344 = vector.extract_strided_slice %301 {offsets = [0, 140], sizes = [8, 16], strides = [1, 1]} : vector<8x320xf32> to vector<8x16xf32>
    %c0_488 = arith.constant 0 : index
    %c112_489 = arith.constant 112 : index
    %345 = vector.load %arg1[%c0_488, %c112_489] : memref<8x256xf32, #tpu.memory_space<vmem>>, vector<8x16xf32>
    %346 = arith.addf %344, %345 : vector<8x16xf32>
    %cst_490 = arith.constant 0.000000e+00 : f32
    %347 = vector.broadcast %cst_490 : f32 to vector<8x16xf32>
    %348 = arith.maximumf %346, %347 : vector<8x16xf32>
    %c0_491 = arith.constant 0 : index
    %c112_492 = arith.constant 112 : index
    %349 = vector.load %arg5[%c0_491, %c112_492] : memref<8x256xf32, #tpu.memory_space<vmem>>, vector<8x16xf32>
    tpu.vector_store %arg5[%c0_491, %c112_492], %348 {strides = array<i32>} : memref<8x256xf32, #tpu.memory_space<vmem>>, vector<8x16xf32>,
    %350 = vector.extract_strided_slice %301 {offsets = [0, 160], sizes = [8, 16], strides = [1, 1]} : vector<8x320xf32> to vector<8x16xf32>
    %c0_493 = arith.constant 0 : index
    %c128_494 = arith.constant 128 : index
    %351 = vector.load %arg1[%c0_493, %c128_494] : memref<8x256xf32, #tpu.memory_space<vmem>>, vector<8x16xf32>
    %352 = arith.addf %350, %351 : vector<8x16xf32>
    %cst_495 = arith.constant 0.000000e+00 : f32
    %353 = vector.broadcast %cst_495 : f32 to vector<8x16xf32>
    %354 = arith.maximumf %352, %353 : vector<8x16xf32>
    %c0_496 = arith.constant 0 : index
    %c128_497 = arith.constant 128 : index
    %355 = vector.load %arg5[%c0_496, %c128_497] : memref<8x256xf32, #tpu.memory_space<vmem>>, vector<8x16xf32>
    tpu.vector_store %arg5[%c0_496, %c128_497], %354 {strides = array<i32>} : memref<8x256xf32, #tpu.memory_space<vmem>>, vector<8x16xf32>,
    %356 = vector.extract_strided_slice %301 {offsets = [0, 180], sizes = [8, 16], strides = [1, 1]} : vector<8x320xf32> to vector<8x16xf32>
    %c0_498 = arith.constant 0 : index
    %c144_499 = arith.constant 144 : index
    %357 = vector.load %arg1[%c0_498, %c144_499] : memref<8x256xf32, #tpu.memory_space<vmem>>, vector<8x16xf32>
    %358 = arith.addf %356, %357 : vector<8x16xf32>
    %cst_500 = arith.constant 0.000000e+00 : f32
    %359 = vector.broadcast %cst_500 : f32 to vector<8x16xf32>
    %360 = arith.maximumf %358, %359 : vector<8x16xf32>
    %c0_501 = arith.constant 0 : index
    %c144_502 = arith.constant 144 : index
    %361 = vector.load %arg5[%c0_501, %c144_502] : memref<8x256xf32, #tpu.memory_space<vmem>>, vector<8x16xf32>
    tpu.vector_store %arg5[%c0_501, %c144_502], %360 {strides = array<i32>} : memref<8x256xf32, #tpu.memory_space<vmem>>, vector<8x16xf32>,
    %362 = vector.extract_strided_slice %301 {offsets = [0, 200], sizes = [8, 16], strides = [1, 1]} : vector<8x320xf32> to vector<8x16xf32>
    %c0_503 = arith.constant 0 : index
    %c160_504 = arith.constant 160 : index
    %363 = vector.load %arg1[%c0_503, %c160_504] : memref<8x256xf32, #tpu.memory_space<vmem>>, vector<8x16xf32>
    %364 = arith.addf %362, %363 : vector<8x16xf32>
    %cst_505 = arith.constant 0.000000e+00 : f32
    %365 = vector.broadcast %cst_505 : f32 to vector<8x16xf32>
    %366 = arith.maximumf %364, %365 : vector<8x16xf32>
    %c0_506 = arith.constant 0 : index
    %c160_507 = arith.constant 160 : index
    %367 = vector.load %arg5[%c0_506, %c160_507] : memref<8x256xf32, #tpu.memory_space<vmem>>, vector<8x16xf32>
    tpu.vector_store %arg5[%c0_506, %c160_507], %366 {strides = array<i32>} : memref<8x256xf32, #tpu.memory_space<vmem>>, vector<8x16xf32>,
    %368 = vector.extract_strided_slice %301 {offsets = [0, 220], sizes = [8, 16], strides = [1, 1]} : vector<8x320xf32> to vector<8x16xf32>
    %c0_508 = arith.constant 0 : index
    %c176_509 = arith.constant 176 : index
    %369 = vector.load %arg1[%c0_508, %c176_509] : memref<8x256xf32, #tpu.memory_space<vmem>>, vector<8x16xf32>
    %370 = arith.addf %368, %369 : vector<8x16xf32>
    %cst_510 = arith.constant 0.000000e+00 : f32
    %371 = vector.broadcast %cst_510 : f32 to vector<8x16xf32>
    %372 = arith.maximumf %370, %371 : vector<8x16xf32>
    %c0_511 = arith.constant 0 : index
    %c176_512 = arith.constant 176 : index
    %373 = vector.load %arg5[%c0_511, %c176_512] : memref<8x256xf32, #tpu.memory_space<vmem>>, vector<8x16xf32>
    tpu.vector_store %arg5[%c0_511, %c176_512], %372 {strides = array<i32>} : memref<8x256xf32, #tpu.memory_space<vmem>>, vector<8x16xf32>,
    %374 = vector.extract_strided_slice %301 {offsets = [0, 240], sizes = [8, 16], strides = [1, 1]} : vector<8x320xf32> to vector<8x16xf32>
    %c0_513 = arith.constant 0 : index
    %c192_514 = arith.constant 192 : index
    %375 = vector.load %arg1[%c0_513, %c192_514] : memref<8x256xf32, #tpu.memory_space<vmem>>, vector<8x16xf32>
    %376 = arith.addf %374, %375 : vector<8x16xf32>
    %cst_515 = arith.constant 0.000000e+00 : f32
    %377 = vector.broadcast %cst_515 : f32 to vector<8x16xf32>
    %378 = arith.maximumf %376, %377 : vector<8x16xf32>
    %c0_516 = arith.constant 0 : index
    %c192_517 = arith.constant 192 : index
    %379 = vector.load %arg5[%c0_516, %c192_517] : memref<8x256xf32, #tpu.memory_space<vmem>>, vector<8x16xf32>
    tpu.vector_store %arg5[%c0_516, %c192_517], %378 {strides = array<i32>} : memref<8x256xf32, #tpu.memory_space<vmem>>, vector<8x16xf32>,
    %380 = vector.extract_strided_slice %301 {offsets = [0, 260], sizes = [8, 16], strides = [1, 1]} : vector<8x320xf32> to vector<8x16xf32>
    %c0_518 = arith.constant 0 : index
    %c208_519 = arith.constant 208 : index
    %381 = vector.load %arg1[%c0_518, %c208_519] : memref<8x256xf32, #tpu.memory_space<vmem>>, vector<8x16xf32>
    %382 = arith.addf %380, %381 : vector<8x16xf32>
    %cst_520 = arith.constant 0.000000e+00 : f32
    %383 = vector.broadcast %cst_520 : f32 to vector<8x16xf32>
    %384 = arith.maximumf %382, %383 : vector<8x16xf32>
    %c0_521 = arith.constant 0 : index
    %c208_522 = arith.constant 208 : index
    %385 = vector.load %arg5[%c0_521, %c208_522] : memref<8x256xf32, #tpu.memory_space<vmem>>, vector<8x16xf32>
    tpu.vector_store %arg5[%c0_521, %c208_522], %384 {strides = array<i32>} : memref<8x256xf32, #tpu.memory_space<vmem>>, vector<8x16xf32>,
    %386 = vector.extract_strided_slice %301 {offsets = [0, 280], sizes = [8, 16], strides = [1, 1]} : vector<8x320xf32> to vector<8x16xf32>
    %c0_523 = arith.constant 0 : index
    %c224_524 = arith.constant 224 : index
    %387 = vector.load %arg1[%c0_523, %c224_524] : memref<8x256xf32, #tpu.memory_space<vmem>>, vector<8x16xf32>
    %388 = arith.addf %386, %387 : vector<8x16xf32>
    %cst_525 = arith.constant 0.000000e+00 : f32
    %389 = vector.broadcast %cst_525 : f32 to vector<8x16xf32>
    %390 = arith.maximumf %388, %389 : vector<8x16xf32>
    %c0_526 = arith.constant 0 : index
    %c224_527 = arith.constant 224 : index
    %391 = vector.load %arg5[%c0_526, %c224_527] : memref<8x256xf32, #tpu.memory_space<vmem>>, vector<8x16xf32>
    tpu.vector_store %arg5[%c0_526, %c224_527], %390 {strides = array<i32>} : memref<8x256xf32, #tpu.memory_space<vmem>>, vector<8x16xf32>,
    %392 = vector.extract_strided_slice %301 {offsets = [0, 300], sizes = [8, 16], strides = [1, 1]} : vector<8x320xf32> to vector<8x16xf32>
    %c0_528 = arith.constant 0 : index
    %c240_529 = arith.constant 240 : index
    %393 = vector.load %arg1[%c0_528, %c240_529] : memref<8x256xf32, #tpu.memory_space<vmem>>, vector<8x16xf32>
    %394 = arith.addf %392, %393 : vector<8x16xf32>
    %cst_530 = arith.constant 0.000000e+00 : f32
    %395 = vector.broadcast %cst_530 : f32 to vector<8x16xf32>
    %396 = arith.maximumf %394, %395 : vector<8x16xf32>
    %c0_531 = arith.constant 0 : index
    %c240_532 = arith.constant 240 : index
    %397 = vector.load %arg5[%c0_531, %c240_532] : memref<8x256xf32, #tpu.memory_space<vmem>>, vector<8x16xf32>
    tpu.vector_store %arg5[%c0_531, %c240_532], %396 {strides = array<i32>} : memref<8x256xf32, #tpu.memory_space<vmem>>, vector<8x16xf32>,
    return
  }
  func.func @transform_0(%arg0: i32) -> (i32, i32) {
    %c0_i32 = arith.constant 0 : i32
    %c0_i32_0 = arith.constant 0 : i32
    return %arg0, %c0_i32 : i32, i32
  }
  func.func @transform_1(%arg0: i32) -> (i32, i32) {
    %c0_i32 = arith.constant 0 : i32
    %c0_i32_0 = arith.constant 0 : i32
    %c0_i32_1 = arith.constant 0 : i32
    return %c0_i32, %c0_i32_0 : i32, i32
  }
  func.func @transform_2(%arg0: i32) -> (i32, i32) {
    %c0_i32 = arith.constant 0 : i32
    %c0_i32_0 = arith.constant 0 : i32
    %c0_i32_1 = arith.constant 0 : i32
    return %c0_i32, %c0_i32_0 : i32, i32
  }
  func.func @transform_3(%arg0: i32) -> (i32, i32) {
    %c0_i32 = arith.constant 0 : i32
    %c0_i32_0 = arith.constant 0 : i32
    %c0_i32_1 = arith.constant 0 : i32
    return %c0_i32, %c0_i32_0 : i32, i32
  }
  func.func @transform_4(%arg0: i32) -> (i32, i32) {
    %c0_i32 = arith.constant 0 : i32
    %c0_i32_0 = arith.constant 0 : i32
    return %arg0, %c0_i32 : i32, i32
  }
}

</mosaic_0001>

<bundles_post_ra>
// kernel: tpu_custom_call.1
= control target key start
LH: loop header
LB: loop body
LE: loop exit
PB: predicated region body
PF: predicated region fallthrough
CT: control target
= control target key end

     0   :  { %9 = vsyncpa [#allocation6], 0  ;;  %s5356_s0 = inlined_call_operand.hbm [shape: f32[8,256], index: 0, kind: input, shape index: {}]   ;;  %s5357_s1 = inlined_call_operand.hbm [shape: f32[4,100], index: 1, kind: input, shape index: {}]   ;;  %s5358_s2 = inlined_call_operand.vmem [shape: f32[4,100], index: 2, kind: input, shape index: {}]   ;;  %s5359_s3 = inlined_call_operand.vmem [shape: f32[1,320], index: 3, kind: input, shape index: {}]   ;;  %s5360_s4 = inlined_call_operand.hbm [shape: f32[8,256], index: 4, kind: output, shape index: {}]  }
   0x1   :  { %10 = vsyncpa [#allocation9], 0 }
   0x2   :  { %11 = vsyncpa [#allocation7], 0  ;;  %s4032_s15 = smov [#allocation5]   ;;  %s4033_s17 = smov [#allocation8]  }
   0x3   :  { %s18_s16 = sshll.u32 %s4032_s15, 4  ;;  %s28_s18 = sshll.u32 %s4033_s17, 4  ;;  %s19_s16 = int_to_ptr.vmem [resolvable:$true] %s18_s16  ;;  %s29_s18 = int_to_ptr.vmem [resolvable:$true] %s28_s18 }
   0x4   :  { %s3960_s21 = scalar_lea.hbm %s5356_s0, 256 }
   0x5   :  { %p3961_p0 = scmp.ne.s32.totalorder %s5356_s0, %s3960_s21  ;;  %p3964_p1 = scmp.lt.u32.totalorder %s3960_s21, %s5356_s0 }
   0x7   :  { %p3966_p2 = pnand %p3964_p1, %p3961_p0 }
   0x9   :  { %3969 = shalt.err (!%p3966_p2)
}
   0xa   :  { %s3970_s26 = scalar_lea.vmem %s19_s16, 256  ;;  %p3975_p4 = scmp.lt.s32.totalorder %s19_s16, %s19_s16 }
   0xb   :  { %p3971_p3 = scmp.ne.s32.totalorder %s19_s16, %s3970_s26  ;;  %p3976_p5 = scmp.lt.s32.totalorder %s3970_s26, %s3970_s26 }
   0xd   :  { %p3977_p6 = por %p3976_p5, %p3975_p4 }
   0xf   :  { %p3978_p7 = pnand %p3977_p6, %p3971_p3 }
  0x11   :  { %3981 = shalt.err (!%p3978_p7)
}
  0x12   :  { %21 = dma.hbm_to_vmem [thread:$0]  %s5356_s0, 256, %s19_s16, [#allocation6]  }
  0x13   :  { %s3982_s5 = scalar_lea.hbm %s5357_s1, 64 }
  0x14   :  { %p3983_p8 = scmp.ne.s32.totalorder %s5357_s1, %s3982_s5  ;;  %p3986_p9 = scmp.lt.u32.totalorder %s3982_s5, %s5357_s1 }
  0x16   :  { %p3988_p10 = pnand %p3986_p9, %p3983_p8 }
  0x18   :  { %3991 = shalt.err (!%p3988_p10)
}
  0x19   :  { %s3992_s10 = scalar_lea.vmem %s29_s18, 64  ;;  %p3997_p12 = scmp.lt.s32.totalorder %s29_s18, %s29_s18 }
  0x1a   :  { %p3993_p11 = scmp.ne.s32.totalorder %s29_s18, %s3992_s10  ;;  %p3998_p13 = scmp.lt.s32.totalorder %s3992_s10, %s3992_s10 }
  0x1c   :  { %p3999_p0 = por %p3998_p13, %p3997_p12 }
  0x1e   :  { %p4000_p1 = pnand %p3999_p0, %p3993_p11 }
  0x20   :  { %4003 = shalt.err (!%p4000_p1)
}
  0x21   :  { %31 = dma.hbm_to_vmem [thread:$0]  %s5357_s1, 64, %s29_s18, [#allocation9]  }
  0x22   :  { %4026 = dma.done.wait [#allocation6], 256  }
  0x23   :  { %4027 = vsyncadd [#allocation6], 4294967040 }
  0x24   :  { %4028 = dma.done.wait [#allocation9], 64  }
  0x25   :  { %4029 = vsyncadd [#allocation9], 4294967232  ;;  %v4034_v0 = vmov 0.0   ;;  %v119_v1 = vld [vmem:[#allocation5 + $0x8] sm:$0xff]  ;;  %v75_v2 = vld [vmem:[#allocation5] sm:$0xff]  ;;  %s4035_s12 = smov 82  }
  0x26   :  { %45 = vst [vmem:[#allocation2 + $0x10] sm:$0xff] %v4034_v0  ;;  %43 = vst [vmem:[#allocation2] sm:$0xff] %v4034_v0  ;;  %856 = vmatprep.mubr.f32.mxu0 %v4034_v0  ;;  %121 = vrot.lane.b32.xlu1 %v119_v1, %s4035_s12  ;;  %s4036_s1 = smov 58   ;;  %s4037_s13 = smov 66   ;;  %vm126_vm0 = vcmask 15360   ;;  %vm82_vm1 = vcmask 80896  }
  0x27   :  { %44 = vst [vmem:[#allocation2 + $0x8] sm:$0xff] %v4034_v0  ;;  %46 = vst [vmem:[#allocation2 + $0x18] sm:$0xff] %v4034_v0  ;;  %77 = vrot.lane.b32.xlu0 %v75_v2, %s4036_s1  ;;  %s4038_s14 = smov 62   ;;  %s4039_s15 = smov 86   ;;  %vm89_vm2 = vcmask 244848   ;;  %vm96_vm3 = vcmask 408848  }
  0x28   :  { %s4040_s16 = smov 42   ;;  %s4041_s17 = smov 70   ;;  %vm133_vm4 = vcmask 179248   ;;  %vm52_vm5 = vcmask 474448   ;;  %vm103_vm6 = vcmask 572848   ;;  %vm140_vm7 = vcmask 343248  }
  0x29   :  { %s4042_s18 = smov 90   ;;  %s4043_s19 = smov 46   ;;  %vm59_vm8 = vcmask 638448   ;;  %vm110_vm9 = vcmask 736848   ;;  %vm147_vm10 = vcmask 507248   ;;  %vm66_vm11 = vcmask 802448  }
  0x2a   :  { %93 = vrot.lane.b32.xlu1 %v75_v2, %s4037_s13  ;;  %s4044_s20 = smov 74   ;;  %s4045_s21 = smov 94   ;;  %vm117_vm12 = vcmask 900848   ;;  %vm154_vm13 = vcmask 671248   ;;  %vm124_vm14 = vcmask 1048464   ;;  %vm73_vm15 = vcmask 966448  }
  0x2b   :  { %86 = vrot.lane.b32.xlu0 %v75_v2, %s4038_s14  ;;  %s4046_s22 = smov 50   ;;  %s4047_s23 = smov 78  }
  0x2c   :  { %s4048_s24 = smov 98   ;;  %s4049_s25 = smov 54  }
  0x2d   :  { %s4050_s26 = smov 102   ;;  %s4051_s27 = smov 124  }
  0x2e   :  { %49 = vrot.lane.b32.xlu1 %v75_v2, %s4040_s16  ;;  %s4052_s28 = smov 126   ;;  %s4053_s29 = smov 107  }
  0x2f   :  { %130 = vrot.lane.b32.xlu0 %v119_v1, %s4039_s15  ;;  %s4054_s30 = smov 105   ;;  %s4055_s5 = smov 88  }
  0x30   :  { %s4056_s6 = smov 84   ;;  %s4057_s7 = smov 67  }
  0x31   :  { %s4058_s8 = smov 65   ;;  %s4059_s9 = smov 127  }
  0x32   :  { %137 = vrot.lane.b32.xlu1 %v119_v1, %s4042_s18  ;;  %s4060_s10 = smov 125   ;;  %s4061_s0 = smov 108  }
  0x33   :  { %100 = vrot.lane.b32.xlu0 %v75_v2, %s4041_s17  ;;  %s4062_s11 = smov 106   ;;  %s4063_s12 = smov 104  }
  0x34   :  { %s4064_s1 = smov 87   ;;  %s4065_s14 = smov 85  }
  0x35   :  { %s4066_s17 = smov 68   ;;  %s4068_s18 = smov 64  }
  0x36   :  { %107 = vrot.lane.b32.xlu1 %v119_v1, %s4044_s20  ;;  %s4069_s20 = smov 48  }
  0x37   :  { %56 = vrot.lane.b32.xlu0 %v75_v2, %s4043_s19 }
  0x3a   :  { %63 = vrot.lane.b32.xlu1 %v75_v2, %s4046_s22  ;;  %s4071_s22 = smov 45  }
  0x3b   :  { %144 = vrot.lane.b32.xlu0 %v119_v1, %s4045_s21  ;;  %s4070_s21 = smov 47  }
  0x3e   :  { %151 = vrot.lane.b32.xlu1 %v119_v1, %s4048_s24 }
  0x3f   :  { %114 = vrot.lane.b32.xlu0 %v119_v1, %s4047_s23  ;;  %s4072_s23 = smov 44  }
  0x42   :  { %158 = vrot.lane.b32.xlu1 %v119_v1, %s4050_s26 }
  0x43   :  { %70 = vrot.lane.b32.xlu0 %v75_v2, %s4049_s25 }
  0x98   :  { %v122_v3 = vpop.permute.xlu1 %121 }
  0x99   :  { %v78_v4 = vpop.permute.xlu0 %77  ;;  %127 = vst.msk [vmem:[#allocation2 + $0x10] sm:$0xff] %vm126_vm0, %v122_v3  ;;  %vm161_vm0 = vcmask 835248  }
  0x9a   :  { %83 = vst.msk [vmem:[#allocation2 + $0x8] sm:$0xff] %vm82_vm1, %v78_v4  ;;  %vm80_vm1 = vcmask 1048528  }
  0x9c   :  { %v94_v5 = vpop.permute.xlu1 %93 }
  0x9d   :  { %v87_v6 = vpop.permute.xlu0 %86 }
  0x9e   :  { %90 = vst.msk [vmem:[#allocation2 + $0x8] sm:$0xff] %vm89_vm2, %v87_v6  ;;  %vm168_vm2 = vcmask 519168  }
  0x9f   :  { %97 = vst.msk [vmem:[#allocation2 + $0x8] sm:$0xff] %vm96_vm3, %v94_v5  ;;  %vm207_vm3 = vcmask 1031168  }
  0xa0   :  { %v50_v8 = vpop.permute.xlu1 %49 }
  0xa1   :  { %v131_v7 = vpop.permute.xlu0 %130  ;;  %53 = vst.msk [vmem:[#allocation2] sm:$0xff] %vm52_vm5, %v50_v8  ;;  %v5379_v8 = vmov 0.0|0.0   ;;  %vm5376_vm5 = vcmask 875520  }
  0xa2   :  { %134 = vst.msk [vmem:[#allocation2 + $0x10] sm:$0xff] %vm133_vm4, %v131_v7  ;;  %3744 = vmatprep.subr.bf16.mxu1 %v5379_v8  ;;  %vm252_vm4 = vcmask 1014784  }
  0xa4   :  { %v138_v10 = vpop.permute.xlu1 %137 }
  0xa5   :  { %v101_v9 = vpop.permute.xlu0 %100  ;;  %141 = vst.msk [vmem:[#allocation2 + $0x10] sm:$0xff] %vm140_vm7, %v138_v10  ;;  %vm5370_vm7 = vcmask 719872  }
  0xa6   :  { %104 = vst.msk [vmem:[#allocation2 + $0x8] sm:$0xff] %vm103_vm6, %v101_v9  ;;  %vm5378_vm6 = vcmask 859136  }
  0xa8   :  { %v108_v12 = vpop.permute.xlu1 %107 }
  0xa9   :  { %v57_v11 = vpop.permute.xlu0 %56  ;;  %111 = vst.msk [vmem:[#allocation2 + $0x8] sm:$0xff] %vm110_vm9, %v108_v12  ;;  %vm4073_vm9 = vmmov 0  }
  0xaa   :  { %60 = vst.msk [vmem:[#allocation2] sm:$0xff] %vm59_vm8, %v57_v11  ;;  %vm5364_vm8 = vcmask 703488   ;;  %3630 = vmatprep.mubr.msk.f32.mxu1 %vm4073_vm9, %v4034_v0 }
  0xac   :  { %v64_v14 = vpop.permute.xlu1 %63 }
  0xad   :  { %v145_v13 = vpop.permute.xlu0 %144  ;;  %67 = vst.msk [vmem:[#allocation2] sm:$0xff] %vm66_vm11, %v64_v14  ;;  %vm5361_vm11 = vcmask 547840  }
  0xae   :  { %148 = vst.msk [vmem:[#allocation2 + $0x10] sm:$0xff] %vm147_vm10, %v145_v13  ;;  %vm5362_vm10 = vcmask 687104  }
  0xb0   :  { %v152_v16 = vpop.permute.xlu1 %151 }
  0xb1   :  { %v115_v15 = vpop.permute.xlu0 %114  ;;  %155 = vst.msk [vmem:[#allocation2 + $0x10] sm:$0xff] %vm154_vm13, %v152_v16  ;;  %vm193_vm13 = vcmask 523268  }
  0xb2   :  { %118 = vst.msk [vmem:[#allocation2 + $0x8] sm:$0xff] %vm117_vm12, %v115_v15  ;;  %vm5367_vm12 = vcmask 531456  }
  0xb3   :  { %125 = vst.msk [vmem:[#allocation2 + $0x8] sm:$0xff] %vm124_vm14, %v122_v3  ;;  %vm5374_vm14 = vcmask 883712  }
  0xb4   :  { %v159_v18 = vpop.permute.xlu1 %158 }
  0xb5   :  { %v71_v17 = vpop.permute.xlu0 %70  ;;  %162 = vst.msk [vmem:[#allocation2 + $0x10] sm:$0xff] %vm161_vm0, %v159_v18  ;;  %vm5377_vm0 = vcmask 850944  }
  0xb6   :  { %74 = vst.msk [vmem:[#allocation2] sm:$0xff] %vm73_vm15, %v71_v17  ;;  %vm321_vm15 = vcmask 867328  }
  0xb7   :  { %81 = vst.msk [vmem:[#allocation2] sm:$0xff] %vm80_vm1, %v78_v4  ;;  %vm5366_vm1 = vcmask 711680  }
  0xba   :  { %v196_v35 = vld [vmem:[#allocation2 + $0x8] sm:$0xf] }
  0xbb   :  { %v241_v40 = vld [vmem:[#allocation2 + $0x8] sm:$0xf] }
  0xbc   :  { %v242_v19 = vld [vmem:[#allocation2 + $0x10] sm:$0xf]  ;;  %v286_v44 = vld [vmem:[#allocation2 + $0x8] sm:$0xf] }
  0xbd   :  { %250 = vrot.lane.b32.xlu0 %v242_v19, %s4051_s27  ;;  %v287_v21 = vld [vmem:[#allocation2 + $0x10] sm:$0xf]  ;;  %v331_v47 = vld [vmem:[#allocation2 + $0x8] sm:$0xf] }
  0xbe   :  { %v195_v20 = vld [vmem:[#allocation2] sm:$0xf]  ;;  %v332_v23 = vld [vmem:[#allocation2 + $0x10] sm:$0xf]  ;;  %v376_v50 = vld [vmem:[#allocation2 + $0x8] sm:$0xf] }
  0xbf   :  { %201 = vrot.lane.b32.xlu1 %v195_v20, %s4052_s28  ;;  %v240_v22 = vld [vmem:[#allocation2] sm:$0xf]  ;;  %v377_v25 = vld [vmem:[#allocation2 + $0x10] sm:$0xf]  ;;  %v164_v51 = vld [vmem:[#allocation2 + $0x8] sm:$0xf] }
  0xc0   :  { %v285_v24 = vld [vmem:[#allocation2] sm:$0xf]  ;;  %v422_v27 = vld [vmem:[#allocation2 + $0x10] sm:$0xf]  ;;  %167 = vst [vmem:[#allocation3 + $0x8] sm:$0xf] %v164_v51 }
  0xc1   :  { %295 = vrot.lane.b32.xlu0 %v287_v21, %s4053_s29  ;;  %v330_v26 = vld [vmem:[#allocation2] sm:$0xf]  ;;  %v467_v29 = vld [vmem:[#allocation2 + $0x10] sm:$0xf]  ;;  %v421_v55 = vld [vmem:[#allocation2 + $0x8] sm:$0xf] }
  0xc2   :  { %v375_v28 = vld [vmem:[#allocation2] sm:$0xf]  ;;  %v512_v31 = vld [vmem:[#allocation2 + $0x10] sm:$0xf]  ;;  %v466_v58 = vld [vmem:[#allocation2 + $0x8] sm:$0xf] }
  0xc3   :  { %246 = vrot.lane.b32.xlu1 %v240_v22, %s4051_s27  ;;  %v420_v30 = vld [vmem:[#allocation2] sm:$0xf]  ;;  %v557_v33 = vld [vmem:[#allocation2 + $0x10] sm:$0xf]  ;;  %v511_v61 = vld [vmem:[#allocation2 + $0x8] sm:$0xf] }
  0xc4   :  { %v465_v32 = vld [vmem:[#allocation2] sm:$0xf]  ;;  %v197_v37 = vld [vmem:[#allocation2 + $0x10] sm:$0xf]  ;;  %v556_v1 = vld [vmem:[#allocation2 + $0x8] sm:$0xf] }
  0xc5   :  { %340 = vrot.lane.b32.xlu0 %v332_v23, %s4054_s30  ;;  %v510_v34 = vld [vmem:[#allocation2] sm:$0xf]  ;;  %v165_v43 = vld [vmem:[#allocation2 + $0x10] sm:$0xf]  ;;  %v262_v11 = vld [vmem:[#allocation2 + $0x8] sm:$0xf] }
  0xc6   :  { %v170_v36 = vld [vmem:[#allocation2] sm:$0xf]  ;;  %169 = vst.msk [vmem:[#allocation3 + $0x10] sm:$0xf] %vm168_vm2, %v165_v43  ;;  %v263_v63 = vld [vmem:[#allocation2 + $0x10] sm:$0xf] }
  0xc7   :  { %291 = vrot.lane.b32.xlu1 %v285_v24, %s4053_s29  ;;  %v176_v38 = vrot.slane %v170_v36, 4  ;;  %v216_v39 = vld [vmem:[#allocation2] sm:$0xf]  ;;  %v172_v2 = vld [vmem:[#allocation2 + $0x10] sm:$0xf]  ;;  %v269_v3 = vrot.slane %v263_v63, 4 }
  0xc8   :  { %v222_v41 = vrot.slane %v216_v39, 4  ;;  %v261_v42 = vld [vmem:[#allocation2] sm:$0xf]  ;;  %v178_v4 = vrot.slane %v172_v2, 4  ;;  %v308_v5 = vld [vmem:[#allocation2 + $0x10] sm:$0xf] }
  0xc9   :  { %385 = vrot.lane.b32.xlu0 %v377_v25, %s4055_s5  ;;  %v267_v45 = vrot.slane %v261_v42, 4  ;;  %v306_v46 = vld [vmem:[#allocation2] sm:$0xf]  ;;  %v218_v6 = vld [vmem:[#allocation2 + $0x10] sm:$0xf]  ;;  %v314_v7 = vrot.slane %v308_v5, 4 }
  0xca   :  { %v312_v48 = vrot.slane %v306_v46, 4  ;;  %v351_v49 = vld [vmem:[#allocation2] sm:$0xf]  ;;  %v224_v9 = vrot.slane %v218_v6, 4  ;;  %v353_v10 = vld [vmem:[#allocation2 + $0x10] sm:$0xf] }
  0xcb   :  { %336 = vrot.lane.b32.xlu1 %v330_v26, %s4054_s30  ;;  %v163_v52 = vld [vmem:[#allocation2] sm:$0xf]  ;;  %v357_v53 = vrot.slane %v351_v49, 4  ;;  %v359_v12 = vrot.slane %v353_v10, 4  ;;  %v268_v13 = vrot.slane %v262_v11, 4 }
  0xcc   :  { %166 = vst [vmem:[#allocation3] sm:$0xf] %v163_v52  ;;  %v396_v54 = vld [vmem:[#allocation2] sm:$0xf]  ;;  %v398_v14 = vld [vmem:[#allocation2 + $0x10] sm:$0xf] }
  0xcd   :  { %430 = vrot.lane.b32.xlu0 %v422_v27, %s4039_s15  ;;  %v402_v56 = vrot.slane %v396_v54, 4  ;;  %v441_v57 = vld [vmem:[#allocation2] sm:$0xf]  ;;  %v307_v15 = vld [vmem:[#allocation2 + $0x8] sm:$0xf]  ;;  %v404_v16 = vrot.slane %v398_v14, 4 }
  0xce   :  { %v447_v59 = vrot.slane %v441_v57, 4  ;;  %v486_v60 = vld [vmem:[#allocation2] sm:$0xf]  ;;  %v313_v17 = vrot.slane %v307_v15, 4  ;;  %v443_v18 = vld [vmem:[#allocation2 + $0x10] sm:$0xf] }
  0xcf   :  { %381 = vrot.lane.b32.xlu1 %v375_v28, %s4055_s5  ;;  %v492_v62 = vrot.slane %v486_v60, 4  ;;  %v352_v19 = vld [vmem:[#allocation2 + $0x8] sm:$0xf]  ;;  %v449_v20 = vrot.slane %v443_v18, 4  ;;  %v488_v22 = vld [vmem:[#allocation2 + $0x10] sm:$0xf] }
  0xd0   :  { %v358_v21 = vrot.slane %v352_v19, 4  ;;  %v397_v23 = vld [vmem:[#allocation2 + $0x8] sm:$0xf]  ;;  %v494_v24 = vrot.slane %v488_v22, 4  ;;  %v533_v26 = vld [vmem:[#allocation2 + $0x10] sm:$0xf] }
  0xd1   :  { %475 = vrot.lane.b32.xlu0 %v467_v29, %s4056_s6  ;;  %v403_v25 = vrot.slane %v397_v23, 4  ;;  %v442_v27 = vld [vmem:[#allocation2 + $0x8] sm:$0xf]  ;;  %v539_v28 = vrot.slane %v533_v26, 4  ;;  %v531_v42 = vld [vmem:[#allocation2] sm:$0xf] }
  0xd2   :  { %v448_v29 = vrot.slane %v442_v27, 4  ;;  %v577_v39 = vld [vmem:[#allocation2 + $0x8] sm:$0xf]  ;;  %v537_v43 = vrot.slane %v531_v42, 4  ;;  %v602_v51 = vld [vmem:[#allocation2 + $0x10] sm:$0xf] }
  0xd3   :  { %426 = vrot.lane.b32.xlu1 %v420_v30, %s4039_s15  ;;  %v578_v30 = vld [vmem:[#allocation2 + $0x10] sm:$0xf]  ;;  %v657_v57 = vld [vmem:[#allocation2 + $0x8] sm:$0xf]  ;;  %v600_v5 = vld [vmem:[#allocation2] sm:$0xf] }
  0xd4   :  { %v684_v63 = vld [vmem:[#allocation2 + $0x10] sm:$0xf]  ;;  %v682_v10 = vld [vmem:[#allocation2] sm:$0xf]  ;;  %v603_v15 = vld [vmem:[#allocation2 + $0x18] sm:$0xf] }
  0xd5   :  { %520 = vrot.lane.b32.xlu0 %v512_v31, %s4057_s7  ;;  %v487_v31 = vld [vmem:[#allocation2 + $0x8] sm:$0xf]  ;;  %v692_v2 = vrot.slane %v684_v63, 4  ;;  %v656_v11 = vld [vmem:[#allocation2] sm:$0xf]  ;;  %v690_v14 = vrot.slane %v682_v10, 4 }
  0xd6   :  { %v685_v18 = vld [vmem:[#allocation2 + $0x18] sm:$0xf]  ;;  %v1015_v63 = vld [vmem:[#allocation2 + $0x8] sm:$0xf0] }
  0xd7   :  { %471 = vrot.lane.b32.xlu1 %v465_v32, %s4056_s6  ;;  %v584_v32 = vrot.slane %v578_v30, 4  ;;  %v693_v22 = vrot.slane %v685_v18, 4  ;;  %v1021_v0 = vrot.slane %v1015_v63, 4  ;;  %v1125_v63 = vld [vmem:[#allocation2 + $0x10] sm:$0xf0] }
  0xd9   :  { %565 = vrot.lane.b32.xlu0 %v557_v33, %s4058_s8  ;;  %v493_v33 = vrot.slane %v487_v31, 4  ;;  %v952_v31 = vld [vmem:[#allocation2 + $0x8] sm:$0xf0] }
  0xdb   :  { %516 = vrot.lane.b32.xlu1 %v510_v34, %s4057_s7  ;;  %v171_v34 = vld [vmem:[#allocation2 + $0x8] sm:$0xf] }
  0xdc   :  { %v177_v36 = vrot.slane %v171_v34, 4 }
  0xdd   :  { %203 = vrot.lane.b32.xlu0 %v196_v35, %s4052_s28  ;;  %v532_v35 = vld [vmem:[#allocation2 + $0x8] sm:$0xf] }
  0xdf   :  { %205 = vrot.lane.b32.xlu1 %v197_v37, %s4052_s28  ;;  %v538_v37 = vrot.slane %v532_v35, 4  ;;  %v953_v35 = vld [vmem:[#allocation2 + $0x10] sm:$0xf0] }
  0xe1   :  { %179 = vrot.lane.b32.xlu0 %v176_v38, %s4059_s9  ;;  %v217_v38 = vld [vmem:[#allocation2 + $0x8] sm:$0xf] }
  0xe3   :  { %248 = vrot.lane.b32.xlu1 %v241_v40, %s4051_s27  ;;  %v223_v40 = vrot.slane %v217_v38, 4 }
  0xe5   :  { %225 = vrot.lane.b32.xlu0 %v222_v41, %s4060_s10  ;;  %v583_v41 = vrot.slane %v577_v39, 4 }
  0xe7   :  { %293 = vrot.lane.b32.xlu1 %v286_v44, %s4053_s29  ;;  %v576_v44 = vld [vmem:[#allocation2] sm:$0xf] }
  0xe8   :  { %v582_v46 = vrot.slane %v576_v44, 4 }
  0xe9   :  { %270 = vrot.lane.b32.xlu0 %v267_v45, %s4061_s0  ;;  %v555_v45 = vld [vmem:[#allocation2] sm:$0xf] }
  0xeb   :  { %338 = vrot.lane.b32.xlu1 %v331_v47, %s4054_s30  ;;  %v601_v47 = vld [vmem:[#allocation2 + $0x8] sm:$0xf] }
  0xed   :  { %315 = vrot.lane.b32.xlu0 %v312_v48, %s4062_s11  ;;  %v627_v48 = vld [vmem:[#allocation2 + $0x8] sm:$0xf] }
  0xee   :  { %v635_v52 = vrot.slane %v627_v48, 4  ;;  %v996_v48 = vld [vmem:[#allocation2 + $0x10] sm:$0xf0] }
  0xef   :  { %383 = vrot.lane.b32.xlu1 %v376_v50, %s4055_s5 }
  0xf1   :  { %360 = vrot.lane.b32.xlu0 %v357_v53, %s4063_s12  ;;  %v628_v53 = vld [vmem:[#allocation2 + $0x10] sm:$0xf] }
  0xf3   :  { %428 = vrot.lane.b32.xlu1 %v421_v55, %s4039_s15  ;;  %v636_v55 = vrot.slane %v628_v53, 4 }
  0xf5   :  { %405 = vrot.lane.b32.xlu0 %v402_v56, %s4064_s1 }
  0xf7   :  { %473 = vrot.lane.b32.xlu1 %v466_v58, %s4056_s6  ;;  %v683_v58 = vld [vmem:[#allocation2 + $0x8] sm:$0xf] }
  0xf9   :  { %450 = vrot.lane.b32.xlu0 %v447_v59, %s4065_s14 }
  0xfb   :  { %518 = vrot.lane.b32.xlu1 %v511_v61, %s4057_s7  ;;  %v658_v61 = vld [vmem:[#allocation2 + $0x10] sm:$0xf] }
  0xfd   :  { %495 = vrot.lane.b32.xlu0 %v492_v62, %s4066_s17  ;;  %v691_v62 = vrot.slane %v683_v58, 4 }
  0xff   :  { %563 = vrot.lane.b32.xlu1 %v556_v1, %s4058_s8 }
 0x101   :  { %274 = vrot.lane.b32.xlu0 %v269_v3, %s4061_s0 }
 0x103   :  { %183 = vrot.lane.b32.xlu1 %v178_v4, %s4059_s9  ;;  %v626_v4 = vld [vmem:[#allocation2] sm:$0xf] }
 0x105   :  { %319 = vrot.lane.b32.xlu0 %v314_v7, %s4062_s11  ;;  %v634_v7 = vrot.slane %v626_v4, 4 }
 0x107   :  { %229 = vrot.lane.b32.xlu1 %v224_v9, %s4060_s10 }
 0x109   :  { %364 = vrot.lane.b32.xlu0 %v359_v12, %s4063_s12  ;;  %v629_v12 = vld [vmem:[#allocation2 + $0x18] sm:$0xf] }
 0x10b   :  { %272 = vrot.lane.b32.xlu1 %v268_v13, %s4061_s0 }
 0x10d   :  { %409 = vrot.lane.b32.xlu0 %v404_v16, %s4064_s1 }
 0x10f   :  { %317 = vrot.lane.b32.xlu1 %v313_v17, %s4062_s11  ;;  %v637_v17 = vrot.slane %v629_v12, 4  ;;  %v1038_v12 = vld [vmem:[#allocation2 + $0x8] sm:$0xf0] }
 0x111   :  { %454 = vrot.lane.b32.xlu0 %v449_v20, %s4065_s14  ;;  %v659_v20 = vld [vmem:[#allocation2 + $0x18] sm:$0xf] }
 0x113   :  { %362 = vrot.lane.b32.xlu1 %v358_v21, %s4063_s12 }
 0x115   :  { %499 = vrot.lane.b32.xlu0 %v494_v24, %s4066_s17 }
 0x117   :  { %407 = vrot.lane.b32.xlu1 %v403_v25, %s4064_s1  ;;  %v713_v25 = vld [vmem:[#allocation2 + $0x8] sm:$0xf] }
 0x119   :  { %544 = vrot.lane.b32.xlu0 %v539_v28, %s4037_s13 }
 0x11b   :  { %452 = vrot.lane.b32.xlu1 %v448_v29, %s4065_s14  ;;  %v714_v29 = vld [vmem:[#allocation2 + $0x10] sm:$0xf] }
 0x11d   :  { %589 = vrot.lane.b32.xlu0 %v584_v32, %s4068_s18  ;;  %v972_v32 = vld [vmem:[#allocation2 + $0x8] sm:$0xf0] }
 0x11f   :  { %497 = vrot.lane.b32.xlu1 %v493_v33, %s4066_s17 }
 0x121   :  { %181 = vrot.lane.b32.xlu0 %v177_v36, %s4059_s9  ;;  %v978_v36 = vrot.slane %v972_v32, 4  ;;  %v938_v32 = vld [vmem:[#allocation2 + $0x10] sm:$0xf0] }
 0x123   :  { %542 = vrot.lane.b32.xlu1 %v538_v37, %s4037_s13  ;;  %v973_v37 = vld [vmem:[#allocation2 + $0x10] sm:$0xf0] }
 0x125   :  { %227 = vrot.lane.b32.xlu0 %v223_v40, %s4060_s10 }
 0x127   :  { %587 = vrot.lane.b32.xlu1 %v583_v41, %s4068_s18  ;;  %v979_v41 = vrot.slane %v973_v37, 4  ;;  %v944_v37 = vrot.slane %v938_v32, 4 }
 0x129   :  { %540 = vrot.lane.b32.xlu0 %v537_v43, %s4037_s13 }
 0x12b   :  { %561 = vrot.lane.b32.xlu1 %v555_v45, %s4058_s8  ;;  %v995_v45 = vld [vmem:[#allocation2 + $0x8] sm:$0xf0] }
 0x12d   :  { %585 = vrot.lane.b32.xlu0 %v582_v46, %s4068_s18 }
 0x12f   :  { %610 = vrot.lane.b32.xlu1 %v601_v47, %s4069_s20  ;;  %v4215_v49 = vpop.permute.xlu0 %250 }
 0x130   :  { %260 = vst.msk [vmem:[#allocation3 + $0x40] sm:$0xf] %vm168_vm2, %v4215_v49 }
 0x131   :  { %v4219_v50 = vpop.permute.xlu1 %201  ;;  %612 = vrot.lane.b32.xlu0 %v602_v51, %s4069_s20  ;;  %v712_v51 = vld [vmem:[#allocation2] sm:$0xf] }
 0x133   :  { %640 = vrot.lane.b32.xlu1 %v635_v52, %s4070_s21  ;;  %v4223_v54 = vpop.permute.xlu0 %295  ;;  %v971_v52 = vld [vmem:[#allocation2] sm:$0xf0] }
 0x134   :  { %305 = vst.msk [vmem:[#allocation3 + $0x58] sm:$0xf] %vm168_vm2, %v4223_v54 }
 0x135   :  { %v4227_v56 = vpop.permute.xlu1 %246  ;;  %642 = vrot.lane.b32.xlu0 %v636_v55, %s4070_s21  ;;  %v951_v55 = vld [vmem:[#allocation2] sm:$0xf0] }
 0x137   :  { %666 = vrot.lane.b32.xlu1 %v657_v57, %s4043_s19  ;;  %v4231_v59 = vpop.permute.xlu0 %340 }
 0x138   :  { %350 = vst.msk [vmem:[#allocation3 + $0x70] sm:$0xf] %vm168_vm2, %v4231_v59 }
 0x139   :  { %v4235_v60 = vpop.permute.xlu1 %291  ;;  %668 = vrot.lane.b32.xlu0 %v658_v61, %s4043_s19 }
 0x13b   :  { %696 = vrot.lane.b32.xlu1 %v691_v62, %s4071_s22  ;;  %v4239_v1 = vpop.permute.xlu0 %385  ;;  %v994_v62 = vld [vmem:[#allocation2] sm:$0xf0] }
 0x13c   :  { %395 = vst.msk [vmem:[#allocation3 + $0x88] sm:$0xf] %vm168_vm2, %v4239_v1 }
 0x13d   :  { %v4243_v3 = vpop.permute.xlu1 %336  ;;  %698 = vrot.lane.b32.xlu0 %v692_v2, %s4071_s22 }
 0x13f   :  { %608 = vrot.lane.b32.xlu1 %v600_v5, %s4069_s20  ;;  %v4247_v6 = vpop.permute.xlu0 %430 }
 0x140   :  { %440 = vst.msk [vmem:[#allocation3 + $0xa0] sm:$0xf] %vm168_vm2, %v4247_v6 }
 0x141   :  { %v4251_v9 = vpop.permute.xlu1 %381  ;;  %638 = vrot.lane.b32.xlu0 %v634_v7, %s4070_s21 }
 0x143   :  { %664 = vrot.lane.b32.xlu1 %v656_v11, %s4043_s19  ;;  %v4255_v13 = vpop.permute.xlu0 %475 }
 0x144   :  { %485 = vst.msk [vmem:[#allocation3 + $0xb8] sm:$0xf] %vm168_vm2, %v4255_v13 }
 0x145   :  { %v4259_v16 = vpop.permute.xlu1 %426  ;;  %694 = vrot.lane.b32.xlu0 %v690_v14, %s4071_s22  ;;  %v1058_v14 = vld [vmem:[#allocation2 + $0x8] sm:$0xf0] }
 0x147   :  { %614 = vrot.lane.b32.xlu1 %v603_v15, %s4069_s20  ;;  %v4263_v19 = vpop.permute.xlu0 %520 }
 0x148   :  { %530 = vst.msk [vmem:[#allocation3 + $0xd0] sm:$0xf] %vm168_vm2, %v4263_v19 }
 0x149   :  { %v4267_v21 = vpop.permute.xlu1 %471  ;;  %644 = vrot.lane.b32.xlu0 %v637_v17, %s4070_s21  ;;  %v1059_v17 = vld [vmem:[#allocation2 + $0x10] sm:$0xf0] }
 0x14b   :  { %670 = vrot.lane.b32.xlu1 %v659_v20, %s4043_s19  ;;  %v4271_v23 = vpop.permute.xlu0 %565  ;;  %v1064_v20 = vrot.slane %v1058_v14, 4 }
 0x14c   :  { %575 = vst.msk [vmem:[#allocation3 + $0xe8] sm:$0xf] %vm168_vm2, %v4271_v23 }
 0x14d   :  { %v4275_v24 = vpop.permute.xlu1 %516  ;;  %700 = vrot.lane.b32.xlu0 %v693_v22, %s4071_s22  ;;  %v1065_v22 = vrot.slane %v1059_v17, 4 }
 0x14f   :  { %722 = vrot.lane.b32.xlu1 %v713_v25, %s4072_s23  ;;  %v204_v26 = vpop.permute.xlu0 %203 }
 0x150   :  { %v208_v27 = vsel %vm207_vm3, %v4219_v50, %v204_v26 }
 0x151   :  { %v206_v28 = vpop.permute.xlu1 %205  ;;  %213 = vst [vmem:[#allocation3 + $0x18] sm:$0xf] %v208_v27  ;;  %724 = vrot.lane.b32.xlu0 %v714_v29, %s4072_s23  ;;  %v1014_v27 = vld [vmem:[#allocation2] sm:$0xf0] }
 0x152   :  { %v209_v30 = vsel %vm207_vm3, %v204_v26, %v206_v28  ;;  %215 = vst.msk [vmem:[#allocation3 + $0x28] sm:$0xf] %vm168_vm2, %v206_v28  ;;  %v1081_v26 = vld [vmem:[#allocation2 + $0x8] sm:$0xf0]  ;;  %v1082_v28 = vld [vmem:[#allocation2 + $0x10] sm:$0xf0] }
 0x153   :  { %214 = vst [vmem:[#allocation3 + $0x20] sm:$0xf] %v209_v30  ;;  %959 = vrot.lane.b32.xlu1 %v952_v31, %s4059_s9  ;;  %v4285_v33 = vpop.permute.xlu0 %179  ;;  %v1020_v29 = vrot.slane %v1014_v27, 4  ;;  %v1057_v31 = vld [vmem:[#allocation2] sm:$0xf0] }
 0x155   :  { %v249_v34 = vpop.permute.xlu1 %248  ;;  %961 = vrot.lane.b32.xlu0 %v953_v35, %s4059_s9 }
 0x156   :  { %v253_v38 = vsel %vm252_vm4, %v4227_v56, %v249_v34  ;;  %v254_v39 = vsel %vm252_vm4, %v249_v34, %v4215_v49  ;;  %v977_v56 = vrot.slane %v971_v52, 4  ;;  %v1037_v34 = vld [vmem:[#allocation2] sm:$0xf0] }
 0x157   :  { %258 = vst [vmem:[#allocation3 + $0x30] sm:$0xf] %v253_v38  ;;  %259 = vst [vmem:[#allocation3 + $0x38] sm:$0xf] %v254_v39  ;;  %982 = vrot.lane.b32.xlu1 %v978_v36, %s4052_s28  ;;  %v4293_v40 = vpop.permute.xlu0 %225  ;;  %v1063_v36 = vrot.slane %v1057_v31, 4 }
 0x158   :  { %v1101_v39 = vld [vmem:[#allocation2 + $0x8] sm:$0xf0]  ;;  %v1123_v31 = vld [vmem:[#allocation2] sm:$0xf0] }
 0x159   :  { %v294_v42 = vpop.permute.xlu1 %293  ;;  %984 = vrot.lane.b32.xlu0 %v979_v41, %s4052_s28 }
 0x15a   :  { %v298_v43 = vsel %vm5376_vm5, %v4235_v60, %v294_v42  ;;  %v299_v44 = vsel %vm5376_vm5, %v294_v42, %v4223_v54  ;;  %v715_v60 = vld [vmem:[#allocation2 + $0x18] sm:$0xf] }
 0x15b   :  { %303 = vst [vmem:[#allocation3 + $0x48] sm:$0xf] %v298_v43  ;;  %304 = vst [vmem:[#allocation3 + $0x50] sm:$0xf] %v299_v44  ;;  %1002 = vrot.lane.b32.xlu1 %v995_v45, %s4060_s10  ;;  %v4301_v46 = vpop.permute.xlu0 %270  ;;  %v1080_v44 = vld [vmem:[#allocation2] sm:$0xf0] }
 0x15c   :  { %v1102_v45 = vld [vmem:[#allocation2 + $0x10] sm:$0xf0] }
 0x15d   :  { %v339_v47 = vpop.permute.xlu1 %338  ;;  %1004 = vrot.lane.b32.xlu0 %v996_v48, %s4060_s10  ;;  %v1107_v48 = vrot.slane %v1101_v39, 4  ;;  %v1166_v39 = vld [vmem:[#allocation2] sm:$0xf0] }
 0x15e   :  { %v343_v49 = vsel %vm5378_vm6, %v4243_v3, %v339_v47  ;;  %v344_v50 = vsel %vm5378_vm6, %v339_v47, %v4231_v59  ;;  %v1016_v3 = vld [vmem:[#allocation2 + $0x10] sm:$0xf0] }
 0x15f   :  { %348 = vst [vmem:[#allocation3 + $0x60] sm:$0xf] %v343_v49  ;;  %349 = vst [vmem:[#allocation3 + $0x68] sm:$0xf] %v344_v50  ;;  %720 = vrot.lane.b32.xlu1 %v712_v51, %s4072_s23  ;;  %v4309_v53 = vpop.permute.xlu0 %315  ;;  %v1022_v7 = vrot.slane %v1016_v3, 4  ;;  %v1108_v50 = vrot.slane %v1102_v45, 4 }
 0x161   :  { %v384_v54 = vpop.permute.xlu1 %383  ;;  %957 = vrot.lane.b32.xlu0 %v951_v55, %s4059_s9 }
 0x162   :  { %v388_v57 = vsel %vm5370_vm7, %v4251_v9, %v384_v54  ;;  %v389_v58 = vsel %vm5370_vm7, %v384_v54, %v4239_v1  ;;  %vm5372_vm7 = vcmask 367616  }
 0x163   :  { %393 = vst [vmem:[#allocation3 + $0x78] sm:$0xf] %v388_v57  ;;  %394 = vst [vmem:[#allocation3 + $0x80] sm:$0xf] %v389_v58  ;;  %980 = vrot.lane.b32.xlu1 %v977_v56, %s4052_s28  ;;  %v4317_v59 = vpop.permute.xlu0 %360  ;;  %v1124_v58 = vld [vmem:[#allocation2 + $0x8] sm:$0xf0] }
 0x165   :  { %v429_v61 = vpop.permute.xlu1 %428  ;;  %1000 = vrot.lane.b32.xlu0 %v994_v62, %s4060_s10 }
 0x166   :  { %v433_v1 = vsel %vm5364_vm8, %v4259_v16, %v429_v61  ;;  %v434_v2 = vsel %vm5364_vm8, %v429_v61, %v4247_v6  ;;  %vm5369_vm8 = vcmask 539648  }
 0x167   :  { %438 = vst [vmem:[#allocation3 + $0x90] sm:$0xf] %v433_v1  ;;  %439 = vst [vmem:[#allocation3 + $0x98] sm:$0xf] %v434_v2  ;;  %726 = vrot.lane.b32.xlu1 %v715_v60, %s4072_s23  ;;  %v4327_v4 = vpop.permute.xlu0 %405  ;;  %v1144_v60 = vld [vmem:[#allocation2 + $0x8] sm:$0xf0] }
 0x168   :  { %v1145_v2 = vld [vmem:[#allocation2 + $0x10] sm:$0xf0] }
 0x169   :  { %v474_v5 = vpop.permute.xlu1 %473  ;;  %1025 = vrot.lane.b32.xlu0 %v1021_v0, %s4051_s27  ;;  %v1150_v0 = vrot.slane %v1144_v60, 4 }
 0x16a   :  { %v478_v9 = vsel %vm5362_vm10, %v4267_v21, %v474_v5  ;;  %v479_v10 = vsel %vm5362_vm10, %v474_v5, %v4255_v13  ;;  %v1039_v13 = vld [vmem:[#allocation2 + $0x10] sm:$0xf0]  ;;  %vm5365_vm10 = vcmask 556032  }
 0x16b   :  { %483 = vst [vmem:[#allocation3 + $0xa8] sm:$0xf] %v478_v9  ;;  %484 = vst [vmem:[#allocation3 + $0xb0] sm:$0xf] %v479_v10  ;;  %1027 = vrot.lane.b32.xlu1 %v1022_v7, %s4051_s27  ;;  %v4335_v6 = vpop.permute.xlu0 %450  ;;  %v1151_v9 = vrot.slane %v1145_v2, 4 }
 0x16d   :  { %v519_v11 = vpop.permute.xlu1 %518  ;;  %1045 = vrot.lane.b32.xlu0 %v1038_v12, %s4061_s0 }
 0x16e   :  { %v523_v15 = vsel %vm5361_vm11, %v4275_v24, %v519_v11  ;;  %v524_v16 = vsel %vm5361_vm11, %v519_v11, %v4263_v19  ;;  %vm5363_vm11 = vcmask 695296  }
 0x16f   :  { %528 = vst [vmem:[#allocation3 + $0xc0] sm:$0xf] %v523_v15  ;;  %529 = vst [vmem:[#allocation3 + $0xc8] sm:$0xf] %v524_v16  ;;  %1047 = vrot.lane.b32.xlu1 %v1039_v13, %s4061_s0  ;;  %v4343_v18 = vpop.permute.xlu0 %495  ;;  %v1167_v16 = vld [vmem:[#allocation2 + $0x8] sm:$0xf0] }
 0x170   :  { %v1100_v13 = vld [vmem:[#allocation2] sm:$0xf0] }
 0x171   :  { %v4345_v21 = vpop.permute.xlu1 %563  ;;  %1068 = vrot.lane.b32.xlu0 %v1064_v20, %s4053_s29  ;;  %v1168_v20 = vld [vmem:[#allocation2 + $0x10] sm:$0xf0] }
 0x172   :  { %v569_v24 = vsel %vm5367_vm12, %v4345_v21, %v4271_v23 }
 0x173   :  { %574 = vst [vmem:[#allocation3 + $0xe0] sm:$0xf] %v569_v24  ;;  %1070 = vrot.lane.b32.xlu1 %v1065_v22, %s4053_s29  ;;  %v275_v19 = vpop.permute.xlu0 %274  ;;  %v1106_v24 = vrot.slane %v1100_v13, 4  ;;  %v1253_v13 = vld [vmem:[#allocation2 + $0x8] sm:$0xf0] }
 0x174   :  { %284 = vst.msk [vmem:[#allocation3 + $0x40] sm:$0xf0] %vm193_vm13, %v275_v19 }
 0x175   :  { %v4353_v25 = vpop.permute.xlu1 %183  ;;  %1088 = vrot.lane.b32.xlu0 %v1081_v26, %s4062_s11 }
 0x176   :  { %194 = vst.msk [vmem:[#allocation3 + $0x10] sm:$0xf0] %vm193_vm13, %v4353_v25 }
 0x177   :  { %1090 = vrot.lane.b32.xlu1 %v1082_v28, %s4062_s11  ;;  %v320_v23 = vpop.permute.xlu0 %319 }
 0x178   :  { %329 = vst.msk [vmem:[#allocation3 + $0x58] sm:$0xf0] %vm193_vm13, %v320_v23 }
 0x179   :  { %v4360_v30 = vpop.permute.xlu1 %229  ;;  %1023 = vrot.lane.b32.xlu0 %v1020_v29, %s4051_s27 }
 0x17a   :  { %239 = vst.msk [vmem:[#allocation3 + $0x28] sm:$0xf0] %vm193_vm13, %v4360_v30 }
 0x17b   :  { %1043 = vrot.lane.b32.xlu1 %v1037_v34, %s4061_s0  ;;  %v365_v35 = vpop.permute.xlu0 %364 }
 0x17c   :  { %374 = vst.msk [vmem:[#allocation3 + $0x70] sm:$0xf0] %vm193_vm13, %v365_v35 }
 0x17d   :  { %v273_v38 = vpop.permute.xlu1 %272  ;;  %v741_v41 = vld [vmem:[#allocation3 + $0x10] sm:$0xff]  ;;  %1066 = vrot.lane.b32.xlu0 %v1063_v36, %s4053_s29 }
 0x17e   :  { %v277_v42 = vsel %vm5374_vm14, %v4301_v46, %v273_v38  ;;  %v278_v43 = vsel %vm5374_vm14, %v273_v38, %v275_v19  ;;  %950 = vst.msk [vmem:[#allocation3 + $0x10] sm:$0xf] %vm168_vm2, %v944_v37  ;;  %v1187_v37 = vld [vmem:[#allocation2 + $0x8] sm:$0xf0] }
 0x17f   :  { %282 = vst [vmem:[#allocation3 + $0x30] sm:$0xf0] %v277_v42  ;;  %283 = vst [vmem:[#allocation3 + $0x38] sm:$0xf0] %v278_v43  ;;  %1086 = vrot.lane.b32.xlu1 %v1080_v44, %s4062_s11  ;;  %v410_v47 = vpop.permute.xlu0 %409  ;;  %v750_v55 = vld [vmem:[#allocation3 + $0x58] sm:$0xff] }
 0x180   :  { %419 = vst.msk [vmem:[#allocation3 + $0x88] sm:$0xf0] %vm193_vm13, %v410_v47 }
 0x181   :  { %v318_v49 = vpop.permute.xlu1 %317  ;;  %v744_v46 = vld [vmem:[#allocation3 + $0x28] sm:$0xff]  ;;  %1111 = vrot.lane.b32.xlu0 %v1107_v48, %s4054_s30 }
 0x182   :  { %v322_v51 = vsel %vm321_vm15, %v4309_v53, %v318_v49  ;;  %v323_v52 = vsel %vm321_vm15, %v318_v49, %v320_v23  ;;  %v3745_v54 = vpack.c.bf16 %v744_v46, %v741_v41  ;;  %v747_v53 = vld [vmem:[#allocation3 + $0x40] sm:$0xff]  ;;  %v1188_v41 = vld [vmem:[#allocation2 + $0x10] sm:$0xf0]  ;;  %v937_v46 = vld [vmem:[#allocation2 + $0x8] sm:$0xf0] }
 0x183   :  { %327 = vst [vmem:[#allocation3 + $0x48] sm:$0xf0] %v322_v51  ;;  %328 = vst [vmem:[#allocation3 + $0x50] sm:$0xf0] %v323_v52  ;;  %1113 = vrot.lane.b32.xlu1 %v1108_v50, %s4054_s30  ;;  %v455_v56 = vpop.permute.xlu0 %454  ;;  %v3748_v1 = vpack.c.bf16 %v750_v55, %v747_v53  ;;  %v753_v5 = vld [vmem:[#allocation3 + $0x70] sm:$0xff]  ;;  %v1194_v48 = vrot.slane %v1188_v41, 4 }
 0x184   :  { %3746 = vmatpush3.bf16.msra.mxu1 %v3745_v54  ;;  %464 = vst.msk [vmem:[#allocation3 + $0xa0] sm:$0xf0] %vm193_vm13, %v455_v56  ;;  %v1143_v23 = vld [vmem:[#allocation2] sm:$0xf0] }
 0x185   :  { %v363_v57 = vpop.permute.xlu1 %362  ;;  %3747 = vmatprep.subr.bf16.mxu1 %v5379_v8  ;;  %1131 = vrot.lane.b32.xlu0 %v1124_v58, %s4063_s12  ;;  %v1149_v34 = vrot.slane %v1143_v23, 4  ;;  %v936_v50 = vld [vmem:[#allocation2] sm:$0xf0] }
 0x186   :  { %v367_v61 = vsel %vm5377_vm0, %v4317_v59, %v363_v57  ;;  %v368_v62 = vsel %vm5377_vm0, %v363_v57, %v365_v35  ;;  %v942_v54 = vrot.slane %v936_v50, 4  ;;  %v1230_v57 = vld [vmem:[#allocation2 + $0x8] sm:$0xf0] }
 0x187   :  { %372 = vst [vmem:[#allocation3 + $0x60] sm:$0xf0] %v367_v61  ;;  %373 = vst [vmem:[#allocation3 + $0x68] sm:$0xf0] %v368_v62  ;;  %1133 = vrot.lane.b32.xlu1 %v1125_v63, %s4063_s12  ;;  %v500_v3 = vpop.permute.xlu0 %499  ;;  %v756_v7 = vld [vmem:[#allocation3 + $0x88] sm:$0xff] }
 0x188   :  { %3749 = vmatpush3.bf16.msra.mxu1 %v3748_v1  ;;  %509 = vst.msk [vmem:[#allocation3 + $0xb8] sm:$0xf0] %vm193_vm13, %v500_v3  ;;  %v3751_v10 = vpack.c.bf16 %v756_v7, %v753_v5  ;;  %v1211_v61 = vld [vmem:[#allocation2 + $0x10] sm:$0xf0]  ;;  %v1236_v1 = vrot.slane %v1230_v57, 4 }
 0x189   :  { %v408_v59 = vpop.permute.xlu1 %407  ;;  %3750 = vmatprep.subr.bf16.mxu1 %v5379_v8  ;;  %1154 = vrot.lane.b32.xlu0 %v1150_v0, %s4055_s5  ;;  %v1231_v62 = vld [vmem:[#allocation2 + $0x10] sm:$0xf0] }
 0x18a   :  { %v412_v11 = vsel %vm5366_vm1, %v4327_v4, %v408_v59  ;;  %v413_v12 = vsel %vm5366_vm1, %v408_v59, %v410_v47  ;;  %vm5368_vm1 = vcmask 523264   ;;  %v1237_v0 = vrot.slane %v1231_v62, 4  ;;  %v749_v59 = vld [vmem:[#allocation3 + $0x50] sm:$0xff]  ;;  %v1316_v62 = vld [vmem:[#allocation2 + $0x8] sm:$0xf0] }
 0x18b   :  { %417 = vst [vmem:[#allocation3 + $0x78] sm:$0xf0] %v412_v11  ;;  %418 = vst [vmem:[#allocation3 + $0x80] sm:$0xf0] %v413_v12  ;;  %1156 = vrot.lane.b32.xlu1 %v1151_v9, %s4055_s5  ;;  %v545_v14 = vpop.permute.xlu0 %544  ;;  %v759_v19 = vld [vmem:[#allocation3 + $0xa0] sm:$0xff] }
 0x18c   :  { %3752 = vmatpush3.bf16.msra.mxu1 %v3751_v10  ;;  %554 = vst.msk [vmem:[#allocation3 + $0xd0] sm:$0xf0] %vm193_vm13, %v545_v14  ;;  %v746_v10 = vld [vmem:[#allocation3 + $0x38] sm:$0xff] }
 0x18d   :  { %v453_v15 = vpop.permute.xlu1 %452  ;;  %3753 = vmatprep.subr.bf16.mxu1 %v5379_v8  ;;  %1174 = vrot.lane.b32.xlu0 %v1167_v16, %s4064_s1  ;;  %v3724_v12 = vpack.c.bf16 %v749_v59, %v746_v10 }
 0x18e   :  { %v457_v4 = vsel %vm5363_vm11, %v4335_v6, %v453_v15  ;;  %v458_v17 = vsel %vm5363_vm11, %v453_v15, %v455_v56  ;;  %vm5373_vm11 = vcmask 1039360  }
 0x18f   :  { %462 = vst [vmem:[#allocation3 + $0x90] sm:$0xf0] %v457_v4  ;;  %463 = vst [vmem:[#allocation3 + $0x98] sm:$0xf0] %v458_v17  ;;  %1176 = vrot.lane.b32.xlu1 %v1168_v20, %s4064_s1  ;;  %v590_v22 = vpop.permute.xlu0 %589  ;;  %v762_v26 = vld [vmem:[#allocation3 + $0xb8] sm:$0xff] }
 0x190   :  { %599 = vst.msk [vmem:[#allocation3 + $0xe8] sm:$0xf0] %vm193_vm13, %v590_v22  ;;  %v3754_v28 = vpack.c.bf16 %v762_v26, %v759_v19  ;;  %v1186_v4 = vld [vmem:[#allocation2] sm:$0xf0]  ;;  %v1254_v20 = vld [vmem:[#allocation2 + $0x10] sm:$0xf0] }
 0x191   :  { %v498_v27 = vpop.permute.xlu1 %497  ;;  %1109 = vrot.lane.b32.xlu0 %v1106_v24, %s4054_s30  ;;  %v752_v19 = vld [vmem:[#allocation3 + $0x68] sm:$0xff] }
 0x192   :  { %v502_v6 = vsel %vm5365_vm10, %v4343_v18, %v498_v27  ;;  %v503_v29 = vsel %vm5365_vm10, %v498_v27, %v500_v3  ;;  %3755 = vmatpush3.bf16.msra.mxu1 %v3754_v28  ;;  %vm5375_vm10 = vcmask 1022976   ;;  %v755_v17 = vld [vmem:[#allocation3 + $0x80] sm:$0xff]  ;;  %v1192_v27 = vrot.slane %v1186_v4, 4  ;;  %v754_v23 = vld [vmem:[#allocation3 + $0x78] sm:$0xff] }
 0x193   :  { %507 = vst [vmem:[#allocation3 + $0xa8] sm:$0xf0] %v502_v6  ;;  %508 = vst [vmem:[#allocation3 + $0xb0] sm:$0xf0] %v503_v29  ;;  %1129 = vrot.lane.b32.xlu1 %v1123_v31, %s4063_s12  ;;  %v182_v32 = vpop.permute.xlu0 %181  ;;  %3756 = vmatprep.subr.bf16.mxu1 %v5379_v8  ;;  %v765_v43 = vld [vmem:[#allocation3 + $0xd0] sm:$0xff]  ;;  %v3728_v28 = vpack.c.bf16 %v755_v17, %v752_v19 }
 0x194   :  { %v186_v35 = vsel %vm5373_vm11, %v4285_v33, %v182_v32  ;;  %v187_v18 = vsel %vm5373_vm11, %v182_v32, %v4353_v25  ;;  %v1193_v33 = vrot.slane %v1187_v37, 4  ;;  %v1229_v31 = vld [vmem:[#allocation2] sm:$0xf0]  ;;  %v1340_v17 = vld [vmem:[#allocation2 + $0x10] sm:$0xf0] }
 0x195   :  { %v543_v36 = vpop.permute.xlu1 %542  ;;  %191 = vst [vmem:[#allocation3] sm:$0xf0] %v186_v35  ;;  %192 = vst [vmem:[#allocation3 + $0x8] sm:$0xf0] %v187_v18  ;;  %1152 = vrot.lane.b32.xlu0 %v1149_v34, %s4055_s5  ;;  %v1209_v34 = vld [vmem:[#allocation2] sm:$0xf0] }
 0x196   :  { %v548_v38 = vsel %vm5369_vm8, %v543_v36, %v545_v14  ;;  %v748_v14 = vld [vmem:[#allocation3 + $0x48] sm:$0xff]  ;;  %v751_v35 = vld [vmem:[#allocation3 + $0x60] sm:$0xff] }
 0x197   :  { %553 = vst [vmem:[#allocation3 + $0xc8] sm:$0xf0] %v548_v38  ;;  %1172 = vrot.lane.b32.xlu1 %v1166_v39, %s4064_s1  ;;  %v228_v42 = vpop.permute.xlu0 %227  ;;  %v768_v44 = vld [vmem:[#allocation3 + $0xe8] sm:$0xff]  ;;  %v3730_v18 = vpack.c.bf16 %v754_v23, %v751_v35  ;;  %v1235_v38 = vrot.slane %v1229_v31, 4  ;;  %v1272_v4 = vld [vmem:[#allocation2] sm:$0xf0] }
 0x198   :  { %v232_v25 = vsel %vm5375_vm10, %v4293_v40, %v228_v42  ;;  %v233_v45 = vsel %vm5375_vm10, %v228_v42, %v4360_v30  ;;  %v3757_v49 = vpack.c.bf16 %v768_v44, %v765_v43  ;;  %v1210_v40 = vld [vmem:[#allocation2 + $0x8] sm:$0xf0]  ;;  %v943_v30 = vrot.slane %v937_v46, 4  ;;  %v1295_v23 = vld [vmem:[#allocation2] sm:$0xf0] }
 0x199   :  { %v588_v47 = vpop.permute.xlu1 %587  ;;  %237 = vst [vmem:[#allocation3 + $0x18] sm:$0xf0] %v232_v25  ;;  %238 = vst [vmem:[#allocation3 + $0x20] sm:$0xf0] %v233_v45  ;;  %1197 = vrot.lane.b32.xlu0 %v1193_v33, %s4039_s15  ;;  %v1273_v43 = vld [vmem:[#allocation2 + $0x8] sm:$0xf0] }
 0x19a   :  { %v593_v51 = vsel %vm5368_vm1, %v588_v47, %v590_v22  ;;  %3758 = vmatpush3.bf16.msra.mxu1 %v3757_v49  ;;  %v745_v22 = vld [vmem:[#allocation3 + $0x30] sm:$0xff]  ;;  %v760_v41 = vld [vmem:[#allocation3 + $0xa8] sm:$0xff]  ;;  %v1252_v25 = vld [vmem:[#allocation2] sm:$0xf0]  ;;  %v1279_v46 = vrot.slane %v1273_v43, 4 }
 0x19b   :  { %598 = vst [vmem:[#allocation3 + $0xe0] sm:$0xf0] %v593_v51  ;;  %1199 = vrot.lane.b32.xlu1 %v1194_v48, %s4039_s15  ;;  %v541_v52 = vpop.permute.xlu0 %540  ;;  %3759 = vmatprep.subr.bf16.mxu1 %v5379_v8  ;;  %v3726_v24 = vpack.c.bf16 %v748_v14, %v745_v22  ;;  %v761_v32 = vld [vmem:[#allocation3 + $0xb0] sm:$0xff]  ;;  %v1278_v22 = vrot.slane %v1272_v4, 4  ;;  %v1359_v35 = vld [vmem:[#allocation2 + $0x8] sm:$0xf0] }
 0x19c   :  { %v547_v55 = vsel %vm5369_vm8, %v541_v52, %v543_v36  ;;  %v740_v58 = vld [vmem:[#allocation3 + $0x8] sm:$0xff]  ;;  %v739_v53 = vld [vmem:[#allocation3] sm:$0xff]  ;;  %vm5371_vm8 = vcmask 375808   ;;  %v758_v36 = vld [vmem:[#allocation3 + $0x98] sm:$0xff] }
 0x19d   :  { %v562_v56 = vpop.permute.xlu1 %561  ;;  %552 = vst [vmem:[#allocation3 + $0xc0] sm:$0xf0] %v547_v55  ;;  %1217 = vrot.lane.b32.xlu0 %v1210_v40, %s4065_s14  ;;  %948 = vst [vmem:[#allocation3] sm:$0xf] %v942_v54  ;;  %v3732_v39 = vpack.c.bf16 %v761_v32, %v758_v36  ;;  %v757_v45 = vld [vmem:[#allocation3 + $0x90] sm:$0xff] }
 0x19e   :  { %v568_v60 = vsel %vm5367_vm12, %v562_v56, %v4345_v21  ;;  %949 = vst [vmem:[#allocation3 + $0x8] sm:$0xf] %v943_v30  ;;  %vm616_vm12 = vcmask 392192   ;;  %v3734_v48 = vpack.c.bf16 %v760_v41, %v757_v45  ;;  %v764_v49 = vld [vmem:[#allocation3 + $0xc8] sm:$0xff]  ;;  %v1360_v36 = vld [vmem:[#allocation2 + $0x10] sm:$0xf0] }
 0x19f   :  { %573 = vst [vmem:[#allocation3 + $0xd8] sm:$0xf] %v568_v60  ;;  %1219 = vrot.lane.b32.xlu1 %v1211_v61, %s4065_s14  ;;  %v586_v63 = vpop.permute.xlu0 %585  ;;  %v1296_v61 = vld [vmem:[#allocation2 + $0x8] sm:$0xf0] }
 0x1a0   :  { %v592_v2 = vsel %vm5368_vm1, %v586_v63, %v588_v47  ;;  %v743_v5 = vld [vmem:[#allocation3 + $0x20] sm:$0xff]  ;;  %v742_v7 = vld [vmem:[#allocation3 + $0x18] sm:$0xff]  ;;  %vm646_vm1 = vcmask 384000   ;;  %v1274_v47 = vld [vmem:[#allocation2 + $0x10] sm:$0xf0] }
 0x1a1   :  { %v4428_v3 = vpop.permute.xlu1 %610  ;;  %597 = vst [vmem:[#allocation3 + $0xd8] sm:$0xf0] %v592_v2  ;;  %1240 = vrot.lane.b32.xlu0 %v1236_v1, %s4056_s6  ;;  %v3720_v21 = vpack.c.bf16 %v743_v5, %v740_v58  ;;  %v3722_v9 = vpack.c.bf16 %v742_v7, %v739_v53  ;;  %v1280_v30 = vrot.slane %v1274_v47, 4  ;;  %v1297_v1 = vld [vmem:[#allocation2 + $0x10] sm:$0xf0] }
 0x1a2   :  { %v767_v44 = vld [vmem:[#allocation3 + $0xe0] sm:$0xff]  ;;  %v1317_v2 = vld [vmem:[#allocation2 + $0x10] sm:$0xf0] }
 0x1a3   :  { %1242 = vrot.lane.b32.xlu1 %v1237_v0, %s4056_s6  ;;  %3721 = vmatprep.subr.bf16.mxu0 %v3720_v21  ;;  %v4432_v11 = vpop.permute.xlu0 %612  ;;  %v3736_v51 = vpack.c.bf16 %v767_v44, %v764_v49  ;;  %v1322_v0 = vrot.slane %v1316_v62, 4  ;;  %v1323_v59 = vrot.slane %v1317_v2, 4  ;;  %v1358_v62 = vld [vmem:[#allocation2] sm:$0xf0] }
 0x1a4   :  { %v618_v15 = vsel %vm616_vm12, %v4428_v3, %v4432_v11  ;;  %3723 = vmatpush1.bf16.msra.mxu0 %v3722_v9  ;;  %v763_v56 = vld [vmem:[#allocation3 + $0xc0] sm:$0xff] }
 0x1a5   :  { %v4437_v16 = vpop.permute.xlu1 %640  ;;  %624 = vst [vmem:[#allocation3 + $0xf8] sm:$0xf] %v618_v15  ;;  %1260 = vrot.lane.b32.xlu0 %v1253_v13, %s4066_s17  ;;  %3725 = vmatprep.subr.bf16.mxu0 %v3724_v12  ;;  %v1339_v13 = vld [vmem:[#allocation2 + $0x8] sm:$0xf0] }
 0x1a7   :  { %1262 = vrot.lane.b32.xlu1 %v1254_v20, %s4066_s17  ;;  %v4441_v26 = vpop.permute.xlu0 %642 }
 0x1a8   :  { %v648_v6 = vsel %vm646_vm1, %v4437_v16, %v4441_v26  ;;  %3727 = vmatpush1.bf16.msra.mxu0 %v3726_v24  ;;  %v766_v52 = vld [vmem:[#allocation3 + $0xd8] sm:$0xff] }
 0x1a9   :  { %v667_v29 = vpop.permute.xlu1 %666  ;;  %654 = vst [vmem:[#allocation3 + $0xf8] sm:$0xf0] %v648_v6  ;;  %1195 = vrot.lane.b32.xlu0 %v1192_v27, %s4039_s15  ;;  %3729 = vmatprep.subr.bf16.mxu0 %v3728_v28  ;;  %v3738_v57 = vpack.c.bf16 %v766_v52, %v763_v56  ;;  %v1315_v28 = vld [vmem:[#allocation2] sm:$0xf0]  ;;  %v1414_v52 = vld [vmem:[#allocation2 + $0x10] sm:$0xf0] }
 0x1aa   :  { %v1321_v31 = vrot.slane %v1315_v28, 4  ;;  %v1422_v56 = vrot.slane %v1414_v52, 4  ;;  %v2217_v52 = vld [vmem:[#allocation2 + $0x18] sm:$0xf] }
 0x1ab   :  { %1215 = vrot.lane.b32.xlu1 %v1209_v34, %s4065_s14  ;;  %v4448_v37 = vpop.permute.xlu0 %668 }
 0x1ac   :  { %v674_v42 = vsel %vm5371_vm8, %v667_v29, %v4448_v37  ;;  %3731 = vmatpush1.bf16.msra.mxu0 %v3730_v18  ;;  %v1338_v18 = vld [vmem:[#allocation2] sm:$0xf0] }
 0x1ad   :  { %v697_v33 = vpop.permute.xlu1 %696  ;;  %680 = vst [vmem:[#allocation3 + $0x110] sm:$0xf] %v674_v42  ;;  %1238 = vrot.lane.b32.xlu0 %v1235_v38, %s4056_s6  ;;  %3733 = vmatprep.subr.bf16.mxu0 %v3732_v39  ;;  %v1367_v38 = vrot.slane %v1359_v35, 4  ;;  %v1368_v42 = vrot.slane %v1360_v36, 4 }
 0x1af   :  { %1258 = vrot.lane.b32.xlu1 %v1252_v25, %s4066_s17  ;;  %v699_v50 = vpop.permute.xlu0 %698 }
 0x1b0   :  { %v704_v40 = vsel %vm5372_vm7, %v697_v33, %v699_v50  ;;  %3735 = vmatpush1.bf16.msra.mxu0 %v3734_v48  ;;  %v770_v21 = vld [vmem:[#allocation3 + $0xf8] sm:$0xff]  ;;  %v1388_v48 = vld [vmem:[#allocation2 + $0x8] sm:$0xf0] }
 0x1b1   :  { %v609_v54 = vpop.permute.xlu1 %608  ;;  %710 = vst [vmem:[#allocation3 + $0x110] sm:$0xf0] %v704_v40  ;;  %1283 = vrot.lane.b32.xlu0 %v1279_v46, %s4057_s7  ;;  %3737 = vmatprep.subr.bf16.mxu0 %v3736_v51  ;;  %v4494_v46 = vld [vmem:[#allocation2 + $0x18] sm:$0xff]  ;;  %v1389_v51 = vld [vmem:[#allocation2 + $0x10] sm:$0xf0] }
 0x1b2   :  { %v617_v55 = vsel %vm616_vm12, %v609_v54, %v4428_v3 }
 0x1b3   :  { %623 = vst [vmem:[#allocation3 + $0xf0] sm:$0xf] %v617_v55  ;;  %1285 = vrot.lane.b32.xlu1 %v1280_v30, %s4057_s7  ;;  %v639_v58 = vpop.permute.xlu0 %638 }
 0x1b4   :  { %v647_v53 = vsel %vm646_vm1, %v639_v58, %v4437_v16  ;;  %3739 = vmatpush1.bf16.msra.mxu0 %v3738_v57 }
 0x1b5   :  { %v665_v60 = vpop.permute.xlu1 %664  ;;  %653 = vst [vmem:[#allocation3 + $0xf0] sm:$0xf0] %v647_v53  ;;  %1303 = vrot.lane.b32.xlu0 %v1296_v61, %s4037_s13  ;;  %v1442_v61 = vld [vmem:[#allocation2 + $0x8] sm:$0xf0] }
 0x1b6   :  { %v673_v63 = vsel %vm5371_vm8, %v665_v60, %v667_v29 }
 0x1b7   :  { %679 = vst [vmem:[#allocation3 + $0x108] sm:$0xf] %v673_v63  ;;  %1305 = vrot.lane.b32.xlu1 %v1297_v1, %s4037_s13  ;;  %v695_v3 = vpop.permute.xlu0 %694  ;;  %v1443_v1 = vld [vmem:[#allocation2 + $0x10] sm:$0xf0] }
 0x1b8   :  { %v703_v5 = vsel %vm5372_vm7, %v695_v3, %v697_v33  ;;  %v773_v9 = vld [vmem:[#allocation3 + $0x110] sm:$0xff]  ;;  %v1366_v3 = vrot.slane %v1358_v62, 4 }
 0x1b9   :  { %v615_v7 = vpop.permute.xlu1 %614  ;;  %709 = vst [vmem:[#allocation3 + $0x108] sm:$0xf0] %v703_v5  ;;  %1326 = vrot.lane.b32.xlu0 %v1322_v0, %s4058_s8  ;;  %v3740_v12 = vpack.c.bf16 %v773_v9, %v770_v21  ;;  %v1412_v0 = vld [vmem:[#allocation2] sm:$0xf0]  ;;  %v738_v9 = vld [vmem:[#allocation8] sm:$0xf] }
 0x1ba   :  { %v619_v10 = vsel %vm616_vm12, %v4432_v11, %v615_v7  ;;  %v1420_v4 = vrot.slane %v1412_v0, 4 }
 0x1bb   :  { %625 = vst.msk [vmem:[#allocation3 + $0x100] sm:$0xf] %vm168_vm2, %v619_v10  ;;  %1328 = vrot.lane.b32.xlu1 %v1323_v59, %s4058_s8  ;;  %v645_v14 = vpop.permute.xlu0 %644  ;;  %3741 = vmatprep.subr.bf16.mxu0 %v3740_v12  ;;  %v1387_v12 = vld [vmem:[#allocation2] sm:$0xf0] }
 0x1bc   :  { %v649_v15 = vsel %vm646_vm1, %v4441_v26, %v645_v14  ;;  %v769_v26 = vld [vmem:[#allocation3 + $0xf0] sm:$0xff] }
 0x1bd   :  { %v671_v16 = vpop.permute.xlu1 %670  ;;  %655 = vst.msk [vmem:[#allocation3 + $0x100] sm:$0xf0] %vm193_vm13, %v649_v15  ;;  %1346 = vrot.lane.b32.xlu0 %v1339_v13, %s4068_s18 }
 0x1be   :  { %v675_v11 = vsel %vm5371_vm8, %v4448_v37, %v671_v16  ;;  %vm728_vm8 = vcmask 359424   ;;  %v1361_v16 = vld [vmem:[#allocation2 + $0x18] sm:$0xf0] }
 0x1bf   :  { %681 = vst.msk [vmem:[#allocation3 + $0x118] sm:$0xf] %vm168_vm2, %v675_v11  ;;  %1348 = vrot.lane.b32.xlu1 %v1340_v17, %s4068_s18  ;;  %v701_v20 = vpop.permute.xlu0 %700 }
 0x1c0   :  { %v705_v24 = vsel %vm5372_vm7, %v699_v50, %v701_v20  ;;  %v772_v27 = vld [vmem:[#allocation3 + $0x108] sm:$0xff]  ;;  %vm782_vm7 = vcmask 1043456   ;;  %v1441_v20 = vld [vmem:[#allocation2] sm:$0xf0] }
 0x1c1   :  { %v723_v19 = vpop.permute.xlu1 %722  ;;  %711 = vst.msk [vmem:[#allocation3 + $0x118] sm:$0xf0] %vm193_vm13, %v705_v24  ;;  %1281 = vrot.lane.b32.xlu0 %v1278_v22, %s4057_s7  ;;  %v3742_v6 = vpack.c.bf16 %v772_v27, %v769_v26  ;;  %v1413_v50 = vld [vmem:[#allocation2 + $0x8] sm:$0xf0]  ;;  %v1369_v22 = vrot.slane %v1361_v16, 4 }
 0x1c2   :  { %v1421_v54 = vrot.slane %v1413_v50, 4  ;;  %v1415_v24 = vld [vmem:[#allocation2 + $0x18] sm:$0xf0] }
 0x1c3   :  { %1301 = vrot.lane.b32.xlu1 %v1295_v23, %s4037_s13  ;;  %v4482_v29 = vpop.permute.xlu0 %724  ;;  %3743 = vmatpush1.bf16.msra.mxu0 %v3742_v6  ;;  %v1390_v26 = vld [vmem:[#allocation2 + $0x18] sm:$0xf0] }
 0x1c4   :  { %v730_v32 = vsel %vm728_vm8, %v723_v19, %v4482_v29  ;;  %v771_v33 = vld [vmem:[#allocation3 + $0x100] sm:$0xff] }
 0x1c5   :  { %v960_v34 = vpop.permute.xlu1 %959  ;;  %736 = vst [vmem:[#allocation3 + $0x128] sm:$0xf] %v730_v32  ;;  %1324 = vrot.lane.b32.xlu0 %v1321_v31, %s4058_s8 }
 0x1c7   :  { %1344 = vrot.lane.b32.xlu1 %v1338_v18, %s4068_s18  ;;  %v962_v37 = vpop.permute.xlu0 %961 }
 0x1c8   :  { %v964_v39 = vsel %vm5373_vm11, %v960_v34, %v962_v37  ;;  %970 = vst.msk [vmem:[#allocation3 + $0x10] sm:$0xf0] %vm193_vm13, %v962_v37  ;;  %v774_v43 = vld [vmem:[#allocation3 + $0x118] sm:$0xff] }
 0x1c9   :  { %v983_v41 = vpop.permute.xlu1 %982  ;;  %969 = vst [vmem:[#allocation3 + $0x8] sm:$0xf0] %v964_v39  ;;  %1372 = vrot.lane.b32.xlu0 %v1367_v38, %s4069_s20  ;;  %v3760_v44 = vpack.c.bf16 %v774_v43, %v771_v33  ;;  %v1444_v37 = vld [vmem:[#allocation2 + $0x18] sm:$0xf0]  ;;  %v1467_v39 = vld [vmem:[#allocation2 + $0x8] sm:$0xf0] }
 0x1ca   :  { %v1475_v43 = vrot.slane %v1467_v39, 4 }
 0x1cb   :  { %1374 = vrot.lane.b32.xlu1 %v1368_v42, %s4069_s20  ;;  %3761 = vmatpush3.bf16.msra.mxu1 %v3760_v44  ;;  %v985_v25 = vpop.permute.xlu0 %984  ;;  %v1468_v42 = vld [vmem:[#allocation2 + $0x10] sm:$0xf0]  ;;  %v1469_v44 = vld [vmem:[#allocation2 + $0x18] sm:$0xf0] }
 0x1cc   :  { %v987_v45 = vsel %vm207_vm3, %v983_v41, %v985_v25  ;;  %993 = vst.msk [vmem:[#allocation3 + $0x28] sm:$0xf] %vm168_vm2, %v985_v25  ;;  %v776_v49 = vld [vmem:[#allocation3 + $0x128] sm:$0xf]  ;;  %3628 = vmatprep.subr.mxu1 %v4494_v46 }
 0x1cd   :  { %v1003_v47 = vpop.permute.xlu1 %1002  ;;  %992 = vst [vmem:[#allocation3 + $0x20] sm:$0xf] %v987_v45  ;;  %1397 = vrot.lane.b32.xlu0 %v1388_v48, %s4070_s21  ;;  %3528 = vmatprep.subr.msk.mxu0 %vm782_vm7, %v776_v49  ;;  %v1476_v45 = vrot.slane %v1468_v42, 4  ;;  %v1477_v49 = vrot.slane %v1469_v44, 4 }
 0x1cf   :  { %1399 = vrot.lane.b32.xlu1 %v1389_v51, %s4070_s21  ;;  %v1005_v40 = vpop.permute.xlu0 %1004  ;;  %v1498_v35 = vld [vmem:[#allocation3 + $0x10] sm:$0xff] }
 0x1d0   :  { %v1007_v30 = vsel %vm5375_vm10, %v1003_v47, %v1005_v40  ;;  %1013 = vst.msk [vmem:[#allocation3 + $0x28] sm:$0xf0] %vm193_vm13, %v1005_v40  ;;  %v1497_v59 = vld [vmem:[#allocation3 + $0x8] sm:$0xff] }
 0x1d1   :  { %v721_v55 = vpop.permute.xlu1 %720  ;;  %1012 = vst [vmem:[#allocation3 + $0x20] sm:$0xf0] %v1007_v30  ;;  %1426 = vrot.lane.b32.xlu0 %v1421_v54, %s4043_s19 }
 0x1d2   :  { %v729_v57 = vsel %vm728_vm8, %v721_v55, %v723_v19  ;;  %v2225_v55 = vrot.slane %v2217_v52, 4 }
 0x1d3   :  { %735 = vst [vmem:[#allocation3 + $0x120] sm:$0xf] %v729_v57  ;;  %1428 = vrot.lane.b32.xlu1 %v1422_v56, %s4043_s19  ;;  %v958_v58 = vpop.permute.xlu0 %957 }
 0x1d4   :  { %v963_v53 = vsel %vm5373_vm11, %v958_v58, %v960_v34  ;;  %vm778_vm11 = vcmask 818176   ;;  %v1423_v34 = vrot.slane %v1415_v24, 4 }
 0x1d5   :  { %v981_v60 = vpop.permute.xlu1 %980  ;;  %968 = vst [vmem:[#allocation3] sm:$0xf0] %v963_v53  ;;  %1451 = vrot.lane.b32.xlu0 %v1442_v61, %s4071_s22 }
 0x1d6   :  { %v986_v63 = vsel %vm207_vm3, %v981_v60, %v983_v41 }
 0x1d7   :  { %991 = vst [vmem:[#allocation3 + $0x18] sm:$0xf] %v986_v63  ;;  %1453 = vrot.lane.b32.xlu1 %v1443_v1, %s4071_s22  ;;  %v1001_v2 = vpop.permute.xlu0 %1000  ;;  %v1501_v6 = vld [vmem:[#allocation3 + $0x28] sm:$0xff] }
 0x1d8   :  { %v1006_v5 = vsel %vm5375_vm10, %v1001_v2, %v1003_v47  ;;  %v1500_v21 = vld [vmem:[#allocation3 + $0x20] sm:$0xff]  ;;  %v3787_v36 = vpack.c.bf16 %v1501_v6, %v1498_v35  ;;  %vm5390_vm10 = vcmask 711680  }
 0x1d9   :  { %v727_v7 = vpop.permute.xlu1 %726  ;;  %1011 = vst [vmem:[#allocation3 + $0x18] sm:$0xf0] %v1006_v5  ;;  %1370 = vrot.lane.b32.xlu0 %v1366_v3, %s4069_s20  ;;  %v3762_v15 = vpack.c.bf16 %v1500_v21, %v1497_v59  ;;  %v1466_v47 = vld [vmem:[#allocation2] sm:$0xf0] }
 0x1da   :  { %v731_v10 = vsel %vm728_vm8, %v4482_v29, %v727_v7  ;;  %v775_v14 = vld [vmem:[#allocation3 + $0x120] sm:$0xf]  ;;  %v1474_v51 = vrot.slane %v1466_v47, 4 }
 0x1db   :  { %737 = vst.msk [vmem:[#allocation3 + $0x130] sm:$0xf] %vm168_vm2, %v731_v10  ;;  %1395 = vrot.lane.b32.xlu1 %v1387_v12, %s4070_s21  ;;  %3529 = vmatpush1.msk.msra.mxu0 %vm782_vm7, %v775_v14  ;;  %v4516_v13 = vpop.permute.xlu0 %1025 }
 0x1dc   :  { %3763 = vmatprep.subr.bf16.mxu0 %v3762_v15  ;;  %3530 = vmatmul.mubr.msk.f32.vlgmr.msra.gmra.mrb[0].mxu0 %vm778_vm11, %v738_v9  ;;  %v1496_v28 = vld [vmem:[#allocation3] sm:$0xff] }
 0x1dd   :  { %v1028_v11 = vpop.permute.xlu1 %1027  ;;  %1611 = vmatprep.mubr.f32.mxu0 %v4494_v46  ;;  %1424 = vrot.lane.b32.xlu0 %v1420_v4, %s4043_s19 }
 0x1de   :  { %v1030_v17 = vsel %vm252_vm4, %v4516_v13, %v1028_v11  ;;  %1036 = vst.msk [vmem:[#allocation3 + $0x40] sm:$0xf] %vm168_vm2, %v1028_v11 }
 0x1df   :  { %1035 = vst [vmem:[#allocation3 + $0x38] sm:$0xf] %v1030_v17  ;;  %1449 = vrot.lane.b32.xlu1 %v1441_v20, %s4071_s22  ;;  %v1046_v19 = vpop.permute.xlu0 %1045 }
 0x1e0   :  { %v1499_v23 = vld [vmem:[#allocation3 + $0x18] sm:$0xff] }
 0x1e1   :  { %v1048_v27 = vpop.permute.xlu1 %1047  ;;  %1376 = vrot.lane.b32.xlu0 %v1369_v22, %s4069_s20  ;;  %v3764_v32 = vpack.c.bf16 %v1499_v23, %v1496_v28 }
 0x1e2   :  { %v1050_v29 = vsel %vm5374_vm14, %v1046_v19, %v1048_v27  ;;  %1056 = vst.msk [vmem:[#allocation3 + $0x40] sm:$0xf0] %vm193_vm13, %v1048_v27  ;;  %v777_v31 = vld [vmem:[#allocation3 + $0x130] sm:$0xf] }
 0x1e3   :  { %1055 = vst [vmem:[#allocation3 + $0x38] sm:$0xf0] %v1050_v29  ;;  %1401 = vrot.lane.b32.xlu1 %v1390_v26, %s4070_s21  ;;  %3629 = vmatpush3.msk.msra.mxu1 %vm782_vm7, %v777_v31  ;;  %v1069_v18 = vpop.permute.xlu0 %1068 }
 0x1e4   :  { %3786 = vmatprep.subr.bf16.mxu1 %v5379_v8  ;;  %3765 = vmatpush1.bf16.msra.mxu0 %v3764_v32 }
 0x1e5   :  { %v1071_v38 = vpop.permute.xlu1 %1070  ;;  %3631 = vmatmul.mubr.msk.f32.vlgmr.msra.gmra.mrb[0].mxu1 %vm778_vm11, %v738_v9  ;;  %1430 = vrot.lane.b32.xlu0 %v1423_v34, %s4043_s19 }
 0x1e6   :  { %v1073_v41 = vsel %vm5376_vm5, %v1069_v18, %v1071_v38  ;;  %1079 = vst.msk [vmem:[#allocation3 + $0x58] sm:$0xf] %vm168_vm2, %v1071_v38  ;;  %3788 = vmatpush3.bf16.msra.mxu1 %v3787_v36  ;;  %3659 = vmatprep.mubr.msk.f32.mxu1 %vm4073_vm9, %v4494_v46 }
 0x1e7   :  { %1078 = vst [vmem:[#allocation3 + $0x50] sm:$0xf] %v1073_v41  ;;  %1455 = vrot.lane.b32.xlu1 %v1444_v37, %s4071_s22  ;;  %3789 = vmatprep.subr.bf16.mxu1 %v5379_v8  ;;  %v1089_v33 = vpop.permute.xlu0 %1088 }
 0x1e9   :  { %v1091_v25 = vpop.permute.xlu1 %1090  ;;  %1480 = vrot.lane.b32.xlu0 %v1475_v43, %s4072_s23  ;;  %v1504_v53 = vld [vmem:[#allocation3 + $0x40] sm:$0xff] }
 0x1ea   :  { %v1093_v48 = vsel %vm321_vm15, %v1089_v33, %v1091_v25  ;;  %1099 = vst.msk [vmem:[#allocation3 + $0x58] sm:$0xf0] %vm193_vm13, %v1091_v25  ;;  %v1503_v63 = vld [vmem:[#allocation3 + $0x38] sm:$0xff] }
 0x1eb   :  { %1098 = vst [vmem:[#allocation3 + $0x50] sm:$0xf0] %v1093_v48  ;;  %1482 = vrot.lane.b32.xlu1 %v1476_v45, %s4072_s23  ;;  %v1024_v50 = vpop.permute.xlu0 %1023 }
 0x1ec   :  { %v1029_v40 = vsel %vm252_vm4, %v1024_v50, %v4516_v13 }
 0x1ed   :  { %v1044_v54 = vpop.permute.xlu1 %1043  ;;  %1034 = vst [vmem:[#allocation3 + $0x30] sm:$0xf] %v1029_v40  ;;  %1478 = vrot.lane.b32.xlu0 %v1474_v51, %s4072_s23 }
 0x1ee   :  { %v1049_v30 = vsel %vm5374_vm14, %v1044_v54, %v1046_v19  ;;  %vm5389_vm14 = vcmask 719872  }
 0x1ef   :  { %1054 = vst [vmem:[#allocation3 + $0x30] sm:$0xf0] %v1049_v30  ;;  %1484 = vrot.lane.b32.xlu1 %v1477_v49, %s4072_s23  ;;  %v1067_v56 = vpop.permute.xlu0 %1066 }
 0x1f0   :  { %v1072_v57 = vsel %vm5376_vm5, %v1067_v56, %v1069_v18  ;;  %vm5391_vm5 = vmmov %vm5390_vm10 }
 0x1f1   :  { %v1087_v58 = vpop.permute.xlu1 %1086  ;;  %v1507_v60 = vld [vmem:[#allocation3 + $0x58] sm:$0xff]  ;;  %1077 = vst [vmem:[#allocation3 + $0x48] sm:$0xf] %v1072_v57 }
 0x1f2   :  { %v1092_v61 = vsel %vm321_vm15, %v1087_v58, %v1089_v33  ;;  %v3790_v62 = vpack.c.bf16 %v1507_v60, %v1504_v53  ;;  %v1506_v1 = vld [vmem:[#allocation3 + $0x50] sm:$0xff] }
 0x1f3   :  { %1097 = vst [vmem:[#allocation3 + $0x48] sm:$0xf0] %v1092_v61  ;;  %v3766_v2 = vpack.c.bf16 %v1506_v1, %v1503_v63  ;;  %2232 = vrot.lane.b32.xlu1 %v2225_v55, %s4070_s21  ;;  %v1112_v3 = vpop.permute.xlu0 %1111 }
 0x1f4   :  { %3791 = vmatpush3.bf16.msra.mxu1 %v3790_v62 }
 0x1f5   :  { %v1114_v0 = vpop.permute.xlu1 %1113  ;;  %3767 = vmatprep.subr.bf16.mxu0 %v3766_v2  ;;  %3792 = vmatprep.subr.bf16.mxu1 %v5379_v8 }
 0x1f6   :  { %v1116_v5 = vsel %vm5378_vm6, %v1112_v3, %v1114_v0  ;;  %1122 = vst.msk [vmem:[#allocation3 + $0x70] sm:$0xf] %vm168_vm2, %v1114_v0  ;;  %v1502_v9 = vld [vmem:[#allocation3 + $0x30] sm:$0xff] }
 0x1f7   :  { %1121 = vst [vmem:[#allocation3 + $0x68] sm:$0xf] %v1116_v5  ;;  %v1132_v7 = vpop.permute.xlu0 %1131 }
 0x1f9   :  { %v1134_v59 = vpop.permute.xlu1 %1133 }
 0x1fa   :  { %v1136_v21 = vsel %vm5377_vm0, %v1132_v7, %v1134_v59  ;;  %1142 = vst.msk [vmem:[#allocation3 + $0x70] sm:$0xf0] %vm193_vm13, %v1134_v59  ;;  %v1505_v10 = vld [vmem:[#allocation3 + $0x48] sm:$0xff] }
 0x1fb   :  { %1141 = vst [vmem:[#allocation3 + $0x68] sm:$0xf0] %v1136_v21  ;;  %v3768_v12 = vpack.c.bf16 %v1505_v10, %v1502_v9  ;;  %v1155_v14 = vpop.permute.xlu0 %1154 }
 0x1fd   :  { %v1157_v15 = vpop.permute.xlu1 %1156  ;;  %3769 = vmatpush1.bf16.msra.mxu0 %v3768_v12 }
 0x1fe   :  { %v1159_v16 = vsel %vm5389_vm14, %v1155_v14, %v1157_v15  ;;  %1165 = vst.msk [vmem:[#allocation3 + $0x88] sm:$0xf] %vm168_vm2, %v1157_v15 }
 0x1ff   :  { %1164 = vst [vmem:[#allocation3 + $0x80] sm:$0xf] %v1159_v16  ;;  %v1175_v13 = vpop.permute.xlu0 %1174  ;;  %v2271_v16 = vld [vmem:[#allocation2 + $0x18] sm:$0xf] }
 0x201   :  { %v1177_v4 = vpop.permute.xlu1 %1176  ;;  %v1510_v28 = vld [vmem:[#allocation3 + $0x70] sm:$0xff] }
 0x202   :  { %v1179_v11 = vsel %vm5390_vm10, %v1175_v13, %v1177_v4  ;;  %1185 = vst.msk [vmem:[#allocation3 + $0x88] sm:$0xf0] %vm193_vm13, %v1177_v4  ;;  %v1509_v31 = vld [vmem:[#allocation3 + $0x68] sm:$0xff]  ;;  %vm5392_vm10 = vcmask 703488   ;;  %v2279_v4 = vrot.slane %v2271_v16, 4 }
 0x203   :  { %1184 = vst [vmem:[#allocation3 + $0x80] sm:$0xf0] %v1179_v11  ;;  %v1110_v17 = vpop.permute.xlu0 %1109 }
 0x204   :  { %v1115_v20 = vsel %vm5378_vm6, %v1110_v17, %v1112_v3  ;;  %2286 = vrot.lane.b32.xlu1 %v2279_v4, %s4071_s22 }
 0x205   :  { %v1130_v22 = vpop.permute.xlu1 %1129  ;;  %1120 = vst [vmem:[#allocation3 + $0x60] sm:$0xf] %v1115_v20 }
 0x206   :  { %v1135_v24 = vsel %vm5377_vm0, %v1130_v22, %v1132_v7  ;;  %vm5397_vm0 = vcmask 695296  }
 0x207   :  { %1140 = vst [vmem:[#allocation3 + $0x60] sm:$0xf0] %v1135_v24  ;;  %v1153_v19 = vpop.permute.xlu0 %1152 }
 0x208   :  { %v1158_v26 = vsel %vm5389_vm14, %v1153_v19, %v1155_v14  ;;  %vm5393_vm14 = vcmask 695296   ;;  %v2192_v14 = vld [vmem:[#allocation2 + $0x18] sm:$0xf] }
 0x209   :  { %v1173_v27 = vpop.permute.xlu1 %1172  ;;  %v1513_v23 = vld [vmem:[#allocation3 + $0x88] sm:$0xff]  ;;  %1163 = vst [vmem:[#allocation3 + $0x78] sm:$0xf] %v1158_v26  ;;  %2203 = vrot.lane.b32.xlu0 %v2192_v14, %s4069_s20 }
 0x20a   :  { %v1178_v6 = vsel %vm5391_vm5, %v1173_v27, %v1175_v13  ;;  %v3793_v29 = vpack.c.bf16 %v1513_v23, %v1510_v28  ;;  %v1512_v32 = vld [vmem:[#allocation3 + $0x80] sm:$0xff]  ;;  %vm5394_vm5 = vcmask 687104   ;;  %v2246_v23 = vld [vmem:[#allocation2 + $0x18] sm:$0xf] }
 0x20b   :  { %1183 = vst [vmem:[#allocation3 + $0x78] sm:$0xf0] %v1178_v6  ;;  %v3770_v34 = vpack.c.bf16 %v1512_v32, %v1509_v31  ;;  %v1198_v35 = vpop.permute.xlu0 %1197  ;;  %v2943_v6 = vld [vmem:[#allocation2 + $0x18] sm:$0xf0] }
 0x20c   :  { %3794 = vmatpush3.bf16.msra.mxu1 %v3793_v29 }
 0x20d   :  { %v1200_v18 = vpop.permute.xlu1 %1199  ;;  %3771 = vmatprep.subr.bf16.mxu0 %v3770_v34  ;;  %3795 = vmatprep.subr.bf16.mxu1 %v5379_v8 }
 0x20e   :  { %v1202_v36 = vsel %vm5392_vm10, %v1198_v35, %v1200_v18  ;;  %1208 = vst.msk [vmem:[#allocation3 + $0xa0] sm:$0xf] %vm168_vm2, %v1200_v18  ;;  %v1508_v41 = vld [vmem:[#allocation3 + $0x60] sm:$0xff]  ;;  %vm5395_vm10 = vcmask 556032   ;;  %2257 = vrot.lane.b32.xlu0 %v2246_v23, %s4043_s19  ;;  %v2997_v18 = vld [vmem:[#allocation2 + $0x18] sm:$0xf0] }
 0x20f   :  { %1207 = vst [vmem:[#allocation3 + $0x98] sm:$0xf] %v1202_v36  ;;  %v1218_v37 = vpop.permute.xlu0 %1217  ;;  %vm5398_vm6 = vmmov %vm5395_vm10 }
 0x211   :  { %v1220_v38 = vpop.permute.xlu1 %1219 }
 0x212   :  { %v1222_v39 = vsel %vm5393_vm14, %v1218_v37, %v1220_v38  ;;  %1228 = vst.msk [vmem:[#allocation3 + $0xa0] sm:$0xf0] %vm193_vm13, %v1220_v38  ;;  %v1511_v42 = vld [vmem:[#allocation3 + $0x78] sm:$0xff]  ;;  %vm5396_vm14 = vcmask 703488  }
 0x213   :  { %1227 = vst [vmem:[#allocation3 + $0x98] sm:$0xf0] %v1222_v39  ;;  %v3772_v33 = vpack.c.bf16 %v1511_v42, %v1508_v41  ;;  %v1241_v43 = vpop.permute.xlu0 %1240  ;;  %v3005_v39 = vrot.slane %v2997_v18, 4 }
 0x215   :  { %v1243_v44 = vpop.permute.xlu1 %1242  ;;  %3773 = vmatpush1.bf16.msra.mxu0 %v3772_v33  ;;  %v2972_v33 = vld [vmem:[#allocation2 + $0x18] sm:$0xf0] }
 0x216   :  { %v1245_v25 = vsel %vm5394_vm5, %v1241_v43, %v1243_v44  ;;  %1251 = vst.msk [vmem:[#allocation3 + $0xb8] sm:$0xf] %vm168_vm2, %v1243_v44 }
 0x217   :  { %1250 = vst [vmem:[#allocation3 + $0xb0] sm:$0xf] %v1245_v25  ;;  %v1261_v45 = vpop.permute.xlu0 %1260 }
 0x219   :  { %v1263_v47 = vpop.permute.xlu1 %1262  ;;  %v1516_v55 = vld [vmem:[#allocation3 + $0xa0] sm:$0xff] }
 0x21a   :  { %v1265_v48 = vsel %vm5395_vm10, %v1261_v45, %v1263_v47  ;;  %1271 = vst.msk [vmem:[#allocation3 + $0xb8] sm:$0xf0] %vm193_vm13, %v1263_v47  ;;  %v1515_v53 = vld [vmem:[#allocation3 + $0x98] sm:$0xff]  ;;  %vm5400_vm10 = vcmask 539648  }
 0x21b   :  { %1270 = vst [vmem:[#allocation3 + $0xb0] sm:$0xf0] %v1265_v48  ;;  %v1196_v49 = vpop.permute.xlu0 %1195 }
 0x21c   :  { %v1201_v50 = vsel %vm5396_vm14, %v1196_v49, %v1198_v35  ;;  %vm5402_vm14 = vcmask 523264   ;;  %v2951_v35 = vrot.slane %v2943_v6, 4 }
 0x21d   :  { %v1216_v51 = vpop.permute.xlu1 %1215  ;;  %1206 = vst [vmem:[#allocation3 + $0x90] sm:$0xf] %v1201_v50 }
 0x21e   :  { %v1221_v52 = vsel %vm5397_vm0, %v1216_v51, %v1218_v37  ;;  %vm5399_vm0 = vcmask 547840   ;;  %v2300_v37 = vld [vmem:[#allocation2 + $0x18] sm:$0xf]  ;;  %2958 = vrot.lane.b32.xlu1 %v2951_v35, %s4069_s20 }
 0x21f   :  { %1226 = vst [vmem:[#allocation3 + $0x90] sm:$0xf0] %v1221_v52  ;;  %v1239_v40 = vpop.permute.xlu0 %1238  ;;  %2311 = vrot.lane.b32.xlu0 %v2300_v37, %s4072_s23 }
 0x220   :  { %v1244_v54 = vsel %vm5394_vm5, %v1239_v40, %v1241_v43  ;;  %vm5403_vm5 = vmmov %vm5399_vm0 }
 0x221   :  { %v1259_v30 = vpop.permute.xlu1 %1258  ;;  %v1519_v56 = vld [vmem:[#allocation3 + $0xb8] sm:$0xff]  ;;  %1249 = vst [vmem:[#allocation3 + $0xa8] sm:$0xf] %v1244_v54 }
 0x222   :  { %v1264_v57 = vsel %vm5398_vm6, %v1259_v30, %v1261_v45  ;;  %v3796_v58 = vpack.c.bf16 %v1519_v56, %v1516_v55  ;;  %v1518_v60 = vld [vmem:[#allocation3 + $0xb0] sm:$0xff]  ;;  %vm5401_vm6 = vcmask 531456   ;;  %3012 = vrot.lane.b32.xlu1 %v3005_v39, %s4043_s19 }
 0x223   :  { %1269 = vst [vmem:[#allocation3 + $0xa8] sm:$0xf0] %v1264_v57  ;;  %v3774_v61 = vpack.c.bf16 %v1518_v60, %v1515_v53  ;;  %v1284_v62 = vpop.permute.xlu0 %1283  ;;  %2983 = vrot.lane.b32.xlu0 %v2972_v33, %s4070_s21 }
 0x224   :  { %3797 = vmatpush3.bf16.msra.mxu1 %v3796_v58 }
 0x225   :  { %v1286_v63 = vpop.permute.xlu1 %1285  ;;  %3775 = vmatprep.subr.bf16.mxu0 %v3774_v61  ;;  %3798 = vmatprep.subr.bf16.mxu1 %v5379_v8 }
 0x226   :  { %v1288_v1 = vsel %vm5399_vm0, %v1284_v62, %v1286_v63  ;;  %1294 = vst.msk [vmem:[#allocation3 + $0xd0] sm:$0xf] %vm168_vm2, %v1286_v63  ;;  %v1514_v5 = vld [vmem:[#allocation3 + $0x90] sm:$0xff]  ;;  %vm5404_vm0 = vmmov %vm5400_vm10 }
 0x227   :  { %1293 = vst [vmem:[#allocation3 + $0xc8] sm:$0xf] %v1288_v1  ;;  %v1304_v2 = vpop.permute.xlu0 %1303 }
 0x229   :  { %v1306_v3 = vpop.permute.xlu1 %1305 }
 0x22a   :  { %v1308_v0 = vsel %vm5400_vm10, %v1304_v2, %v1306_v3  ;;  %1314 = vst.msk [vmem:[#allocation3 + $0xd0] sm:$0xf0] %vm193_vm13, %v1306_v3  ;;  %v1517_v7 = vld [vmem:[#allocation3 + $0xa8] sm:$0xff]  ;;  %vm5405_vm10 = vmmov %vm5401_vm6 }
 0x22b   :  { %1313 = vst [vmem:[#allocation3 + $0xc8] sm:$0xf0] %v1308_v0  ;;  %v3776_v59 = vpack.c.bf16 %v1517_v7, %v1514_v5  ;;  %v1327_v21 = vpop.permute.xlu0 %1326 }
 0x22d   :  { %v1329_v9 = vpop.permute.xlu1 %1328  ;;  %3777 = vmatpush1.bf16.msra.mxu0 %v3776_v59 }
 0x22e   :  { %v1331_v10 = vsel %vm5401_vm6, %v1327_v21, %v1329_v9  ;;  %1337 = vst.msk [vmem:[#allocation3 + $0xe8] sm:$0xf] %vm168_vm2, %v1329_v9  ;;  %vm5406_vm6 = vmmov %vm5402_vm14 }
 0x22f   :  { %1336 = vst [vmem:[#allocation3 + $0xe0] sm:$0xf] %v1331_v10  ;;  %v1347_v12 = vpop.permute.xlu0 %1346 }
 0x231   :  { %v1349_v15 = vpop.permute.xlu1 %1348  ;;  %v1522_v19 = vld [vmem:[#allocation3 + $0xd0] sm:$0xff] }
 0x232   :  { %v1351_v13 = vsel %vm5402_vm14, %v1347_v12, %v1349_v15  ;;  %1357 = vst.msk [vmem:[#allocation3 + $0xe8] sm:$0xf0] %vm193_vm13, %v1349_v15  ;;  %v1521_v32 = vld [vmem:[#allocation3 + $0xc8] sm:$0xff]  ;;  %vm5407_vm14 = vcmask 375808  }
 0x233   :  { %1356 = vst [vmem:[#allocation3 + $0xe0] sm:$0xf0] %v1351_v13  ;;  %v1282_v11 = vpop.permute.xlu0 %1281 }
 0x234   :  { %v1287_v17 = vsel %vm5403_vm5, %v1282_v11, %v1284_v62  ;;  %vm5408_vm5 = vcmask 367616  }
 0x235   :  { %v1302_v20 = vpop.permute.xlu1 %1301  ;;  %1292 = vst [vmem:[#allocation3 + $0xc0] sm:$0xf] %v1287_v17 }
 0x236   :  { %v1307_v22 = vsel %vm5404_vm0, %v1302_v20, %v1304_v2  ;;  %vm5409_vm0 = vmmov %vm5407_vm14 }
 0x237   :  { %1312 = vst [vmem:[#allocation3 + $0xc0] sm:$0xf0] %v1307_v22  ;;  %v1325_v24 = vpop.permute.xlu0 %1324 }
 0x238   :  { %v1330_v26 = vsel %vm5405_vm10, %v1325_v24, %v1327_v21  ;;  %vm5410_vm10 = vmmov %vm5408_vm5 }
 0x239   :  { %v1345_v27 = vpop.permute.xlu1 %1344  ;;  %v1525_v28 = vld [vmem:[#allocation3 + $0xe8] sm:$0xff]  ;;  %1335 = vst [vmem:[#allocation3 + $0xd8] sm:$0xf] %v1330_v26 }
 0x23a   :  { %v1350_v29 = vsel %vm5406_vm6, %v1345_v27, %v1347_v12  ;;  %v3799_v31 = vpack.c.bf16 %v1525_v28, %v1522_v19  ;;  %v1524_v34 = vld [vmem:[#allocation3 + $0xe0] sm:$0xff]  ;;  %vm5411_vm6 = vmmov %vm5409_vm0 }
 0x23b   :  { %1355 = vst [vmem:[#allocation3 + $0xd8] sm:$0xf0] %v1350_v29  ;;  %v3778_v36 = vpack.c.bf16 %v1524_v34, %v1521_v32  ;;  %v1373_v38 = vpop.permute.xlu0 %1372  ;;  %v1495_v27 = vld [vmem:[#allocation8] sm:$0xf]  ;;  %v1704_v34 = vlaneseq }
 0x23c   :  { %3800 = vmatpush3.bf16.msra.mxu1 %v3799_v31 }
 0x23d   :  { %v1375_v41 = vpop.permute.xlu1 %1374  ;;  %3779 = vmatprep.subr.bf16.mxu0 %v3778_v36  ;;  %3801 = vmatprep.subr.bf16.mxu1 %v5379_v8  ;;  %v1705_v35 = vshrl.u32 %v1704_v34, 7 }
 0x23e   :  { %v1379_v42 = vsel %vm616_vm12, %v1373_v38, %v1375_v41  ;;  %v1520_v45 = vld [vmem:[#allocation3 + $0xc0] sm:$0xff] }
 0x23f   :  { %1385 = vst [vmem:[#allocation3 + $0xf8] sm:$0xf] %v1379_v42  ;;  %v1398_v43 = vpop.permute.xlu0 %1397  ;;  %v1706_v33 = vsub.s32 0, %v1705_v35 }
 0x241   :  { %v1400_v44 = vpop.permute.xlu1 %1399 }
 0x242   :  { %v1404_v25 = vsel %vm646_vm1, %v1398_v43, %v1400_v44  ;;  %v1523_v47 = vld [vmem:[#allocation3 + $0xd8] sm:$0xff] }
 0x243   :  { %1410 = vst [vmem:[#allocation3 + $0xf8] sm:$0xf0] %v1404_v25  ;;  %v3780_v48 = vpack.c.bf16 %v1523_v47, %v1520_v45  ;;  %v1427_v49 = vpop.permute.xlu0 %1426 }
 0x245   :  { %v1429_v50 = vpop.permute.xlu1 %1428  ;;  %3781 = vmatpush1.bf16.msra.mxu0 %v3780_v48 }
 0x246   :  { %v1433_v51 = vsel %vm5407_vm14, %v1427_v49, %v1429_v50  ;;  %vm5412_vm14 = vmmov %vm5408_vm5 }
 0x247   :  { %1439 = vst [vmem:[#allocation3 + $0x110] sm:$0xf] %v1433_v51  ;;  %v1452_v52 = vpop.permute.xlu0 %1451 }
 0x249   :  { %v1454_v40 = vpop.permute.xlu1 %1453 }
 0x24a   :  { %v1458_v54 = vsel %vm5408_vm5, %v1452_v52, %v1454_v40  ;;  %v1527_v62 = vld [vmem:[#allocation3 + $0xf8] sm:$0xff]  ;;  %vm5416_vm5 = vcmask 523264  }
 0x24b   :  { %1464 = vst [vmem:[#allocation3 + $0x110] sm:$0xf0] %v1458_v54  ;;  %v1371_v30 = vpop.permute.xlu0 %1370 }
 0x24c   :  { %v1378_v55 = vsel %vm616_vm12, %v1371_v30, %v1373_v38 }
 0x24d   :  { %v1396_v56 = vpop.permute.xlu1 %1395  ;;  %1384 = vst [vmem:[#allocation3 + $0xf0] sm:$0xf] %v1378_v55 }
 0x24e   :  { %v1403_v57 = vsel %vm646_vm1, %v1396_v56, %v1398_v43  ;;  %v1710_v43 = vsub.s32 1, %v1705_v35 }
 0x24f   :  { %1409 = vst [vmem:[#allocation3 + $0xf0] sm:$0xf0] %v1403_v57  ;;  %v1425_v58 = vpop.permute.xlu0 %1424 }
 0x250   :  { %v1432_v53 = vsel %vm5409_vm0, %v1425_v58, %v1427_v49  ;;  %vm5417_vm0 = vmmov %vm5416_vm5 }
 0x251   :  { %v1450_v60 = vpop.permute.xlu1 %1449  ;;  %1438 = vst [vmem:[#allocation3 + $0x108] sm:$0xf] %v1432_v53 }
 0x252   :  { %v1457_v61 = vsel %vm5410_vm10, %v1450_v60, %v1452_v52  ;;  %v1530_v63 = vld [vmem:[#allocation3 + $0x110] sm:$0xff]  ;;  %vm1763_vm10 = vcmask 343040  }
 0x253   :  { %1463 = vst [vmem:[#allocation3 + $0x108] sm:$0xf0] %v1457_v61  ;;  %v3782_v1 = vpack.c.bf16 %v1530_v63, %v1527_v62  ;;  %v1377_v2 = vpop.permute.xlu0 %1376 }
 0x254   :  { %v1380_v3 = vsel %vm616_vm12, %v1375_v41, %v1377_v2 }
 0x255   :  { %v1402_v0 = vpop.permute.xlu1 %1401  ;;  %3783 = vmatprep.subr.bf16.mxu0 %v3782_v1  ;;  %1386 = vst.msk [vmem:[#allocation3 + $0x100] sm:$0xf] %vm168_vm2, %v1380_v3 }
 0x256   :  { %v1405_v5 = vsel %vm646_vm1, %v1400_v44, %v1402_v0  ;;  %v1526_v10 = vld [vmem:[#allocation3 + $0xf0] sm:$0xff]  ;;  %v1714_v44 = vsub.s32 2, %v1705_v35 }
 0x257   :  { %1411 = vst.msk [vmem:[#allocation3 + $0x100] sm:$0xf0] %vm193_vm13, %v1405_v5  ;;  %v1431_v7 = vpop.permute.xlu0 %1430 }
 0x258   :  { %v1434_v59 = vsel %vm5411_vm6, %v1429_v50, %v1431_v7  ;;  %vm1769_vm6 = vcmask 1047888  }
 0x259   :  { %v1456_v21 = vpop.permute.xlu1 %1455  ;;  %1440 = vst.msk [vmem:[#allocation3 + $0x118] sm:$0xf] %vm168_vm2, %v1434_v59 }
 0x25a   :  { %v1459_v9 = vsel %vm5412_vm14, %v1454_v40, %v1456_v21  ;;  %v1529_v12 = vld [vmem:[#allocation3 + $0x108] sm:$0xff]  ;;  %vm5420_vm14 = vcmask 375808  }
 0x25b   :  { %1465 = vst.msk [vmem:[#allocation3 + $0x118] sm:$0xf0] %vm193_vm13, %v1459_v9  ;;  %v3784_v14 = vpack.c.bf16 %v1529_v12, %v1526_v10  ;;  %v1481_v15 = vpop.permute.xlu0 %1480 }
 0x25d   :  { %v1483_v16 = vpop.permute.xlu1 %1482  ;;  %3785 = vmatpush1.bf16.msra.mxu0 %v3784_v14 }
 0x25e   :  { %v1487_v13 = vsel %vm728_vm8, %v1481_v15, %v1483_v16  ;;  %v1528_v22 = vld [vmem:[#allocation3 + $0x100] sm:$0xff] }
 0x25f   :  { %1493 = vst [vmem:[#allocation3 + $0x128] sm:$0xf] %v1487_v13  ;;  %v1479_v4 = vpop.permute.xlu0 %1478 }
 0x260   :  { %v1486_v11 = vsel %vm728_vm8, %v1479_v4, %v1481_v15 }
 0x261   :  { %v1485_v17 = vpop.permute.xlu1 %1484  ;;  %1492 = vst [vmem:[#allocation3 + $0x120] sm:$0xf] %v1486_v11 }
 0x262   :  { %v1488_v20 = vsel %vm728_vm8, %v1483_v16, %v1485_v17  ;;  %v1531_v24 = vld [vmem:[#allocation3 + $0x118] sm:$0xff] }
 0x263   :  { %1494 = vst.msk [vmem:[#allocation3 + $0x130] sm:$0xf] %vm168_vm2, %v1488_v20  ;;  %v3802_v19 = vpack.c.bf16 %v1531_v24, %v1528_v22 }
 0x265   :  { %3803 = vmatpush3.bf16.msra.mxu1 %v3802_v19  ;;  %v4646_v63 = vpop.permute.xlu1 %2232 }
 0x266   :  { %v1533_v26 = vld [vmem:[#allocation3 + $0x128] sm:$0xf]  ;;  %3657 = vmatprep.subr.mxu1 %v4494_v46 }
 0x267   :  { %3533 = vmatprep.subr.msk.mxu0 %vm782_vm7, %v1533_v26 }
 0x268   :  { %v1532_v28 = vld [vmem:[#allocation3 + $0x120] sm:$0xf] }
 0x269   :  { %3534 = vmatpush1.msk.msra.mxu0 %vm782_vm7, %v1532_v28 }
 0x26a   :  { %v1534_v23 = vld [vmem:[#allocation3 + $0x130] sm:$0xf]  ;;  %3535 = vmatmul.mubr.msk.f32.vlgmr.msra.gmra.mrb[2].mxu0 %vm778_vm11, %v1495_v27 }
 0x26b   :  { %3658 = vmatpush3.msk.msra.mxu1 %vm782_vm7, %v1534_v23  ;;  %2438 = vmatprep.mubr.f32.mxu0 %v4494_v46 }
 0x26c   :  { %3660 = vmatmul.mubr.msk.f32.vlgmr.msra.gmra.mrb[2].mxu1 %vm778_vm11, %v1495_v27  ;;  %3828 = vmatprep.subr.bf16.mxu1 %v5379_v8 }
 0x26d   :  { %3688 = vmatprep.mubr.msk.f32.mxu1 %vm4073_vm9, %v4494_v46  ;;  %v42_v46 = vld [vmem:[%s5359_s3] sm:$0x7]  ;;  %s4074_s3 = smov 4  }
 0x26e   :  { %v4633_v25 = vrot.slane %v42_v46, %v1706_v33  ;;  %v4635_v45 = vrot.slane %v42_v46, %v1710_v43  ;;  %v4637_v47 = vrot.slane %v42_v46, %v1714_v44 }
 0x270   :  { %5413 = vst [vmem:[#allocation14_spill] sm:$0xff] %v4633_v25  ;;  %5414 = vst [vmem:[#allocation15_spill] sm:$0xff] %v4635_v45 }
 0x271   :  { %5415 = vst [vmem:[#allocation16_spill] sm:$0xff] %v4637_v47 }
 0x276   :  { %v4650_v2 = vpop.permute.xlu1 %2286 }
 0x27b   :  { %v4644_v62 = vpop.permute.xlu0 %2203 }
 0x280   :  { %v4648_v1 = vpop.permute.xlu0 %2257 }
 0x290   :  { %v4654_v0 = vpop.permute.xlu1 %2958 }
 0x291   :  { %v4652_v3 = vpop.permute.xlu0 %2311  ;;  %5418 = vst [vmem:[#allocation17_spill] sm:$0xff] %v4654_v0 }
 0x294   :  { %v4658_v7 = vpop.permute.xlu1 %3012 }
 0x295   :  { %v4656_v5 = vpop.permute.xlu0 %2983  ;;  %5419 = vst [vmem:[#allocation18_spill] sm:$0xff] %v4658_v7 }
 0x2af   :  { %v858_v6 = vpop.f32.mrb[0].mxu0 }
 0x2b0   :  { %933 = vst [vmem:[#allocation4] sm:$0xf] %v858_v6  ;;  %v860_v29 = vpop.f32.mrb[1].mxu0 }
 0x2b1   :  { %934 = vst [vmem:[#allocation4 + $0x8] sm:$0xf] %v860_v29 }
 0x2b8   :  { %v929_v31 = vpop.f32.mrb[0].mxu1 }
 0x2b9   :  { %935 = vst.msk [vmem:[#allocation4 + $0x10] sm:$0xf] %vm168_vm2, %v929_v31  ;;  %v3632_v32 = vpop.f32.mrb[1].mxu1 }
 0x33d   :  { %v1613_v18 = vpop.f32.mrb[2].mxu0 }
 0x33e   :  { %v1691_v36 = vrot.slane %v1613_v18, 4  ;;  %v1615_v37 = vpop.f32.mrb[3].mxu0 }
 0x33f   :  { %v1684_v38 = vpop.f32.mrb[2].mxu1  ;;  %v1692_v39 = vrot.slane %v1615_v37, 4 }
 0x340   :  { %v1693_v41 = vrot.slane %v1684_v38, 4  ;;  %v3661_v42 = vpop.f32.mrb[3].mxu1  ;;  %1697 = vst [vmem:[#allocation4] sm:$0xf0] %v1691_v36 }
 0x341   :  { %1698 = vst [vmem:[#allocation4 + $0x8] sm:$0xf0] %v1692_v39 }
 0x342   :  { %1699 = vst.msk [vmem:[#allocation4 + $0x10] sm:$0xf0] %vm193_vm13, %v1693_v41 }
 0x347   :  { %v1700_v48 = vld [vmem:[#allocation4] sm:$0xff] }
 0x348   :  { %v1701_v49 = vld [vmem:[#allocation4 + $0x8] sm:$0xff]  ;;  %v1719_v51 = vmul.f32 %v4633_v25, %v1700_v48 }
 0x349   :  { %v1702_v50 = vld [vmem:[#allocation4 + $0x10] sm:$0xff]  ;;  %v1720_v52 = vmul.f32 %v4635_v45, %v1701_v49 }
 0x34a   :  { %v1721_v40 = vmul.f32 %v4637_v47, %v1702_v50  ;;  %v1728_v54 = vmul.f32 %v1719_v51, %v1719_v51 }
 0x34b   :  { %v1722_v30 = vadd.f32 %v1720_v52, %v1719_v51  ;;  %v1729_v56 = vmul.f32 %v1720_v52, %v1720_v52 }
 0x34c   :  { %v1723_v55 = vsel %vm5416_vm5, %v1721_v40, 0.0  ;;  %v1730_v57 = vmul.f32 %v1721_v40, %v1721_v40  ;;  %vm5421_vm5 = vcmask 875520  }
 0x34d   :  { %v1724_v58 = vadd.f32 %v1723_v55, %v1722_v30  ;;  %v1731_v53 = vadd.f32 %v1729_v56, %v1728_v54 }
 0x34e   :  { %v1732_v60 = vsel %vm5417_vm0, %v1730_v57, 0.0  ;;  %vm5422_vm0 = vmmov %vm5421_vm5 }
 0x34f   :  { %1725 = vadd.xlane.f32.xlu0 %v1724_v58  ;;  %v1733_v61 = vadd.f32 %v1732_v60, %v1731_v53 }
 0x351   :  { %1734 = vadd.xlane.f32.xlu1 %v1733_v61 }
 0x3dc   :  { %v1726_v59 = vpop.xlane.xlu0 %1725 }
 0x3dd   :  { %v1727_v21 = vmul.f32 0.00390625, %v1726_v59 }
 0x3de   :  { %v1735_v9 = vpop.xlane.xlu1 %1734 }
 0x3df   :  { %v1736_v10 = vmul.f32 0.00390625, %v1735_v9  ;;  %v1737_v12 = vmul.f32 %v1727_v21, %v1727_v21  ;;  %v1742_v13 = vsub.f32 %v1700_v48, %v1727_v21  ;;  %v1743_v4 = vsub.f32 %v1701_v49, %v1727_v21 }
 0x3e0   :  { %v1744_v11 = vsub.f32 %v1702_v50, %v1727_v21 }
 0x3e1   :  { %v1738_v14 = vsub.f32 %v1736_v10, %v1737_v12 }
 0x3e3   :  { %v1739_v15 = vmax.f32 %v1738_v14, 0.0 }
 0x3e5   :  { %v1740_v16 = vadd.f32 1e-05, %v1739_v15 }
 0x3e7   :  { %3953 = vrsqrt.f32 %v1740_v16 }
 0x3f1   :  { %v3954_v17 = vpop.eup %3953 }
 0x3f2   :  { %v1746_v20 = vmul.f32 %v3954_v17, %v1743_v4  ;;  %v1745_v22 = vmul.f32 %v3954_v17, %v1742_v13  ;;  %v1747_v24 = vmul.f32 %v3954_v17, %v1744_v11 }
 0x3f4   :  { %v1749_v19 = vmax.f32 %v1746_v20, 0.0  ;;  %v1748_v26 = vmax.f32 %v1745_v22, 0.0  ;;  %v1750_v23 = vmax.f32 %v1747_v24, 0.0 }
 0x3f6   :  { %v1752_v27 = vmul.f32 %v1749_v19, %v4635_v45  ;;  %v1751_v28 = vmul.f32 %v1748_v26, %v4633_v25  ;;  %v1753_v6 = vmul.f32 %v1750_v23, %v4637_v47 }
 0x3f8   :  { %1759 = vrot.lane.b32.xlu1 %v1752_v27, %s4040_s16  ;;  %1757 = vrot.lane.b32.xlu0 %v1751_v28, %s4040_s16 }
 0x3fc   :  { %1761 = vrot.lane.b32.xlu0 %v1753_v6, %s4040_s16 }
 0x46a   :  { %v1760_v29 = vpop.permute.xlu1 %1759  ;;  %v1758_v31 = vpop.permute.xlu0 %1757 }
 0x46b   :  { %v1764_v32 = vsel %vm1763_vm10, %v1758_v31, %v1760_v29  ;;  %1770 = vst.msk [vmem:[#allocation2] sm:$0xff] %vm1769_vm6, %v1758_v31 }
 0x46c   :  { %1771 = vst [vmem:[#allocation2 + $0x8] sm:$0xff] %v1764_v32 }
 0x46e   :  { %v1762_v34 = vpop.permute.xlu0 %1761 }
 0x46f   :  { %v1765_v35 = vsel %vm1763_vm10, %v1760_v29, %v1762_v34  ;;  %vm5423_vm10 = vcmask 859136  }
 0x470   :  { %1772 = vst.msk [vmem:[#allocation2 + $0x10] sm:$0xff] %vm321_vm15, %v1765_v35  ;;  %vm5424_vm6 = vmmov %vm5423_vm10 }
 0x472   :  { %v2533_v18 = vld [vmem:[#allocation2] sm:$0xf0]  ;;  %v1773_v36 = vld [vmem:[#allocation2] sm:$0xf] }
 0x473   :  { %v1802_v37 = vld [vmem:[#allocation2] sm:$0xf]  ;;  %v1774_v38 = vld [vmem:[#allocation2 + $0x8] sm:$0xf]  ;;  %2539 = vrot.lane.b32.xlu1 %v2533_v18, %s4059_s9  ;;  %1776 = vst [vmem:[#allocation3] sm:$0xf] %v1773_v36 }
 0x474   :  { %1808 = vrot.lane.b32.xlu0 %v1802_v37, %s4052_s28  ;;  %1777 = vst [vmem:[#allocation3 + $0x8] sm:$0xf] %v1774_v38  ;;  %v2576_v39 = vld [vmem:[#allocation2] sm:$0xf0]  ;;  %v1845_v41 = vld [vmem:[#allocation2] sm:$0xf] }
 0x475   :  { %v1888_v33 = vld [vmem:[#allocation2] sm:$0xf]  ;;  %v1803_v46 = vld [vmem:[#allocation2 + $0x8] sm:$0xf]  ;;  %v2619_v21 = vld [vmem:[#allocation2] sm:$0xf0] }
 0x476   :  { %v1931_v43 = vld [vmem:[#allocation2] sm:$0xf]  ;;  %v2662_v10 = vld [vmem:[#allocation2] sm:$0xf0]  ;;  %v2620_v11 = vld [vmem:[#allocation2 + $0x8] sm:$0xf0] }
 0x477   :  { %v1775_v42 = vld [vmem:[#allocation2 + $0x10] sm:$0xf]  ;;  %2582 = vrot.lane.b32.xlu1 %v2576_v39, %s4060_s10  ;;  %v1974_v48 = vld [vmem:[#allocation2] sm:$0xf]  ;;  %v2705_v14 = vld [vmem:[#allocation2] sm:$0xf0] }
 0x478   :  { %1851 = vrot.lane.b32.xlu0 %v1845_v41, %s4051_s27  ;;  %1778 = vst.msk [vmem:[#allocation3 + $0x10] sm:$0xf] %vm168_vm2, %v1775_v42  ;;  %v1847_v44 = vld [vmem:[#allocation2 + $0x10] sm:$0xf]  ;;  %v2017_v50 = vld [vmem:[#allocation2] sm:$0xf] }
 0x479   :  { %v1890_v49 = vld [vmem:[#allocation2 + $0x10] sm:$0xf]  ;;  %v2060_v52 = vld [vmem:[#allocation2] sm:$0xf]  ;;  %v2535_v15 = vld [vmem:[#allocation2 + $0x10] sm:$0xf0] }
 0x47a   :  { %v1933_v51 = vld [vmem:[#allocation2 + $0x10] sm:$0xf]  ;;  %v2103_v54 = vld [vmem:[#allocation2] sm:$0xf]  ;;  %v2748_v16 = vld [vmem:[#allocation2] sm:$0xf0] }
 0x47b   :  { %1810 = vrot.lane.b32.xlu1 %v1803_v46, %s4052_s28  ;;  %v1976_v40 = vld [vmem:[#allocation2 + $0x10] sm:$0xf]  ;;  %v2146_v55 = vld [vmem:[#allocation2] sm:$0xf]  ;;  %v2578_v13 = vld [vmem:[#allocation2 + $0x10] sm:$0xf0] }
 0x47c   :  { %1894 = vrot.lane.b32.xlu0 %v1888_v33, %s4053_s29  ;;  %v2019_v30 = vld [vmem:[#allocation2 + $0x10] sm:$0xf]  ;;  %v2189_v57 = vld [vmem:[#allocation2] sm:$0xf]  ;;  %v2791_v4 = vld [vmem:[#allocation2] sm:$0xf0] }
 0x47d   :  { %v2062_v56 = vld [vmem:[#allocation2 + $0x10] sm:$0xf]  ;;  %v2243_v53 = vld [vmem:[#allocation2] sm:$0xf]  ;;  %v2834_v17 = vld [vmem:[#allocation2] sm:$0xf0] }
 0x47e   :  { %v2105_v58 = vld [vmem:[#allocation2 + $0x10] sm:$0xf]  ;;  %v2297_v61 = vld [vmem:[#allocation2] sm:$0xf]  ;;  %v2663_v20 = vld [vmem:[#allocation2 + $0x8] sm:$0xf0] }
 0x47f   :  { %1855 = vrot.lane.b32.xlu1 %v1847_v44, %s4051_s27  ;;  %v2148_v60 = vld [vmem:[#allocation2 + $0x10] sm:$0xf]  ;;  %v2877_v22 = vld [vmem:[#allocation2] sm:$0xf0]  ;;  %v2706_v24 = vld [vmem:[#allocation2 + $0x8] sm:$0xf0] }
 0x480   :  { %1937 = vrot.lane.b32.xlu0 %v1931_v43, %s4054_s30  ;;  %v2191_v59 = vld [vmem:[#allocation2 + $0x10] sm:$0xf]  ;;  %v2920_v19 = vld [vmem:[#allocation2] sm:$0xf0]  ;;  %v2749_v26 = vld [vmem:[#allocation2 + $0x8] sm:$0xf0] }
 0x481   :  { %v2245_v9 = vld [vmem:[#allocation2 + $0x10] sm:$0xf]  ;;  %v2969_v27 = vld [vmem:[#allocation2] sm:$0xf0]  ;;  %v2792_v28 = vld [vmem:[#allocation2 + $0x8] sm:$0xf0] }
 0x482   :  { %v2299_v12 = vld [vmem:[#allocation2 + $0x10] sm:$0xf]  ;;  %v3023_v23 = vld [vmem:[#allocation2] sm:$0xf0]  ;;  %v2835_v6 = vld [vmem:[#allocation2 + $0x8] sm:$0xf0] }
 0x483   :  { %1898 = vrot.lane.b32.xlu1 %v1890_v49, %s4053_s29  ;;  %v2878_v29 = vld [vmem:[#allocation2 + $0x8] sm:$0xf0]  ;;  %v1804_v31 = vld [vmem:[#allocation2 + $0x10] sm:$0xf]  ;;  %v1846_v34 = vld [vmem:[#allocation2 + $0x8] sm:$0xf] }
 0x484   :  { %1980 = vrot.lane.b32.xlu0 %v1974_v48, %s4055_s5  ;;  %v2921_v32 = vld [vmem:[#allocation2 + $0x8] sm:$0xf0]  ;;  %v1889_v18 = vld [vmem:[#allocation2 + $0x8] sm:$0xf]  ;;  %v1779_v38 = vld [vmem:[#allocation2] sm:$0xf] }
 0x485   :  { %v2970_v35 = vld [vmem:[#allocation2 + $0x8] sm:$0xf0]  ;;  %v1932_v37 = vld [vmem:[#allocation2 + $0x8] sm:$0xf]  ;;  %v1785_v39 = vrot.slane %v1779_v38, 4 }
 0x486   :  { %v3024_v36 = vld [vmem:[#allocation2 + $0x8] sm:$0xf0]  ;;  %v1975_v41 = vld [vmem:[#allocation2 + $0x8] sm:$0xf]  ;;  %v1822_v42 = vld [vmem:[#allocation2] sm:$0xf] }
 0x487   :  { %1941 = vrot.lane.b32.xlu1 %v1933_v51, %s4054_s30  ;;  %v1828_v33 = vrot.slane %v1822_v42, 4  ;;  %v2018_v46 = vld [vmem:[#allocation2 + $0x8] sm:$0xf]  ;;  %v1865_v43 = vld [vmem:[#allocation2] sm:$0xf] }
 0x488   :  { %2023 = vrot.lane.b32.xlu0 %v2017_v50, %s4039_s15  ;;  %v1871_v44 = vrot.slane %v1865_v43, 4  ;;  %v2061_v48 = vld [vmem:[#allocation2 + $0x8] sm:$0xf]  ;;  %v1908_v49 = vld [vmem:[#allocation2] sm:$0xf] }
 0x489   :  { %v2596_v42 = vld [vmem:[#allocation2] sm:$0xf0]  ;;  %v1995_v8 = vld [vmem:[#allocation2 + $0x8] sm:$0xf]  ;;  %v3050_v47 = vld [vmem:[#allocation2 + $0x10] sm:$0xf0] }
 0x48a   :  { %v2602_v43 = vrot.slane %v2596_v42, 4  ;;  %v2897_v42 = vld [vmem:[#allocation2] sm:$0xf0]  ;;  %v3058_v25 = vrot.slane %v3050_v47, 4 }
 0x48b   :  { %1984 = vrot.lane.b32.xlu1 %v1976_v40, %s4055_s5  ;;  %v2104_v40 = vld [vmem:[#allocation2 + $0x8] sm:$0xf] }
 0x48c   :  { %2066 = vrot.lane.b32.xlu0 %v2060_v52, %s4056_s6  ;;  %v1914_v52 = vrot.slane %v1908_v49, 4 }
 0x48f   :  { %2027 = vrot.lane.b32.xlu1 %v2019_v30, %s4039_s15 }
 0x490   :  { %2109 = vrot.lane.b32.xlu0 %v2103_v54, %s4057_s7  ;;  %v1951_v54 = vld [vmem:[#allocation2] sm:$0xf] }
 0x493   :  { %2070 = vrot.lane.b32.xlu1 %v2062_v56, %s4056_s6  ;;  %v1957_v56 = vrot.slane %v1951_v54, 4  ;;  %v2682_v54 = vld [vmem:[#allocation2] sm:$0xf0] }
 0x494   :  { %2152 = vrot.lane.b32.xlu0 %v2146_v55, %s4058_s8 }
 0x497   :  { %2113 = vrot.lane.b32.xlu1 %v2105_v58, %s4057_s7  ;;  %v1994_v58 = vld [vmem:[#allocation2] sm:$0xf] }
 0x498   :  { %2197 = vrot.lane.b32.xlu0 %v2189_v57, %s4069_s20  ;;  %v2147_v57 = vld [vmem:[#allocation2 + $0x8] sm:$0xf] }
 0x49b   :  { %2156 = vrot.lane.b32.xlu1 %v2148_v60, %s4058_s8 }
 0x49c   :  { %2251 = vrot.lane.b32.xlu0 %v2243_v53, %s4043_s19 }
 0x49f   :  { %2201 = vrot.lane.b32.xlu1 %v2191_v59, %s4069_s20 }
 0x4a0   :  { %2305 = vrot.lane.b32.xlu0 %v2297_v61, %s4072_s23  ;;  %v2000_v61 = vrot.slane %v1994_v58, 4  ;;  %v2688_v58 = vrot.slane %v2682_v54, 4  ;;  %v2553_v54 = vld [vmem:[#allocation2] sm:$0xf0] }
 0x4a3   :  { %2255 = vrot.lane.b32.xlu1 %v2245_v9, %s4043_s19  ;;  %v2037_v9 = vld [vmem:[#allocation2] sm:$0xf] }
 0x4a4   :  { %2625 = vrot.lane.b32.xlu0 %v2619_v21, %s4061_s0  ;;  %v2190_v21 = vld [vmem:[#allocation2 + $0x8] sm:$0xf] }
 0x4a7   :  { %2309 = vrot.lane.b32.xlu1 %v2299_v12, %s4072_s23 }
 0x4a8   :  { %2668 = vrot.lane.b32.xlu0 %v2662_v10, %s4062_s11 }
 0x4ab   :  { %2543 = vrot.lane.b32.xlu1 %v2535_v15, %s4059_s9  ;;  %v2244_v15 = vld [vmem:[#allocation2 + $0x8] sm:$0xf] }
 0x4ac   :  { %2711 = vrot.lane.b32.xlu0 %v2705_v14, %s4063_s12  ;;  %v2043_v14 = vrot.slane %v2037_v9, 4 }
 0x4af   :  { %2586 = vrot.lane.b32.xlu1 %v2578_v13, %s4060_s10 }
 0x4b0   :  { %2754 = vrot.lane.b32.xlu0 %v2748_v16, %s4064_s1  ;;  %v2080_v16 = vld [vmem:[#allocation2] sm:$0xf] }
 0x4b3   :  { %2627 = vrot.lane.b32.xlu1 %v2620_v11, %s4061_s0  ;;  %v2086_v11 = vrot.slane %v2080_v16, 4 }
 0x4b4   :  { %2797 = vrot.lane.b32.xlu0 %v2791_v4, %s4065_s14 }
 0x4b7   :  { %2670 = vrot.lane.b32.xlu1 %v2663_v20, %s4062_s11  ;;  %v2123_v20 = vld [vmem:[#allocation2] sm:$0xf] }
 0x4b8   :  { %2840 = vrot.lane.b32.xlu0 %v2834_v17, %s4066_s17  ;;  %v2298_v17 = vld [vmem:[#allocation2 + $0x8] sm:$0xf] }
 0x4bb   :  { %2713 = vrot.lane.b32.xlu1 %v2706_v24, %s4063_s12 }
 0x4bc   :  { %2883 = vrot.lane.b32.xlu0 %v2877_v22, %s4037_s13 }
 0x4bf   :  { %2756 = vrot.lane.b32.xlu1 %v2749_v26, %s4064_s1  ;;  %v2534_v26 = vld [vmem:[#allocation2 + $0x8] sm:$0xf0] }
 0x4c0   :  { %2926 = vrot.lane.b32.xlu0 %v2920_v19, %s4068_s18  ;;  %v2129_v19 = vrot.slane %v2123_v20, 4 }
 0x4c3   :  { %2799 = vrot.lane.b32.xlu1 %v2792_v28, %s4065_s14 }
 0x4c4   :  { %2977 = vrot.lane.b32.xlu0 %v2969_v27, %s4070_s21  ;;  %v2166_v27 = vld [vmem:[#allocation2] sm:$0xf] }
 0x4c7   :  { %2842 = vrot.lane.b32.xlu1 %v2835_v6, %s4066_s17  ;;  %v2172_v6 = vrot.slane %v2166_v27, 4  ;;  %v2879_v27 = vld [vmem:[#allocation2 + $0x10] sm:$0xf0] }
 0x4c8   :  { %3031 = vrot.lane.b32.xlu0 %v3023_v23, %s4071_s22 }
 0x4cb   :  { %2885 = vrot.lane.b32.xlu1 %v2878_v29, %s4037_s13  ;;  %v2577_v29 = vld [vmem:[#allocation2 + $0x8] sm:$0xf0] }
 0x4cc   :  { %1812 = vrot.lane.b32.xlu0 %v1804_v31, %s4052_s28  ;;  %v2214_v31 = vld [vmem:[#allocation2] sm:$0xf] }
 0x4cf   :  { %2928 = vrot.lane.b32.xlu1 %v2921_v32, %s4068_s18 }
 0x4d0   :  { %1853 = vrot.lane.b32.xlu0 %v1846_v34, %s4051_s27 }
 0x4d3   :  { %2979 = vrot.lane.b32.xlu1 %v2970_v35, %s4070_s21  ;;  %v2222_v35 = vrot.slane %v2214_v31, 4 }
 0x4d4   :  { %1896 = vrot.lane.b32.xlu0 %v1889_v18, %s4053_s29  ;;  %v2621_v18 = vld [vmem:[#allocation2 + $0x10] sm:$0xf0] }
 0x4d7   :  { %3033 = vrot.lane.b32.xlu1 %v3024_v36, %s4071_s22  ;;  %v2268_v36 = vld [vmem:[#allocation2] sm:$0xf] }
 0x4d8   :  { %1939 = vrot.lane.b32.xlu0 %v1932_v37, %s4054_s30 }
 0x4db   :  { %1788 = vrot.lane.b32.xlu1 %v1785_v39, %s4059_s9  ;;  %v2276_v39 = vrot.slane %v2268_v36, 4 }
 0x4dc   :  { %1982 = vrot.lane.b32.xlu0 %v1975_v41, %s4055_s5  ;;  %v2664_v41 = vld [vmem:[#allocation2 + $0x10] sm:$0xf0] }
 0x4df   :  { %1831 = vrot.lane.b32.xlu1 %v1828_v33, %s4060_s10 }
 0x4e0   :  { %2025 = vrot.lane.b32.xlu0 %v2018_v46, %s4039_s15 }
 0x4e3   :  { %1874 = vrot.lane.b32.xlu1 %v1871_v44, %s4061_s0  ;;  %v2707_v44 = vld [vmem:[#allocation2 + $0x10] sm:$0xf0] }
 0x4e4   :  { %2068 = vrot.lane.b32.xlu0 %v2061_v48, %s4056_s6  ;;  %v2639_v48 = vld [vmem:[#allocation2] sm:$0xf0] }
 0x4e5   :  { %v4726_v50 = vpop.permute.xlu1 %2539 }
 0x4e6   :  { %v1809_v51 = vpop.permute.xlu0 %1808 }
 0x4e7   :  { %1917 = vrot.lane.b32.xlu1 %v1914_v52, %s4062_s11  ;;  %v2645_v52 = vrot.slane %v2639_v48, 4  ;;  %v2903_v48 = vrot.slane %v2897_v42, 4  ;;  %v1866_v42 = vld [vmem:[#allocation2 + $0x8] sm:$0xf] }
 0x4e8   :  { %2111 = vrot.lane.b32.xlu0 %v2104_v40, %s4057_s7  ;;  %v2750_v40 = vld [vmem:[#allocation2 + $0x10] sm:$0xf0] }
 0x4e9   :  { %v4730_v30 = vpop.permute.xlu1 %2582 }
 0x4ea   :  { %v4732_v55 = vpop.permute.xlu0 %1851 }
 0x4eb   :  { %1960 = vrot.lane.b32.xlu1 %v1957_v56, %s4063_s12 }
 0x4ec   :  { %2154 = vrot.lane.b32.xlu0 %v2147_v57, %s4058_s8 }
 0x4ed   :  { %v4736_v53 = vpop.permute.xlu1 %1810 }
 0x4ee   :  { %v4738_v60 = vpop.permute.xlu0 %1894  ;;  %v1814_v59 = vsel %vm207_vm3, %v1809_v51, %v4736_v53 }
 0x4ef   :  { %1819 = vst [vmem:[#allocation3 + $0x18] sm:$0xf] %v1814_v59  ;;  %2003 = vrot.lane.b32.xlu1 %v2000_v61, %s4064_s1  ;;  %v2793_v59 = vld [vmem:[#allocation2 + $0x10] sm:$0xf0] }
 0x4f0   :  { %2199 = vrot.lane.b32.xlu0 %v2190_v21, %s4069_s20  ;;  %v2725_v21 = vld [vmem:[#allocation2] sm:$0xf0] }
 0x4f1   :  { %v4744_v10 = vpop.permute.xlu1 %1855 }
 0x4f2   :  { %v4746_v12 = vpop.permute.xlu0 %1937  ;;  %1864 = vst.msk [vmem:[#allocation3 + $0x40] sm:$0xf] %vm168_vm2, %v4744_v10 }
 0x4f3   :  { %2046 = vrot.lane.b32.xlu1 %v2043_v14, %s4065_s14 }
 0x4f4   :  { %2253 = vrot.lane.b32.xlu0 %v2244_v15, %s4043_s19  ;;  %v2731_v15 = vrot.slane %v2725_v21, 4  ;;  %v2559_v21 = vrot.slane %v2553_v54, 4  ;;  %v1872_v54 = vrot.slane %v1866_v42, 4 }
 0x4f5   :  { %v4752_v13 = vpop.permute.xlu1 %1898 }
 0x4f6   :  { %v4754_v4 = vpop.permute.xlu0 %1980  ;;  %1907 = vst.msk [vmem:[#allocation3 + $0x58] sm:$0xf] %vm168_vm2, %v4752_v13 }
 0x4f7   :  { %2089 = vrot.lane.b32.xlu1 %v2086_v11, %s4066_s17  ;;  %v2836_v11 = vld [vmem:[#allocation2 + $0x10] sm:$0xf0] }
 0x4f8   :  { %2307 = vrot.lane.b32.xlu0 %v2298_v17, %s4072_s23  ;;  %v2768_v17 = vld [vmem:[#allocation2] sm:$0xf0] }
 0x4f9   :  { %v4760_v22 = vpop.permute.xlu1 %1941 }
 0x4fa   :  { %v4762_v24 = vpop.permute.xlu0 %2023  ;;  %1950 = vst.msk [vmem:[#allocation3 + $0x70] sm:$0xf] %vm168_vm2, %v4760_v22 }
 0x4fb   :  { %2132 = vrot.lane.b32.xlu1 %v2129_v19, %s4037_s13  ;;  %v2774_v19 = vrot.slane %v2768_v17, 4 }
 0x4fc   :  { %2541 = vrot.lane.b32.xlu0 %v2534_v26, %s4059_s9 }
 0x4fd   :  { %v4768_v28 = vpop.permute.xlu1 %1984 }
 0x4fe   :  { %v4770_v23 = vpop.permute.xlu0 %2066  ;;  %1993 = vst.msk [vmem:[#allocation3 + $0x88] sm:$0xf] %vm168_vm2, %v4768_v28 }
 0x4ff   :  { %2175 = vrot.lane.b32.xlu1 %v2172_v6, %s4068_s18  ;;  %v2811_v6 = vld [vmem:[#allocation2] sm:$0xf0] }
 0x500   :  { %2584 = vrot.lane.b32.xlu0 %v2577_v29, %s4060_s10  ;;  %v2817_v31 = vrot.slane %v2811_v6, 4  ;;  %v1824_v6 = vld [vmem:[#allocation2 + $0x10] sm:$0xf] }
 0x501   :  { %v4776_v32 = vpop.permute.xlu1 %2027 }
 0x502   :  { %v4778_v34 = vpop.permute.xlu0 %2109  ;;  %2036 = vst.msk [vmem:[#allocation3 + $0xa0] sm:$0xf] %vm168_vm2, %v4776_v32 }
 0x503   :  { %2226 = vrot.lane.b32.xlu1 %v2222_v35, %s4070_s21  ;;  %v2922_v35 = vld [vmem:[#allocation2 + $0x10] sm:$0xf0] }
 0x504   :  { %2629 = vrot.lane.b32.xlu0 %v2621_v18, %s4061_s0  ;;  %v2854_v18 = vld [vmem:[#allocation2] sm:$0xf0] }
 0x505   :  { %v4784_v37 = vpop.permute.xlu1 %2070 }
 0x506   :  { %v4786_v38 = vpop.permute.xlu0 %2152  ;;  %2079 = vst.msk [vmem:[#allocation3 + $0xb8] sm:$0xf] %vm168_vm2, %v4784_v37 }
 0x507   :  { %2280 = vrot.lane.b32.xlu1 %v2276_v39, %s4071_s22  ;;  %v2860_v39 = vrot.slane %v2854_v18, 4 }
 0x508   :  { %2672 = vrot.lane.b32.xlu0 %v2664_v41, %s4062_s11  ;;  %v2971_v41 = vld [vmem:[#allocation2 + $0x10] sm:$0xf0] }
 0x509   :  { %v4792_v33 = vpop.permute.xlu1 %2113 }
 0x50a   :  { %v4794_v46 = vpop.permute.xlu0 %2197  ;;  %2122 = vst.msk [vmem:[#allocation3 + $0xd0] sm:$0xf] %vm168_vm2, %v4792_v33 }
 0x50b   :  { %2605 = vrot.lane.b32.xlu1 %v2602_v43, %s4051_s27 }
 0x50c   :  { %2715 = vrot.lane.b32.xlu0 %v2707_v44, %s4063_s12 }
 0x50d   :  { %v4800_v49 = vpop.permute.xlu1 %2156 }
 0x50e   :  { %v4802_v51 = vpop.permute.xlu0 %2251  ;;  %2165 = vst.msk [vmem:[#allocation3 + $0xe8] sm:$0xf] %vm168_vm2, %v4800_v49 }
 0x50f   :  { %2648 = vrot.lane.b32.xlu1 %v2645_v52, %s4053_s29  ;;  %v3025_v52 = vld [vmem:[#allocation2 + $0x10] sm:$0xf0] }
 0x510   :  { %2758 = vrot.lane.b32.xlu0 %v2750_v40, %s4064_s1  ;;  %v2940_v40 = vld [vmem:[#allocation2] sm:$0xf0] }
 0x511   :  { %v4808_v56 = vpop.permute.xlu1 %2201 }
 0x512   :  { %v4810_v57 = vpop.permute.xlu0 %2305  ;;  %v2207_v61 = vsel %vm616_vm12, %v4808_v56, %v4644_v62 }
 0x513   :  { %2213 = vst.msk [vmem:[#allocation3 + $0x100] sm:$0xf] %vm168_vm2, %v2207_v61  ;;  %2691 = vrot.lane.b32.xlu1 %v2688_v58, %s4054_s30 }
 0x514   :  { %2801 = vrot.lane.b32.xlu0 %v2793_v59, %s4065_s14  ;;  %v2948_v59 = vrot.slane %v2940_v40, 4 }
 0x515   :  { %v4818_v9 = vpop.permute.xlu1 %2255 }
 0x516   :  { %v4820_v14 = vpop.permute.xlu0 %2625  ;;  %v2261_v16 = vsel %vm5420_vm14, %v4818_v9, %v4648_v1  ;;  %vm5425_vm14 = vcmask 719872  }
 0x517   :  { %2267 = vst.msk [vmem:[#allocation3 + $0x118] sm:$0xf] %vm168_vm2, %v2261_v16  ;;  %2734 = vrot.lane.b32.xlu1 %v2731_v15, %s4055_s5  ;;  %v2994_v15 = vld [vmem:[#allocation2] sm:$0xf0]  ;;  %v1781_v16 = vld [vmem:[#allocation2 + $0x10] sm:$0xf] }
 0x518   :  { %2844 = vrot.lane.b32.xlu0 %v2836_v11, %s4066_s17 }
 0x519   :  { %v4828_v62 = vpop.permute.xlu1 %2309 }
 0x51a   :  { %v4830_v20 = vpop.permute.xlu0 %2668  ;;  %v2315_v26 = vsel %vm728_vm8, %v4828_v62, %v4652_v3 }
 0x51b   :  { %2321 = vst.msk [vmem:[#allocation3 + $0x130] sm:$0xf] %vm168_vm2, %v2315_v26  ;;  %2777 = vrot.lane.b32.xlu1 %v2774_v19, %s4039_s15  ;;  %v3002_v19 = vrot.slane %v2994_v15, 4  ;;  %v1787_v26 = vrot.slane %v1781_v16, 4 }
 0x51c   :  { %2887 = vrot.lane.b32.xlu0 %v2879_v27, %s4037_s13  ;;  %v1780_v27 = vld [vmem:[#allocation2 + $0x8] sm:$0xf] }
 0x51d   :  { %v4838_v1 = vpop.permute.xlu1 %2543  ;;  %v1786_v18 = vrot.slane %v1780_v27, 4  ;;  %v1910_v27 = vld [vmem:[#allocation2 + $0x10] sm:$0xf] }
 0x51e   :  { %v4840_v29 = vpop.permute.xlu0 %2711 }
 0x51f   :  { %2820 = vrot.lane.b32.xlu1 %v2817_v31, %s4056_s6 }
 0x520   :  { %2930 = vrot.lane.b32.xlu0 %v2922_v35, %s4068_s18 }
 0x521   :  { %v4844_v3 = vpop.permute.xlu1 %2586 }
 0x522   :  { %v4846_v36 = vpop.permute.xlu0 %2754 }
 0x523   :  { %2863 = vrot.lane.b32.xlu1 %v2860_v39, %s4057_s7  ;;  %v1830_v39 = vrot.slane %v1824_v6, 4  ;;  %v1952_v6 = vld [vmem:[#allocation2 + $0x8] sm:$0xf] }
 0x524   :  { %2981 = vrot.lane.b32.xlu0 %v2971_v41, %s4070_s21  ;;  %v1823_v41 = vld [vmem:[#allocation2 + $0x8] sm:$0xf]  ;;  %v1958_v42 = vrot.slane %v1952_v6, 4  ;;  %v1996_v6 = vld [vmem:[#allocation2 + $0x10] sm:$0xf] }
 0x525   :  { %v4850_v43 = vpop.permute.xlu1 %2627  ;;  %v1829_v40 = vrot.slane %v1823_v41, 4  ;;  %v1916_v41 = vrot.slane %v1910_v27, 4 }
 0x526   :  { %v4852_v44 = vpop.permute.xlu0 %2797 }
 0x527   :  { %2906 = vrot.lane.b32.xlu1 %v2903_v48, %s4058_s8 }
 0x528   :  { %3035 = vrot.lane.b32.xlu0 %v3025_v52, %s4071_s22 }
 0x529   :  { %v4856_v58 = vpop.permute.xlu1 %2670 }
 0x52a   :  { %v4858_v61 = vpop.permute.xlu0 %2840 }
 0x52b   :  { %2952 = vrot.lane.b32.xlu1 %v2948_v59, %s4069_s20  ;;  %v1867_v59 = vld [vmem:[#allocation2 + $0x10] sm:$0xf] }
 0x52c   :  { %2562 = vrot.lane.b32.xlu0 %v2559_v21, %s4052_s28  ;;  %v1909_v21 = vld [vmem:[#allocation2 + $0x8] sm:$0xf] }
 0x52d   :  { %v4862_v11 = vpop.permute.xlu1 %2713 }
 0x52e   :  { %v4864_v17 = vpop.permute.xlu0 %2883 }
 0x52f   :  { %3006 = vrot.lane.b32.xlu1 %v3002_v19, %s4043_s19  ;;  %v1873_v19 = vrot.slane %v1867_v59, 4 }
 0x530   :  { %1792 = vrot.lane.b32.xlu0 %v1787_v26, %s4059_s9  ;;  %v1915_v26 = vrot.slane %v1909_v21, 4 }
 0x531   :  { %v4868_v31 = vpop.permute.xlu1 %2756 }
 0x532   :  { %v4870_v35 = vpop.permute.xlu0 %2926 }
 0x533   :  { %1790 = vrot.lane.b32.xlu1 %v1786_v18, %s4059_s9  ;;  %s4082_s9 = smov 56  }
 0x534   :  { %1835 = vrot.lane.b32.xlu0 %v1830_v39, %s4060_s10 }
 0x535   :  { %v4874_v48 = vpop.permute.xlu1 %2799 }
 0x536   :  { %v4876_v52 = vpop.permute.xlu0 %2977 }
 0x537   :  { %1833 = vrot.lane.b32.xlu1 %v1829_v40, %s4060_s10  ;;  %s4083_s10 = smov 20  }
 0x538   :  { %1876 = vrot.lane.b32.xlu0 %v1872_v54, %s4061_s0  ;;  %v1953_v54 = vld [vmem:[#allocation2 + $0x10] sm:$0xf] }
 0x539   :  { %v4880_v15 = vpop.permute.xlu1 %2842 }
 0x53a   :  { %v4882_v16 = vpop.permute.xlu0 %3031 }
 0x53b   :  { %1878 = vrot.lane.b32.xlu1 %v1873_v19, %s4061_s0  ;;  %v1959_v19 = vrot.slane %v1953_v54, 4 }
 0x53c   :  { %1919 = vrot.lane.b32.xlu0 %v1915_v26, %s4062_s11  ;;  %v2001_v26 = vrot.slane %v1995_v8, 4 }
 0x53d   :  { %v4886_v18 = vpop.permute.xlu1 %2885 }
 0x53e   :  { %v1813_v39 = vpop.permute.xlu0 %1812 }
 0x53f   :  { %v1815_v40 = vsel %vm207_vm3, %v4736_v53, %v1813_v39  ;;  %1821 = vst.msk [vmem:[#allocation3 + $0x28] sm:$0xf] %vm168_vm2, %v1813_v39  ;;  %1921 = vrot.lane.b32.xlu1 %v1916_v41, %s4062_s11  ;;  %v2038_v39 = vld [vmem:[#allocation2 + $0x8] sm:$0xf]  ;;  %s4084_s11 = smov 60  }
 0x540   :  { %1820 = vst [vmem:[#allocation3 + $0x20] sm:$0xf] %v1815_v40  ;;  %1962 = vrot.lane.b32.xlu0 %v1958_v42, %s4063_s12  ;;  %v2002_v40 = vrot.slane %v1996_v6, 4  ;;  %v2044_v54 = vrot.slane %v2038_v39, 4  ;;  %v2124_v39 = vld [vmem:[#allocation2 + $0x8] sm:$0xf] }
 0x541   :  { %v4893_v59 = vpop.permute.xlu1 %2928 }
 0x542   :  { %v1854_v21 = vpop.permute.xlu0 %1853 }
 0x543   :  { %v1857_v27 = vsel %vm252_vm4, %v4732_v55, %v1854_v21  ;;  %v1858_v53 = vsel %vm252_vm4, %v1854_v21, %v4744_v10  ;;  %1964 = vrot.lane.b32.xlu1 %v1959_v19, %s4063_s12  ;;  %v2039_v10 = vld [vmem:[#allocation2 + $0x10] sm:$0xf]  ;;  %v2081_v21 = vld [vmem:[#allocation2 + $0x8] sm:$0xf] }
 0x544   :  { %1862 = vst [vmem:[#allocation3 + $0x30] sm:$0xf] %v1857_v27  ;;  %1863 = vst [vmem:[#allocation3 + $0x38] sm:$0xf] %v1858_v53  ;;  %2005 = vrot.lane.b32.xlu0 %v2001_v26, %s4064_s1  ;;  %v2045_v27 = vrot.slane %v2039_v10, 4  ;;  %v2087_v53 = vrot.slane %v2081_v21, 4 }
 0x545   :  { %v4901_v41 = vpop.permute.xlu1 %2979  ;;  %v2167_v10 = vld [vmem:[#allocation2 + $0x8] sm:$0xf] }
 0x546   :  { %v1897_v42 = vpop.permute.xlu0 %1896 }
 0x547   :  { %v1900_v8 = vsel %vm5421_vm5, %v4738_v60, %v1897_v42  ;;  %v1901_v55 = vsel %vm5422_vm0, %v1897_v42, %v4752_v13  ;;  %2007 = vrot.lane.b32.xlu1 %v2002_v40, %s4064_s1  ;;  %v2082_v13 = vld [vmem:[#allocation2 + $0x10] sm:$0xf]  ;;  %vm5426_vm5 = vmmov %vm5425_vm14  ;;  %vm5427_vm0 = vcmask 703488   ;;  %s4085_s1 = smov 52  }
 0x548   :  { %1905 = vst [vmem:[#allocation3 + $0x48] sm:$0xf] %v1900_v8  ;;  %1906 = vst [vmem:[#allocation3 + $0x50] sm:$0xf] %v1901_v55  ;;  %2048 = vrot.lane.b32.xlu0 %v2044_v54, %s4065_s14  ;;  %v2088_v54 = vrot.slane %v2082_v13, 4  ;;  %v2130_v8 = vrot.slane %v2124_v39, 4 }
 0x549   :  { %v4909_v19 = vpop.permute.xlu1 %3033 }
 0x54a   :  { %v1940_v26 = vpop.permute.xlu0 %1939 }
 0x54b   :  { %v1943_v6 = vsel %vm5423_vm10, %v4746_v12, %v1940_v26  ;;  %v1944_v60 = vsel %vm5424_vm6, %v1940_v26, %v4760_v22  ;;  %2050 = vrot.lane.b32.xlu1 %v2045_v27, %s4065_s14  ;;  %v2125_v22 = vld [vmem:[#allocation2 + $0x10] sm:$0xf]  ;;  %vm5428_vm10 = vmmov %vm5427_vm0  ;;  %vm5429_vm6 = vcmask 687104   ;;  %s4086_s14 = smov 28  }
 0x54c   :  { %1948 = vst [vmem:[#allocation3 + $0x60] sm:$0xf] %v1943_v6  ;;  %1949 = vst [vmem:[#allocation3 + $0x68] sm:$0xf] %v1944_v60  ;;  %2091 = vrot.lane.b32.xlu0 %v2087_v53, %s4066_s17  ;;  %v2131_v27 = vrot.slane %v2125_v22, 4  ;;  %v2173_v53 = vrot.slane %v2167_v10, 4 }
 0x54d   :  { %v4917_v42 = vpop.permute.xlu1 %1788  ;;  %v2215_v60 = vld [vmem:[#allocation2 + $0x8] sm:$0xf] }
 0x54e   :  { %v1983_v40 = vpop.permute.xlu0 %1982 }
 0x54f   :  { %v1986_v55 = vsel %vm5425_vm14, %v4754_v4, %v1983_v40  ;;  %v1987_v12 = vsel %vm5426_vm5, %v1983_v40, %v4768_v28  ;;  %2093 = vrot.lane.b32.xlu1 %v2088_v54, %s4066_s17  ;;  %v2168_v28 = vld [vmem:[#allocation2 + $0x10] sm:$0xf]  ;;  %v2223_v54 = vrot.slane %v2215_v60, 4  ;;  %vm5430_vm14 = vmmov %vm5429_vm6  ;;  %vm5431_vm5 = vcmask 547840  }
 0x550   :  { %1991 = vst [vmem:[#allocation3 + $0x78] sm:$0xf] %v1986_v55  ;;  %1992 = vst [vmem:[#allocation3 + $0x80] sm:$0xf] %v1987_v12  ;;  %2134 = vrot.lane.b32.xlu0 %v2130_v8, %s4037_s13  ;;  %v2174_v40 = vrot.slane %v2168_v28, 4 }
 0x551   :  { %v4925_v21 = vpop.permute.xlu1 %1831  ;;  %v2269_v55 = vld [vmem:[#allocation2 + $0x8] sm:$0xf] }
 0x552   :  { %v2026_v26 = vpop.permute.xlu0 %2025 }
 0x553   :  { %v2029_v6 = vsel %vm5427_vm0, %v4762_v24, %v2026_v26  ;;  %v2030_v4 = vsel %vm5428_vm10, %v2026_v26, %v4776_v32  ;;  %2136 = vrot.lane.b32.xlu1 %v2131_v27, %s4037_s13  ;;  %v2216_v32 = vld [vmem:[#allocation2 + $0x10] sm:$0xf]  ;;  %v2277_v26 = vrot.slane %v2269_v55, 4  ;;  %vm5432_vm0 = vmmov %vm5431_vm5  ;;  %vm5433_vm10 = vcmask 531456   ;;  %s4075_s13 = smov 36  }
 0x554   :  { %2034 = vst [vmem:[#allocation3 + $0x90] sm:$0xf] %v2029_v6  ;;  %2035 = vst [vmem:[#allocation3 + $0x98] sm:$0xf] %v2030_v4  ;;  %2177 = vrot.lane.b32.xlu0 %v2173_v53, %s4068_s18  ;;  %v2224_v10 = vrot.slane %v2216_v32, 4 }
 0x555   :  { %v4933_v13 = vpop.permute.xlu1 %1874  ;;  %v2554_v53 = vld [vmem:[#allocation2 + $0x8] sm:$0xf0] }
 0x556   :  { %v2069_v39 = vpop.permute.xlu0 %2068  ;;  %v2560_v60 = vrot.slane %v2554_v53, 4  ;;  %v2684_v53 = vld [vmem:[#allocation2 + $0x10] sm:$0xf0] }
 0x557   :  { %v2072_v8 = vsel %vm5429_vm6, %v4770_v23, %v2069_v39  ;;  %v2073_v24 = vsel %vm5430_vm14, %v2069_v39, %v4784_v37  ;;  %2179 = vrot.lane.b32.xlu1 %v2174_v40, %s4068_s18  ;;  %v2270_v37 = vld [vmem:[#allocation2 + $0x10] sm:$0xf]  ;;  %vm5434_vm6 = vmmov %vm5433_vm10  ;;  %v2598_v40 = vld [vmem:[#allocation2 + $0x10] sm:$0xf0]  ;;  %vm5435_vm14 = vcmask 375808   ;;  %s4087_s18 = smov 96  }
 0x558   :  { %2077 = vst [vmem:[#allocation3 + $0xa8] sm:$0xf] %v2072_v8  ;;  %2078 = vst [vmem:[#allocation3 + $0xb0] sm:$0xf] %v2073_v24  ;;  %2228 = vrot.lane.b32.xlu0 %v2223_v54, %s4070_s21  ;;  %v2278_v28 = vrot.slane %v2270_v37, 4  ;;  %v2604_v32 = vrot.slane %v2598_v40, 4 }
 0x559   :  { %v4941_v12 = vpop.permute.xlu1 %1917 }
 0x55a   :  { %v2112_v22 = vpop.permute.xlu0 %2111 }
 0x55b   :  { %v2115_v27 = vsel %vm5431_vm5, %v4778_v34, %v2112_v22  ;;  %v2116_v23 = vsel %vm5432_vm0, %v2112_v22, %v4792_v33  ;;  %2230 = vrot.lane.b32.xlu1 %v2224_v10, %s4070_s21  ;;  %v2555_v33 = vld [vmem:[#allocation2 + $0x10] sm:$0xf0]  ;;  %vm5436_vm5 = vmmov %vm5435_vm14  ;;  %vm5450_vm0 = vcmask 1039360   ;;  %s4089_s21 = smov 120  }
 0x55c   :  { %2120 = vst [vmem:[#allocation3 + $0xc0] sm:$0xf] %v2115_v27  ;;  %2121 = vst [vmem:[#allocation3 + $0xc8] sm:$0xf] %v2116_v23  ;;  %2282 = vrot.lane.b32.xlu0 %v2277_v26, %s4071_s22  ;;  %v2561_v24 = vrot.slane %v2555_v33, 4 }
 0x55d   :  { %v4949_v6 = vpop.permute.xlu1 %1960  ;;  %v2641_v22 = vld [vmem:[#allocation2 + $0x10] sm:$0xf0] }
 0x55e   :  { %v2155_v4 = vpop.permute.xlu0 %2154  ;;  %v2647_v23 = vrot.slane %v2641_v22, 4  ;;  %v2727_v33 = vld [vmem:[#allocation2 + $0x10] sm:$0xf0] }
 0x55f   :  { %v2158_v39 = vsel %vm5433_vm10, %v4786_v38, %v2155_v4  ;;  %v2159_v34 = vsel %vm5434_vm6, %v2155_v4, %v4800_v49  ;;  %2284 = vrot.lane.b32.xlu1 %v2278_v28, %s4071_s22  ;;  %v2597_v49 = vld [vmem:[#allocation2 + $0x8] sm:$0xf0]  ;;  %vm5451_vm10 = vmmov %vm5450_vm0  ;;  %vm5452_vm6 = vcmask 1022976  }
 0x560   :  { %2163 = vst [vmem:[#allocation3 + $0xd8] sm:$0xf] %v2158_v39  ;;  %2164 = vst [vmem:[#allocation3 + $0xe0] sm:$0xf] %v2159_v34  ;;  %2564 = vrot.lane.b32.xlu0 %v2560_v60, %s4052_s28  ;;  %v2603_v27 = vrot.slane %v2597_v49, 4  ;;  %v2690_v39 = vrot.slane %v2684_v53, 4 }
 0x561   :  { %v4957_v54 = vpop.permute.xlu1 %2003  ;;  %v2812_v53 = vld [vmem:[#allocation2 + $0x8] sm:$0xf0] }
 0x562   :  { %v2200_v8 = vpop.permute.xlu0 %2199 }
 0x563   :  { %v2205_v55 = vsel %vm616_vm12, %v4794_v46, %v2200_v8  ;;  %v2206_v38 = vsel %vm616_vm12, %v2200_v8, %v4808_v56  ;;  %2566 = vrot.lane.b32.xlu1 %v2561_v24, %s4052_s28  ;;  %v2640_v56 = vld [vmem:[#allocation2 + $0x8] sm:$0xf0]  ;;  %s4076_s28 = smov 40  }
 0x564   :  { %2211 = vst [vmem:[#allocation3 + $0xf0] sm:$0xf] %v2205_v55  ;;  %2212 = vst [vmem:[#allocation3 + $0xf8] sm:$0xf] %v2206_v38  ;;  %2609 = vrot.lane.b32.xlu0 %v2604_v32, %s4051_s27  ;;  %v2646_v60 = vrot.slane %v2640_v56, 4  ;;  %v2733_v32 = vrot.slane %v2727_v33, 4 }
 0x565   :  { %v4965_v10 = vpop.permute.xlu1 %2046  ;;  %v2726_v55 = vld [vmem:[#allocation2 + $0x8] sm:$0xf0]  ;;  %v2770_v38 = vld [vmem:[#allocation2 + $0x10] sm:$0xf0] }
 0x566   :  { %v2254_v26 = vpop.permute.xlu0 %2253  ;;  %v2732_v49 = vrot.slane %v2726_v55, 4  ;;  %v2776_v22 = vrot.slane %v2770_v38, 4  ;;  %v2899_v33 = vld [vmem:[#allocation2 + $0x10] sm:$0xf0] }
 0x567   :  { %v2259_v37 = vsel %vm5435_vm14, %v4802_v51, %v2254_v26  ;;  %v2260_v46 = vsel %vm5436_vm5, %v2254_v26, %v4818_v9  ;;  %2607 = vrot.lane.b32.xlu1 %v2603_v27, %s4051_s27  ;;  %v2683_v9 = vld [vmem:[#allocation2 + $0x8] sm:$0xf0]  ;;  %v2813_v27 = vld [vmem:[#allocation2 + $0x10] sm:$0xf0]  ;;  %v2905_v38 = vrot.slane %v2899_v33, 4  ;;  %vm5453_vm14 = vmmov %vm5452_vm6  ;;  %vm5454_vm5 = vcmask 883712  }
 0x568   :  { %2265 = vst [vmem:[#allocation3 + $0x108] sm:$0xf] %v2259_v37  ;;  %2266 = vst [vmem:[#allocation3 + $0x110] sm:$0xf] %v2260_v46  ;;  %2652 = vrot.lane.b32.xlu0 %v2647_v23, %s4053_s29  ;;  %v2689_v24 = vrot.slane %v2683_v9, 4  ;;  %v2819_v56 = vrot.slane %v2813_v27, 4 }
 0x569   :  { %v4973_v4 = vpop.permute.xlu1 %2089  ;;  %v2769_v26 = vld [vmem:[#allocation2 + $0x8] sm:$0xf0] }
 0x56a   :  { %v2308_v28 = vpop.permute.xlu0 %2307  ;;  %v2775_v46 = vrot.slane %v2769_v26, 4  ;;  %v2855_v9 = vld [vmem:[#allocation2 + $0x8] sm:$0xf0] }
 0x56b   :  { %v2313_v34 = vsel %vm728_vm8, %v4810_v57, %v2308_v28  ;;  %v2314_v51 = vsel %vm728_vm8, %v2308_v28, %v4828_v62  ;;  %2650 = vrot.lane.b32.xlu1 %v2646_v60, %s4053_s29  ;;  %v2856_v28 = vld [vmem:[#allocation2 + $0x10] sm:$0xf0]  ;;  %v2861_v55 = vrot.slane %v2855_v9, 4  ;;  %s4077_s29 = smov 32  }
 0x56c   :  { %2319 = vst [vmem:[#allocation3 + $0x120] sm:$0xf] %v2313_v34  ;;  %2320 = vst [vmem:[#allocation3 + $0x128] sm:$0xf] %v2314_v51  ;;  %2695 = vrot.lane.b32.xlu0 %v2690_v39, %s4054_s30  ;;  %v2818_v34 = vrot.slane %v2812_v53, 4  ;;  %v2862_v51 = vrot.slane %v2856_v28, 4 }
 0x56d   :  { %v4981_v40 = vpop.permute.xlu1 %2132  ;;  %v2941_v53 = vld [vmem:[#allocation2 + $0x8] sm:$0xf0]  ;;  %v2996_v28 = vld [vmem:[#allocation2 + $0x10] sm:$0xf0] }
 0x56e   :  { %v4983_v8 = vpop.permute.xlu0 %2541  ;;  %v2949_v9 = vrot.slane %v2941_v53, 4  ;;  %v3004_v33 = vrot.slane %v2996_v28, 4 }
 0x56f   :  { %2693 = vrot.lane.b32.xlu1 %v2689_v24, %s4054_s30  ;;  %s4079_s30 = smov 12  }
 0x570   :  { %2738 = vrot.lane.b32.xlu0 %v2733_v32, %s4055_s5 }
 0x571   :  { %v4987_v57 = vpop.permute.xlu1 %2175 }
 0x572   :  { %v4989_v62 = vpop.permute.xlu0 %2584 }
 0x573   :  { %2736 = vrot.lane.b32.xlu1 %v2732_v49, %s4055_s5  ;;  %v2898_v49 = vld [vmem:[#allocation2 + $0x8] sm:$0xf0] }
 0x574   :  { %2781 = vrot.lane.b32.xlu0 %v2776_v22, %s4039_s15  ;;  %v2942_v22 = vld [vmem:[#allocation2 + $0x10] sm:$0xf0] }
 0x575   :  { %v4993_v23 = vpop.permute.xlu1 %2226 }
 0x576   :  { %v4995_v37 = vpop.permute.xlu0 %2629 }
 0x577   :  { %2779 = vrot.lane.b32.xlu1 %v2775_v46, %s4039_s15  ;;  %v2904_v46 = vrot.slane %v2898_v49, 4 }
 0x578   :  { %2824 = vrot.lane.b32.xlu0 %v2819_v56, %s4056_s6  ;;  %v2950_v56 = vrot.slane %v2942_v22, 4 }
 0x579   :  { %v4999_v60 = vpop.permute.xlu1 %2280 }
 0x57a   :  { %v5001_v39 = vpop.permute.xlu0 %2672 }
 0x57b   :  { %2822 = vrot.lane.b32.xlu1 %v2818_v34, %s4056_s6 }
 0x57c   :  { %2867 = vrot.lane.b32.xlu0 %v2862_v51, %s4057_s7 }
 0x57d   :  { %v5005_v24 = vpop.permute.xlu1 %2605 }
 0x57e   :  { %5437 = vst [vmem:[#allocation19_spill] sm:$0xff] %v5005_v24  ;;  %v5007_v32 = vpop.permute.xlu0 %2715 }
 0x57f   :  { %2865 = vrot.lane.b32.xlu1 %v2861_v55, %s4057_s7  ;;  %v2995_v55 = vld [vmem:[#allocation2 + $0x8] sm:$0xf0]  ;;  %s4080_s7 = smov 24  }
 0x580   :  { %2910 = vrot.lane.b32.xlu0 %v2905_v38, %s4058_s8  ;;  %v3026_v38 = vld [vmem:[#allocation2 + $0x18] sm:$0xf0]  ;;  %v3003_v45 = vrot.slane %v2995_v55, 4 }
 0x581   :  { %v5011_v26 = vpop.permute.xlu1 %2648 }
 0x582   :  { %5438 = vst [vmem:[#allocation20_spill] sm:$0xff] %v5011_v26  ;;  %v5013_v27 = vpop.permute.xlu0 %2758 }
 0x583   :  { %2908 = vrot.lane.b32.xlu1 %v2904_v46, %s4058_s8  ;;  %v3049_v46 = vld [vmem:[#allocation2 + $0x8] sm:$0xf0]  ;;  %s4081_s8 = smov 16  }
 0x584   :  { %2956 = vrot.lane.b32.xlu0 %v2950_v56, %s4069_s20  ;;  %v3051_v56 = vld [vmem:[#allocation2 + $0x18] sm:$0xf0] }
 0x585   :  { %v5017_v34 = vpop.permute.xlu1 %2691  ;;  %v3059_v7 = vrot.slane %v3051_v56, 4 }
 0x586   :  { %5439 = vst [vmem:[#allocation21_spill] sm:$0xff] %v5017_v34  ;;  %v5019_v51 = vpop.permute.xlu0 %2801 }
 0x587   :  { %2954 = vrot.lane.b32.xlu1 %v2949_v9, %s4069_s20  ;;  %v3057_v9 = vrot.slane %v3049_v46, 4 }
 0x588   :  { %3010 = vrot.lane.b32.xlu0 %v3004_v33, %s4043_s19  ;;  %v3048_v33 = vld [vmem:[#allocation2] sm:$0xf0] }
 0x589   :  { %v5023_v49 = vpop.permute.xlu1 %2734 }
 0x58a   :  { %5440 = vst [vmem:[#allocation22_spill] sm:$0xff] %v5023_v49  ;;  %v5025_v22 = vpop.permute.xlu0 %2844 }
 0x58b   :  { %3008 = vrot.lane.b32.xlu1 %v3003_v45, %s4043_s19  ;;  %v3056_v45 = vrot.slane %v3048_v33, 4 }
 0x58c   :  { %3037 = vrot.lane.b32.xlu0 %v3026_v38, %s4071_s22  ;;  %v5041_v38 = vld [vmem:[#allocation5] sm:$0xff]  ;;  %s4091_s22 = smov 112  }
 0x58d   :  { %v5029_v53 = vpop.permute.xlu1 %2777  ;;  %5443 = vst [vmem:[#allocation25_spill] sm:$0xff] %v5041_v38 }
 0x58e   :  { %5441 = vst [vmem:[#allocation23_spill] sm:$0xff] %v5029_v53  ;;  %v5031_v28 = vpop.permute.xlu0 %2887 }
 0x58f   :  { %3062 = vrot.lane.b32.xlu1 %v3057_v9, %s4072_s23 }
 0x590   :  { %3064 = vrot.lane.b32.xlu0 %v3058_v25, %s4072_s23  ;;  %v5048_v25 = vld [vmem:[#allocation5 + $0x8] sm:$0xff] }
 0x591   :  { %v5035_v55 = vpop.permute.xlu1 %2820  ;;  %5445 = vst [vmem:[#allocation27_spill] sm:$0xff] %v5048_v25 }
 0x592   :  { %5442 = vst [vmem:[#allocation24_spill] sm:$0xff] %v5035_v55  ;;  %v5037_v0 = vpop.permute.xlu0 %2930  ;;  %v2520_v55 = vld [vmem:[#allocation2 + $0x10] sm:$0xf0] }
 0x593   :  { %3060 = vrot.lane.b32.xlu1 %v3056_v45, %s4072_s23 }
 0x594   :  { %3066 = vrot.lane.b32.xlu0 %v3059_v7, %s4072_s23 }
 0x595   :  { %v5043_v53 = vpop.permute.xlu1 %2863 }
 0x596   :  { %5444 = vst [vmem:[#allocation26_spill] sm:$0xff] %v5043_v53  ;;  %v5045_v47 = vpop.permute.xlu0 %2981 }
 0x597   :  { %3321 = vrot.lane.b32.xlu1 %v5041_v38, %s4074_s3 }
 0x599   :  { %v5050_v46 = vpop.permute.xlu1 %2906 }
 0x59a   :  { %5446 = vst [vmem:[#allocation28_spill] sm:$0xff] %v5050_v46  ;;  %v5052_v56 = vpop.permute.xlu0 %3035 }
 0x59b   :  { %5447 = vst [vmem:[#allocation29_spill] sm:$0xff] %v5052_v56  ;;  %3430 = vrot.lane.b32.xlu1 %v5048_v25, %s4075_s13  ;;  %v2526_v25 = vrot.slane %v2520_v55, 4 }
 0x59d   :  { %v5055_v9 = vpop.permute.xlu1 %2952 }
 0x59e   :  { %5448 = vst [vmem:[#allocation30_spill] sm:$0xff] %v5055_v9  ;;  %v5057_v7 = vpop.permute.xlu0 %2562 }
 0x5a1   :  { %v5059_v33 = vpop.permute.xlu1 %3006 }
 0x5a2   :  { %5449 = vst [vmem:[#allocation31_spill] sm:$0xff] %v5059_v33  ;;  %v1793_v45 = vpop.permute.xlu0 %1792 }
 0x5a3   :  { %1801 = vst.msk [vmem:[#allocation3 + $0x10] sm:$0xf0] %vm193_vm13, %v1793_v45 }
 0x5a5   :  { %v1791_v53 = vpop.permute.xlu1 %1790 }
 0x5a6   :  { %v1836_v38 = vpop.permute.xlu0 %1835  ;;  %v1794_v46 = vsel %vm5450_vm0, %v4917_v42, %v1791_v53  ;;  %v1795_v49 = vsel %vm5451_vm10, %v1791_v53, %v1793_v45  ;;  %v2519_v42 = vld [vmem:[#allocation2 + $0x8] sm:$0xf0]  ;;  %v2518_v53 = vld [vmem:[#allocation2] sm:$0xf0]  ;;  %vm5455_vm10 = vmmov %vm5450_vm0 }
 0x5a7   :  { %1844 = vst.msk [vmem:[#allocation3 + $0x28] sm:$0xf0] %vm193_vm13, %v1836_v38  ;;  %1799 = vst [vmem:[#allocation3] sm:$0xf0] %v1794_v46  ;;  %v2525_v46 = vrot.slane %v2519_v42, 4 }
 0x5a8   :  { %1800 = vst [vmem:[#allocation3 + $0x8] sm:$0xf0] %v1795_v49  ;;  %v2545_v49 = vsel %vm5450_vm0, %v4726_v50, %v4983_v8 }
 0x5a9   :  { %v1834_v9 = vpop.permute.xlu1 %1833 }
 0x5aa   :  { %v1877_v34 = vpop.permute.xlu0 %1876  ;;  %v2325_v26 = vld [vmem:[#allocation3 + $0x10] sm:$0xff]  ;;  %v1837_v33 = vsel %vm5452_vm6, %v4925_v21, %v1834_v9  ;;  %v1838_v24 = vsel %vm5453_vm14, %v1834_v9, %v1836_v38  ;;  %v2524_v9 = vrot.slane %v2518_v53, 4  ;;  %vm5456_vm6 = vmmov %vm5454_vm5 }
 0x5ab   :  { %v1880_v56 = vsel %vm5454_vm5, %v4933_v13, %v1877_v34  ;;  %2532 = vst.msk [vmem:[#allocation3 + $0x10] sm:$0xf] %vm168_vm2, %v2526_v25  ;;  %1842 = vst [vmem:[#allocation3 + $0x18] sm:$0xf0] %v1837_v33  ;;  %v2546_v13 = vsel %vm5455_vm10, %v4983_v8, %v4838_v1  ;;  %vm5461_vm10 = vcmask 850944  }
 0x5ac   :  { %2552 = vst.msk [vmem:[#allocation3 + $0x10] sm:$0xf0] %vm193_vm13, %v4838_v1  ;;  %1843 = vst [vmem:[#allocation3 + $0x20] sm:$0xf0] %v1838_v24 }
 0x5ad   :  { %1885 = vst [vmem:[#allocation3 + $0x30] sm:$0xf0] %v1880_v56  ;;  %v1879_v21 = vpop.permute.xlu1 %1878  ;;  %vm5457_vm14 = vmmov %vm5454_vm5  ;;  %vm5459_vm5 = vcmask 1022976  }
 0x5ae   :  { %v1920_v55 = vpop.permute.xlu0 %1919  ;;  %v2328_v38 = vld [vmem:[#allocation3 + $0x28] sm:$0xff]  ;;  %v1881_v25 = vsel %vm5456_vm6, %v1877_v34, %v1879_v21  ;;  %1887 = vst.msk [vmem:[#allocation3 + $0x40] sm:$0xf0] %vm193_vm13, %v1879_v21  ;;  %v2323_v33 = vld [vmem:[#allocation3] sm:$0xff]  ;;  %v2631_v1 = vsel %vm5457_vm14, %v4820_v14, %v4850_v43  ;;  %vm5460_vm0 = vmmov %vm5459_vm5 }
 0x5af   :  { %v1923_v24 = vsel %vm321_vm15, %v4941_v12, %v1920_v55  ;;  %v3829_v56 = vpack.c.bf16 %v2328_v38, %v2325_v26  ;;  %2595 = vst.msk [vmem:[#allocation3 + $0x28] sm:$0xf0] %vm193_vm13, %v4844_v3  ;;  %v2324_v50 = vld [vmem:[#allocation3 + $0x8] sm:$0xff]  ;;  %1886 = vst [vmem:[#allocation3 + $0x38] sm:$0xf0] %v1881_v25  ;;  %v5458_v12 = vmov 0.0|0.0   ;;  %v2588_v26 = vsel %vm5459_vm5, %v4730_v30, %v4989_v62 }
 0x5b0   :  { %1928 = vst [vmem:[#allocation3 + $0x48] sm:$0xf0] %v1923_v24  ;;  %2531 = vst [vmem:[#allocation3 + $0x8] sm:$0xf] %v2525_v46  ;;  %v2589_v45 = vsel %vm5460_vm0, %v4989_v62, %v4844_v3  ;;  %vm5463_vm5 = vcmask 711680  }
 0x5b1   :  { %2551 = vst [vmem:[#allocation3 + $0x8] sm:$0xf0] %v2546_v13  ;;  %2530 = vst [vmem:[#allocation3] sm:$0xf] %v2524_v9  ;;  %3830 = vmatpush3.bf16.msra.mxu1 %v3829_v56  ;;  %v1922_v8 = vpop.permute.xlu1 %1921 }
 0x5b2   :  { %2550 = vst [vmem:[#allocation3] sm:$0xf0] %v2545_v49  ;;  %v1963_v34 = vpop.permute.xlu0 %1962  ;;  %3831 = vmatprep.subr.bf16.mxu1 %v5458_v12  ;;  %v1924_v42 = vsel %vm321_vm15, %v1920_v55, %v1922_v8  ;;  %1930 = vst.msk [vmem:[#allocation3 + $0x58] sm:$0xf0] %vm193_vm13, %v1922_v8  ;;  %v2326_v49 = vld [vmem:[#allocation3 + $0x18] sm:$0xff]  ;;  %v2674_v55 = vsel %vm321_vm15, %v4830_v20, %v4856_v58 }
 0x5b3   :  { %v1966_v53 = vsel %vm5461_vm10, %v4949_v6, %v1963_v34  ;;  %v2327_v14 = vld [vmem:[#allocation3 + $0x20] sm:$0xff]  ;;  %1929 = vst [vmem:[#allocation3 + $0x50] sm:$0xf0] %v1924_v42  ;;  %v3806_v46 = vpack.c.bf16 %v2326_v49, %v2323_v33  ;;  %2593 = vst [vmem:[#allocation3 + $0x18] sm:$0xf0] %v2588_v26  ;;  %v2632_v6 = vsel %vm5456_vm6, %v4850_v43, %v4995_v37  ;;  %vm5466_vm6 = vcmask 695296  }
 0x5b4   :  { %v2329_v21 = vld [vmem:[#allocation3 + $0x30] sm:$0xff]  ;;  %1971 = vst [vmem:[#allocation3 + $0x60] sm:$0xf0] %v1966_v53  ;;  %v3804_v38 = vpack.c.bf16 %v2327_v14, %v2324_v50  ;;  %2594 = vst [vmem:[#allocation3 + $0x20] sm:$0xf0] %v2589_v45 }
 0x5b5   :  { %2636 = vst [vmem:[#allocation3 + $0x30] sm:$0xf0] %v2631_v1  ;;  %v1965_v30 = vpop.permute.xlu1 %1964  ;;  %v2331_v62 = vld [vmem:[#allocation3 + $0x40] sm:$0xff]  ;;  %vm5462_vm14 = vmmov %vm5461_vm10 }
 0x5b6   :  { %3805 = vmatprep.subr.bf16.mxu0 %v3804_v38  ;;  %v2006_v3 = vpop.permute.xlu0 %2005  ;;  %v1967_v9 = vsel %vm5462_vm14, %v1963_v34, %v1965_v30  ;;  %1973 = vst.msk [vmem:[#allocation3 + $0x70] sm:$0xf0] %vm193_vm13, %v1965_v30  ;;  %2638 = vst.msk [vmem:[#allocation3 + $0x40] sm:$0xf0] %vm193_vm13, %v4995_v37  ;;  %v2330_v25 = vld [vmem:[#allocation3 + $0x38] sm:$0xff] }
 0x5b7   :  { %v2009_v13 = vsel %vm5463_vm5, %v4957_v54, %v2006_v3  ;;  %3807 = vmatpush1.bf16.msra.mxu0 %v3806_v46  ;;  %v2332_v24 = vld [vmem:[#allocation3 + $0x48] sm:$0xff]  ;;  %1972 = vst [vmem:[#allocation3 + $0x68] sm:$0xf0] %v1967_v9  ;;  %2637 = vst [vmem:[#allocation3 + $0x38] sm:$0xf0] %v2632_v6  ;;  %v2675_v54 = vsel %vm321_vm15, %v4856_v58, %v5001_v39 }
 0x5b8   :  { %2014 = vst [vmem:[#allocation3 + $0x78] sm:$0xf0] %v2009_v13  ;;  %2679 = vst [vmem:[#allocation3 + $0x48] sm:$0xf0] %v2674_v55  ;;  %v3810_v58 = vpack.c.bf16 %v2332_v24, %v2329_v21 }
 0x5b9   :  { %vm5464_vm0 = vmmov %vm5461_vm10  ;;  %v2008_v43 = vpop.permute.xlu1 %2007  ;;  %v2334_v50 = vld [vmem:[#allocation3 + $0x58] sm:$0xff] }
 0x5ba   :  { %v2717_v20 = vsel %vm5464_vm0, %v4840_v29, %v4862_v11  ;;  %v2049_v56 = vpop.permute.xlu0 %2048  ;;  %vm5465_vm10 = vmmov %vm5463_vm5  ;;  %2016 = vst.msk [vmem:[#allocation3 + $0x88] sm:$0xf0] %vm193_vm13, %v2008_v43  ;;  %v3832_v1 = vpack.c.bf16 %v2334_v50, %v2331_v62  ;;  %v2333_v8 = vld [vmem:[#allocation3 + $0x50] sm:$0xff] }
 0x5bb   :  { %v2010_v33 = vsel %vm5465_vm10, %v2006_v3, %v2008_v43  ;;  %v2052_v37 = vsel %vm5466_vm6, %v4965_v10, %v2049_v56  ;;  %2681 = vst.msk [vmem:[#allocation3 + $0x58] sm:$0xf0] %vm193_vm13, %v5001_v39  ;;  %v2335_v29 = vld [vmem:[#allocation3 + $0x60] sm:$0xff]  ;;  %v3808_v34 = vpack.c.bf16 %v2333_v8, %v2330_v25  ;;  %2680 = vst [vmem:[#allocation3 + $0x50] sm:$0xf0] %v2675_v54 }
 0x5bc   :  { %2015 = vst [vmem:[#allocation3 + $0x80] sm:$0xf0] %v2010_v33  ;;  %2057 = vst [vmem:[#allocation3 + $0x90] sm:$0xf0] %v2052_v37  ;;  %3833 = vmatpush3.bf16.msra.mxu1 %v3832_v1 }
 0x5bd   :  { %2722 = vst [vmem:[#allocation3 + $0x60] sm:$0xf0] %v2717_v20  ;;  %v2051_v26 = vpop.permute.xlu1 %2050  ;;  %3809 = vmatprep.subr.bf16.mxu0 %v3808_v34  ;;  %3834 = vmatprep.subr.bf16.mxu1 %v5458_v12  ;;  %v2337_v42 = vld [vmem:[#allocation3 + $0x70] sm:$0xff]  ;;  %vm5467_vm15 = vmmov %vm5463_vm5 }
 0x5be   :  { %v2092_v45 = vpop.permute.xlu0 %2091  ;;  %v2760_v10 = vsel %vm5467_vm15, %v4846_v36, %v4868_v31  ;;  %vm5468_vm14 = vmmov %vm5464_vm0  ;;  %2059 = vst.msk [vmem:[#allocation3 + $0xa0] sm:$0xf0] %vm193_vm13, %v2051_v26  ;;  %vm5470_vm0 = vcmask 556032   ;;  %3811 = vmatpush1.bf16.msra.mxu0 %v3810_v58  ;;  %v2336_v49 = vld [vmem:[#allocation3 + $0x68] sm:$0xff] }
 0x5bf   :  { %v2718_v39 = vsel %vm5468_vm14, %v4862_v11, %v5007_v32  ;;  %vm5469_vm5 = vmmov %vm5466_vm6  ;;  %v2095_v14 = vsel %vm5470_vm0, %v4973_v4, %v2092_v45  ;;  %2724 = vst.msk [vmem:[#allocation3 + $0x70] sm:$0xf0] %vm193_vm13, %v5007_v32  ;;  %v2338_v21 = vld [vmem:[#allocation3 + $0x78] sm:$0xff]  ;;  %vm5474_vm14 = vcmask 539648  }
 0x5c0   :  { %v2053_v53 = vsel %vm5469_vm5, %v2049_v56, %v2051_v26  ;;  %2100 = vst [vmem:[#allocation3 + $0xa8] sm:$0xf0] %v2095_v14  ;;  %2723 = vst [vmem:[#allocation3 + $0x68] sm:$0xf0] %v2718_v39 }
 0x5c1   :  { %2058 = vst [vmem:[#allocation3 + $0x98] sm:$0xf0] %v2053_v53  ;;  %2765 = vst [vmem:[#allocation3 + $0x78] sm:$0xf0] %v2760_v10  ;;  %v2094_v11 = vpop.permute.xlu1 %2093  ;;  %v2340_v46 = vld [vmem:[#allocation3 + $0x88] sm:$0xff] }
 0x5c2   :  { %vm5471_vm10 = vmmov %vm5469_vm5  ;;  %v2135_v38 = vpop.permute.xlu0 %2134  ;;  %2102 = vst.msk [vmem:[#allocation3 + $0xb8] sm:$0xf0] %vm193_vm13, %v2094_v11  ;;  %v3835_v3 = vpack.c.bf16 %v2340_v46, %v2337_v42 }
 0x5c3   :  { %v2803_v36 = vsel %vm5471_vm10, %v4852_v44, %v4874_v48  ;;  %vm5472_vm6 = vmmov %vm5467_vm15  ;;  %v2138_v32 = vsel %vm5474_vm14, %v4981_v40, %v2135_v38  ;;  %2767 = vst.msk [vmem:[#allocation3 + $0x88] sm:$0xf0] %vm193_vm13, %v5013_v27  ;;  %v2339_v62 = vld [vmem:[#allocation3 + $0x80] sm:$0xff]  ;;  %v2341_v44 = vld [vmem:[#allocation3 + $0x90] sm:$0xff] }
 0x5c4   :  { %v2761_v4 = vsel %vm5472_vm6, %v4868_v31, %v5013_v27  ;;  %vm5473_vm15 = vmmov %vm5470_vm0  ;;  %2143 = vst [vmem:[#allocation3 + $0xc0] sm:$0xf0] %v2138_v32  ;;  %v3812_v55 = vpack.c.bf16 %v2339_v62, %v2336_v49  ;;  %3836 = vmatpush3.bf16.msra.mxu1 %v3835_v3  ;;  %v3814_v31 = vpack.c.bf16 %v2338_v21, %v2335_v29  ;;  %vm5478_vm6 = vcmask 523264   ;;  %v5488_v3 = vld [vmem:[#allocation29_spill] sm:$0xff] }
 0x5c5   :  { %v2096_v30 = vsel %vm5473_vm15, %v2092_v45, %v2094_v11  ;;  %2766 = vst [vmem:[#allocation3 + $0x80] sm:$0xf0] %v2761_v4  ;;  %2808 = vst [vmem:[#allocation3 + $0x90] sm:$0xf0] %v2803_v36  ;;  %v2137_v6 = vpop.permute.xlu1 %2136  ;;  %3837 = vmatprep.subr.bf16.mxu1 %v5458_v12  ;;  %v2343_v13 = vld [vmem:[#allocation3 + $0xa0] sm:$0xff] }
 0x5c6   :  { %2101 = vst [vmem:[#allocation3 + $0xb0] sm:$0xf0] %v2096_v30  ;;  %3813 = vmatprep.subr.bf16.mxu0 %v3812_v55  ;;  %v2178_v9 = vpop.permute.xlu0 %2177  ;;  %vm5475_vm5 = vmmov %vm5470_vm0 }
 0x5c7   :  { %v2846_v40 = vsel %vm5475_vm5, %v4858_v61, %v4880_v15  ;;  %vm5476_vm0 = vmmov %vm5471_vm10  ;;  %2145 = vst.msk [vmem:[#allocation3 + $0xd0] sm:$0xf0] %vm193_vm13, %v2137_v6  ;;  %v2181_v24 = vsel %vm5478_vm6, %v4987_v57, %v2178_v9  ;;  %3815 = vmatpush1.bf16.msra.mxu0 %v3814_v31  ;;  %v2344_v43 = vld [vmem:[#allocation3 + $0xa8] sm:$0xff] }
 0x5c8   :  { %v2804_v27 = vsel %vm5476_vm0, %v4874_v48, %v5019_v51  ;;  %vm5477_vm10 = vmmov %vm5474_vm14  ;;  %2810 = vst.msk [vmem:[#allocation3 + $0xa0] sm:$0xf0] %vm193_vm13, %v5019_v51  ;;  %v2342_v20 = vld [vmem:[#allocation3 + $0x98] sm:$0xff] }
 0x5c9   :  { %v2139_v25 = vsel %vm5477_vm10, %v2135_v38, %v2137_v6  ;;  %2186 = vst [vmem:[#allocation3 + $0xd8] sm:$0xf0] %v2181_v24  ;;  %2809 = vst [vmem:[#allocation3 + $0x98] sm:$0xf0] %v2804_v27  ;;  %v2180_v48 = vpop.permute.xlu1 %2179  ;;  %v2346_v50 = vld [vmem:[#allocation3 + $0xb8] sm:$0xff]  ;;  %v2987_v38 = vsel %vm646_vm1, %v5045_v47, %v4656_v5 }
 0x5ca   :  { %2144 = vst [vmem:[#allocation3 + $0xc8] sm:$0xf0] %v2139_v25  ;;  %2851 = vst [vmem:[#allocation3 + $0xa8] sm:$0xf0] %v2846_v40  ;;  %v2229_v56 = vpop.permute.xlu0 %2228  ;;  %v3838_v33 = vpack.c.bf16 %v2346_v50, %v2343_v13  ;;  %v2322_v50 = vld [vmem:[%s5358_s2] sm:$0xf] }
 0x5cb   :  { %vm5479_vm15 = vmmov %vm5477_vm10  ;;  %2188 = vst.msk [vmem:[#allocation3 + $0xe8] sm:$0xf0] %vm193_vm13, %v2180_v48  ;;  %v2234_v51 = vsel %vm646_vm1, %v4993_v23, %v2229_v56 }
 0x5cc   :  { %v2889_v61 = vsel %vm5479_vm15, %v4864_v17, %v4886_v18  ;;  %vm5480_vm14 = vmmov %vm5475_vm5  ;;  %2853 = vst.msk [vmem:[#allocation3 + $0xb8] sm:$0xf0] %vm193_vm13, %v5025_v22  ;;  %v2347_v17 = vld [vmem:[#allocation3 + $0xc0] sm:$0xff]  ;;  %3839 = vmatpush3.bf16.msra.mxu1 %v3838_v33 }
 0x5cd   :  { %v2847_v57 = vsel %vm5480_vm14, %v4880_v15, %v5025_v22  ;;  %vm5481_vm5 = vmmov %vm5478_vm6  ;;  %v2345_v37 = vld [vmem:[#allocation3 + $0xb0] sm:$0xff]  ;;  %2240 = vst [vmem:[#allocation3 + $0xf0] sm:$0xf0] %v2234_v51  ;;  %v3818_v15 = vpack.c.bf16 %v2344_v43, %v2341_v44  ;;  %v2231_v29 = vpop.permute.xlu1 %2230  ;;  %3840 = vmatprep.subr.bf16.mxu1 %v5458_v12  ;;  %v2890_v22 = vsel %vm5477_vm10, %v4886_v18, %v5031_v28  ;;  %vm5483_vm6 = vcmask 367616   ;;  %v5228_v43 = vld [vmem:[#allocation2 + $0x18] sm:$0xff] }
 0x5ce   :  { %v2182_v54 = vsel %vm5481_vm5, %v2178_v9, %v2180_v48  ;;  %v3816_v1 = vpack.c.bf16 %v2345_v37, %v2342_v20  ;;  %2852 = vst [vmem:[#allocation3 + $0xb0] sm:$0xf0] %v2847_v57  ;;  %2894 = vst [vmem:[#allocation3 + $0xc0] sm:$0xf0] %v2889_v61  ;;  %v2283_v23 = vpop.permute.xlu0 %2282  ;;  %v2349_v34 = vld [vmem:[#allocation3 + $0xd0] sm:$0xff]  ;;  %v2235_v58 = vsel %vm646_vm1, %v2229_v56, %v2231_v29  ;;  %v3079_v57 = vld [vmem:[#allocation3 + $0x8] sm:$0xff] }
 0x5cf   :  { %2187 = vst [vmem:[#allocation3 + $0xe0] sm:$0xf0] %v2182_v54  ;;  %vm5482_vm0 = vmmov %vm5481_vm5  ;;  %v2236_v26 = vsel %vm646_vm1, %v2231_v29, %v4646_v63  ;;  %v2288_v45 = vsel %vm5483_vm6, %v4999_v60, %v2283_v23  ;;  %v2985_v18 = vsel %vm646_vm1, %v4876_v52, %v4901_v41  ;;  %v2360_v20 = vld [vmem:[#allocation3 + $0x128] sm:$0xf]  ;;  %v2361_v48 = vld [vmem:[#allocation3 + $0x130] sm:$0xf] }
 0x5d0   :  { %v2932_v8 = vsel %vm5482_vm0, %v4870_v35, %v4893_v59  ;;  %3817 = vmatprep.subr.bf16.mxu0 %v3816_v1  ;;  %2896 = vst.msk [vmem:[#allocation3 + $0xd0] sm:$0xf0] %vm193_vm13, %v5031_v28  ;;  %v2350_v42 = vld [vmem:[#allocation3 + $0xd8] sm:$0xff]  ;;  %2241 = vst [vmem:[#allocation3 + $0xf8] sm:$0xf0] %v2235_v58  ;;  %v3080_v1 = vld [vmem:[#allocation3 + $0x10] sm:$0xff] }
 0x5d1   :  { %3819 = vmatpush1.bf16.msra.mxu0 %v3818_v15  ;;  %v2348_v35 = vld [vmem:[#allocation3 + $0xc8] sm:$0xff]  ;;  %2242 = vst.msk [vmem:[#allocation3 + $0x100] sm:$0xf0] %vm193_vm13, %v2236_v26  ;;  %2294 = vst [vmem:[#allocation3 + $0x108] sm:$0xf0] %v2288_v45  ;;  %v2285_v60 = vpop.permute.xlu1 %2284  ;;  %v3822_v36 = vpack.c.bf16 %v2350_v42, %v2347_v17 }
 0x5d2   :  { %2895 = vst [vmem:[#allocation3 + $0xc8] sm:$0xf0] %v2890_v22  ;;  %2937 = vst [vmem:[#allocation3 + $0xd8] sm:$0xf0] %v2932_v8  ;;  %v2565_v10 = vpop.permute.xlu0 %2564  ;;  %v2352_v39 = vld [vmem:[#allocation3 + $0xe8] sm:$0xff] }
 0x5d3   :  { %vm5484_vm15 = vmmov %vm5482_vm0  ;;  %v2568_v14 = vsel %vm207_vm3, %v5057_v7, %v2565_v10  ;;  %v3841_v49 = vpack.c.bf16 %v2352_v39, %v2349_v34  ;;  %2939 = vst.msk [vmem:[#allocation3 + $0xe8] sm:$0xf0] %vm193_vm13, %v5037_v0  ;;  %v2986_v7 = vsel %vm646_vm1, %v4901_v41, %v5045_v47  ;;  %v5490_v47 = vld [vmem:[#allocation19_spill] sm:$0xff]  ;;  %v5494_v15 = vld [vmem:[#allocation21_spill] sm:$0xff] }
 0x5d4   :  { %v2933_v63 = vsel %vm5484_vm15, %v4893_v59, %v5037_v0  ;;  %vm5485_vm14 = vmmov %vm5483_vm6  ;;  %v2353_v21 = vld [vmem:[#allocation3 + $0xf0] sm:$0xff]  ;;  %2573 = vst [vmem:[#allocation3 + $0x18] sm:$0xf] %v2568_v14  ;;  %v2359_v37 = vld [vmem:[#allocation3 + $0x120] sm:$0xf]  ;;  %vm5498_vm15 = vcmask 719872  }
 0x5d5   :  { %v2289_v28 = vsel %vm5485_vm14, %v2283_v23, %v2285_v60  ;;  %vm5486_vm5 = vmmov %vm5483_vm6  ;;  %2991 = vst [vmem:[#allocation3 + $0xf0] sm:$0xf0] %v2985_v18  ;;  %3842 = vmatpush3.bf16.msra.mxu1 %v3841_v49  ;;  %v2567_v11 = vpop.permute.xlu1 %2566  ;;  %v3078_v34 = vld [vmem:[#allocation3] sm:$0xff]  ;;  %v5497_v18 = vld [vmem:[#allocation22_spill] sm:$0xff] }
 0x5d6   :  { %v2290_v53 = vsel %vm5486_vm5, %v2285_v60, %v4650_v2  ;;  %v2351_v52 = vld [vmem:[#allocation3 + $0xe0] sm:$0xff]  ;;  %2295 = vst [vmem:[#allocation3 + $0x110] sm:$0xf0] %v2289_v28  ;;  %v2610_v2 = vpop.permute.xlu0 %2609  ;;  %3843 = vmatprep.subr.bf16.mxu1 %v5458_v12  ;;  %vm5487_vm0 = vmmov %vm5486_vm5  ;;  %v2569_v46 = vsel %vm207_vm3, %v2565_v10, %v2567_v11  ;;  %vm5492_vm3 = vcmask 875520   ;;  %vm5501_vm5 = vcmask 703488  }
 0x5d7   :  { %2296 = vst.msk [vmem:[#allocation3 + $0x118] sm:$0xf0] %vm193_vm13, %v2290_v53  ;;  %v3820_v59 = vpack.c.bf16 %v2351_v52, %v2348_v35  ;;  %2938 = vst [vmem:[#allocation3 + $0xe0] sm:$0xf0] %v2933_v63  ;;  %v3039_v0 = vsel %vm5487_vm0, %v4882_v16, %v4909_v19  ;;  %v2354_v4 = vld [vmem:[#allocation3 + $0xf8] sm:$0xff] }
 0x5d8   :  { %2575 = vst.msk [vmem:[#allocation3 + $0x28] sm:$0xf] %vm168_vm2, %v2567_v11  ;;  %2618 = vst.msk [vmem:[#allocation3 + $0x40] sm:$0xf] %vm168_vm2, %v2610_v2  ;;  %v2355_v30 = vld [vmem:[#allocation3 + $0x100] sm:$0xff]  ;;  %v2356_v32 = vld [vmem:[#allocation3 + $0x108] sm:$0xff] }
 0x5d9   :  { %3821 = vmatprep.subr.bf16.mxu0 %v3820_v59  ;;  %2574 = vst [vmem:[#allocation3 + $0x20] sm:$0xf] %v2569_v46  ;;  %2992 = vst [vmem:[#allocation3 + $0xf8] sm:$0xf0] %v2986_v7  ;;  %v2608_v16 = vpop.permute.xlu1 %2607  ;;  %v3826_v13 = vpack.c.bf16 %v2356_v32, %v2353_v21  ;;  %v5500_v11 = vld [vmem:[#allocation23_spill] sm:$0xff] }
 0x5da   :  { %3823 = vmatpush1.bf16.msra.mxu0 %v3822_v36  ;;  %2993 = vst.msk [vmem:[#allocation3 + $0x100] sm:$0xf0] %vm193_vm13, %v2987_v38  ;;  %3045 = vst [vmem:[#allocation3 + $0x108] sm:$0xf0] %v3039_v0  ;;  %v2653_v41 = vpop.permute.xlu0 %2652  ;;  %v2611_v62 = vsel %vm252_vm4, %v5490_v47, %v2608_v16  ;;  %v2612_v44 = vsel %vm252_vm4, %v2608_v16, %v2610_v2  ;;  %vm5495_vm4 = vcmask 859136  }
 0x5db   :  { %vm5489_vm1 = vmmov %vm5487_vm0  ;;  %2661 = vst.msk [vmem:[#allocation3 + $0x58] sm:$0xf] %vm168_vm2, %v2653_v41  ;;  %v3081_v54 = vld [vmem:[#allocation3 + $0x18] sm:$0xff] }
 0x5dc   :  { %v3040_v5 = vsel %vm5489_vm1, %v4909_v19, %v5488_v3  ;;  %2616 = vst [vmem:[#allocation3 + $0x30] sm:$0xf] %v2611_v62  ;;  %2617 = vst [vmem:[#allocation3 + $0x38] sm:$0xf] %v2612_v44  ;;  %v5491_v19 = vld [vmem:[#allocation20_spill] sm:$0xff]  ;;  %v3848_v22 = vpack.c.bf16 %v3081_v54, %v3078_v34 }
 0x5dd   :  { %v2357_v55 = vld [vmem:[#allocation3 + $0x110] sm:$0xff]  ;;  %v2651_v40 = vpop.permute.xlu1 %2650  ;;  %vm5493_vm10 = vmmov %vm5492_vm3 }
 0x5de   :  { %v2358_v31 = vld [vmem:[#allocation3 + $0x118] sm:$0xff]  ;;  %v3824_v6 = vpack.c.bf16 %v2357_v55, %v2354_v4  ;;  %3046 = vst [vmem:[#allocation3 + $0x110] sm:$0xf0] %v3040_v5  ;;  %v2696_v27 = vpop.permute.xlu0 %2695  ;;  %v2654_v25 = vsel %vm5492_vm3, %v5491_v19, %v2651_v40  ;;  %v2655_v24 = vsel %vm5493_vm10, %v2651_v40, %v2653_v41  ;;  %vm5496_vm6 = vmmov %vm5495_vm4  ;;  %vm5507_vm3 = vcmask 547840  }
 0x5df   :  { %v3844_v9 = vpack.c.bf16 %v2358_v31, %v2355_v30  ;;  %2704 = vst.msk [vmem:[#allocation3 + $0x70] sm:$0xf] %vm168_vm2, %v2696_v27  ;;  %2659 = vst [vmem:[#allocation3 + $0x48] sm:$0xf] %v2654_v25  ;;  %v3083_v56 = vld [vmem:[#allocation3 + $0x28] sm:$0xff]  ;;  %v3086_v35 = vld [vmem:[#allocation3 + $0x40] sm:$0xff] }
 0x5e0   :  { %3825 = vmatprep.subr.bf16.mxu0 %v3824_v6  ;;  %v3082_v61 = vld [vmem:[#allocation3 + $0x20] sm:$0xff]  ;;  %2660 = vst [vmem:[#allocation3 + $0x50] sm:$0xf] %v2655_v24  ;;  %v3871_v23 = vpack.c.bf16 %v3083_v56, %v3080_v1  ;;  %vm5499_vm14 = vmmov %vm5498_vm15 }
 0x5e1   :  { %3845 = vmatpush3.bf16.msra.mxu1 %v3844_v9  ;;  %3827 = vmatpush1.bf16.msra.mxu0 %v3826_v13  ;;  %v2694_v51 = vpop.permute.xlu1 %2693  ;;  %v3846_v17 = vpack.c.bf16 %v3082_v61, %v3079_v57  ;;  %vm5502_vm0 = vmmov %vm5501_vm5  ;;  %v5503_v30 = vld [vmem:[#allocation24_spill] sm:$0xff]  ;;  %v5506_v13 = vld [vmem:[#allocation26_spill] sm:$0xff] }
 0x5e2   :  { %3686 = vmatprep.subr.mxu1 %v5228_v43  ;;  %3538 = vmatprep.subr.msk.mxu0 %vm782_vm7, %v2360_v20  ;;  %v2739_v33 = vpop.permute.xlu0 %2738  ;;  %v2697_v8 = vsel %vm5495_vm4, %v5494_v15, %v2694_v51  ;;  %v2698_v29 = vsel %vm5496_vm6, %v2694_v51, %v2696_v27  ;;  %v3089_v58 = vld [vmem:[#allocation3 + $0x58] sm:$0xff]  ;;  %vm5508_vm10 = vmmov %vm5507_vm3  ;;  %v5509_v61 = vld [vmem:[#allocation28_spill] sm:$0xff]  ;;  %vm5510_vm4 = vcmask 531456  }
 0x5e3   :  { %2747 = vst.msk [vmem:[#allocation3 + $0x88] sm:$0xf] %vm168_vm2, %v2739_v33  ;;  %2702 = vst [vmem:[#allocation3 + $0x60] sm:$0xf] %v2697_v8  ;;  %v3085_v42 = vld [vmem:[#allocation3 + $0x38] sm:$0xff]  ;;  %v3874_v10 = vpack.c.bf16 %v3089_v58, %v3086_v35  ;;  %v3084_v28 = vld [vmem:[#allocation3 + $0x30] sm:$0xff] }
 0x5e4   :  { %2703 = vst [vmem:[#allocation3 + $0x68] sm:$0xf] %v2698_v29  ;;  %vm5511_vm6 = vmmov %vm5510_vm4  ;;  %v5514_v58 = vld [vmem:[#allocation18_spill] sm:$0xff] }
 0x5e5   :  { %3687 = vmatpush3.msk.msra.mxu1 %vm782_vm7, %v2361_v48  ;;  %3539 = vmatpush1.msk.msra.mxu0 %vm782_vm7, %v2359_v37  ;;  %v2737_v26 = vpop.permute.xlu1 %2736 }
 0x5e6   :  { %3870 = vmatprep.subr.bf16.mxu1 %v5458_v12  ;;  %3689 = vmatmul.mubr.msk.f32.vlgmr.msra.gmra.mrb[4].mxu1 %vm778_vm11, %v2322_v50  ;;  %v2782_v45 = vpop.permute.xlu0 %2781  ;;  %v2740_v63 = vsel %vm5498_vm15, %v5497_v18, %v2737_v26  ;;  %v2741_v60 = vsel %vm5499_vm14, %v2737_v26, %v2739_v33  ;;  %v3087_v53 = vld [vmem:[#allocation3 + $0x48] sm:$0xff]  ;;  %v3092_v59 = vld [vmem:[#allocation3 + $0x70] sm:$0xff]  ;;  %vm5515_vm15 = vcmask 375808  }
 0x5e7   :  { %3847 = vmatprep.subr.bf16.mxu0 %v3846_v17  ;;  %3872 = vmatpush3.bf16.msra.mxu1 %v3871_v23  ;;  %2790 = vst.msk [vmem:[#allocation3 + $0xa0] sm:$0xf] %vm168_vm2, %v2782_v45  ;;  %v3088_v39 = vld [vmem:[#allocation3 + $0x50] sm:$0xff]  ;;  %2745 = vst [vmem:[#allocation3 + $0x78] sm:$0xf] %v2740_v63  ;;  %v3852_v49 = vpack.c.bf16 %v3087_v53, %v3084_v28  ;;  %v5516_v63 = vld [vmem:[#allocation31_spill] sm:$0xff] }
 0x5e8   :  { %3540 = vmatmul.mubr.msk.f32.vlgmr.msra.gmra.mrb[4].mxu0 %vm778_vm11, %v2322_v50  ;;  %3873 = vmatprep.subr.bf16.mxu1 %v5458_v12  ;;  %2746 = vst [vmem:[#allocation3 + $0x80] sm:$0xf] %v2741_v60  ;;  %v3850_v14 = vpack.c.bf16 %v3088_v39, %v3085_v42  ;;  %v5512_v50 = vld [vmem:[#allocation17_spill] sm:$0xff]  ;;  %v5513_v23 = vld [vmem:[#allocation30_spill] sm:$0xff]  ;;  %vm5517_vm14 = vmmov %vm5515_vm15 }
 0x5e9   :  { %3849 = vmatpush1.bf16.msra.mxu0 %v3848_v22  ;;  %3193 = vmatprep.mubr.f32.mxu0 %v5228_v43  ;;  %v2780_v52 = vpop.permute.xlu1 %2779 }
 0x5ea   :  { %3717 = vmatprep.mubr.msk.f32.mxu1 %vm4073_vm9, %v5228_v43  ;;  %3851 = vmatprep.subr.bf16.mxu0 %v3850_v14  ;;  %v2825_v21 = vpop.permute.xlu0 %2824  ;;  %v3095_v36 = vld [vmem:[#allocation3 + $0x88] sm:$0xff]  ;;  %v2783_v2 = vsel %vm5501_vm5, %v5500_v11, %v2780_v52  ;;  %v2784_v0 = vsel %vm5502_vm0, %v2780_v52, %v2782_v45  ;;  %vm5504_vm9 = vcmask 687104   ;;  %v3090_v5 = vld [vmem:[#allocation3 + $0x60] sm:$0xff]  ;;  %vm5518_vm5 = vmmov %vm5517_vm14  ;;  %vm3356_vm0 = vcmask 523648  }
 0x5eb   :  { %3875 = vmatpush3.bf16.msra.mxu1 %v3874_v10  ;;  %2833 = vst.msk [vmem:[#allocation3 + $0xb8] sm:$0xf] %vm168_vm2, %v2825_v21  ;;  %v3877_v7 = vpack.c.bf16 %v3095_v36, %v3092_v59  ;;  %2788 = vst [vmem:[#allocation3 + $0x90] sm:$0xf] %v2783_v2  ;;  %v3091_v4 = vld [vmem:[#allocation3 + $0x68] sm:$0xff] }
 0x5ec   :  { %3876 = vmatprep.subr.bf16.mxu1 %v5458_v12  ;;  %2789 = vst [vmem:[#allocation3 + $0x98] sm:$0xf] %v2784_v0  ;;  %vm5505_vm1 = vmmov %vm5504_vm9 }
 0x5ed   :  { %3853 = vmatpush1.bf16.msra.mxu0 %v3852_v49  ;;  %v2823_v38 = vpop.permute.xlu1 %2822 }
 0x5ee   :  { %v2868_v46 = vpop.permute.xlu0 %2867  ;;  %v2826_v32 = vsel %vm5504_vm9, %v5503_v30, %v2823_v38  ;;  %v2827_v16 = vsel %vm5505_vm1, %v2823_v38, %v2825_v21  ;;  %v3093_v47 = vld [vmem:[#allocation3 + $0x78] sm:$0xff]  ;;  %v3098_v6 = vld [vmem:[#allocation3 + $0xa0] sm:$0xff]  ;;  %vm3369_vm9 = vcmask 654848   ;;  %vm3382_vm1 = vcmask 786048  }
 0x5ef   :  { %3878 = vmatpush3.bf16.msra.mxu1 %v3877_v7  ;;  %2876 = vst.msk [vmem:[#allocation3 + $0xd0] sm:$0xf] %vm168_vm2, %v2868_v46  ;;  %v3094_v41 = vld [vmem:[#allocation3 + $0x80] sm:$0xff]  ;;  %2831 = vst [vmem:[#allocation3 + $0xa8] sm:$0xf] %v2826_v32  ;;  %v3856_v44 = vpack.c.bf16 %v3093_v47, %v3090_v5 }
 0x5f0   :  { %3879 = vmatprep.subr.bf16.mxu1 %v5458_v12  ;;  %2832 = vst [vmem:[#allocation3 + $0xb0] sm:$0xf] %v2827_v16  ;;  %v3854_v62 = vpack.c.bf16 %v3094_v41, %v3091_v4  ;;  %v3077_v47 = vld [vmem:[%s5358_s2] sm:$0xf]  ;;  %s4078_s2 = smov 8  }
 0x5f1   :  { %v2866_v55 = vpop.permute.xlu1 %2865 }
 0x5f2   :  { %3855 = vmatprep.subr.bf16.mxu0 %v3854_v62  ;;  %v2911_v31 = vpop.permute.xlu0 %2910  ;;  %v3101_v9 = vld [vmem:[#allocation3 + $0xb8] sm:$0xff]  ;;  %v2869_v40 = vsel %vm5507_vm3, %v5506_v13, %v2866_v55  ;;  %v2870_v27 = vsel %vm5508_vm10, %v2866_v55, %v2868_v46  ;;  %v3096_v51 = vld [vmem:[#allocation3 + $0x90] sm:$0xff]  ;;  %vm3401_vm3 = vcmask 917248   ;;  %vm5527_vm10 = vcmask 850944  }
 0x5f3   :  { %2919 = vst.msk [vmem:[#allocation3 + $0xe8] sm:$0xf] %vm168_vm2, %v2911_v31  ;;  %3857 = vmatpush1.bf16.msra.mxu0 %v3856_v44  ;;  %v3880_v19 = vpack.c.bf16 %v3101_v9, %v3098_v6  ;;  %2874 = vst [vmem:[#allocation3 + $0xc0] sm:$0xf] %v2869_v40  ;;  %v3097_v20 = vld [vmem:[#allocation3 + $0x98] sm:$0xff] }
 0x5f4   :  { %2875 = vst [vmem:[#allocation3 + $0xc8] sm:$0xf] %v2870_v27  ;;  %v5520_v55 = vld [vmem:[#allocation27_spill] sm:$0xff] }
 0x5f5   :  { %3881 = vmatpush3.bf16.msra.mxu1 %v3880_v19  ;;  %v2909_v25 = vpop.permute.xlu1 %2908  ;;  %3442 = vrot.lane.b32.xlu1 %v5520_v55, %s4076_s28 }
 0x5f6   :  { %v2957_v24 = vpop.permute.xlu0 %2956  ;;  %3882 = vmatprep.subr.bf16.mxu1 %v5458_v12  ;;  %v2912_v48 = vsel %vm5510_vm4, %v5509_v61, %v2909_v25  ;;  %v2913_v56 = vsel %vm5511_vm6, %v2909_v25, %v2911_v31  ;;  %v3099_v33 = vld [vmem:[#allocation3 + $0xa8] sm:$0xff]  ;;  %v3104_v8 = vld [vmem:[#allocation3 + $0xd0] sm:$0xff]  ;;  %3418 = vrot.lane.b32.xlu0 %v5520_v55, %s4077_s29  ;;  %vm3414_vm4 = vcmask 1048448  }
 0x5f7   :  { %v2962_v57 = vsel %vm616_vm12, %v2957_v24, %v5512_v50  ;;  %v3100_v54 = vld [vmem:[#allocation3 + $0xb0] sm:$0xff]  ;;  %2917 = vst [vmem:[#allocation3 + $0xd8] sm:$0xf] %v2912_v48  ;;  %2918 = vst [vmem:[#allocation3 + $0xe0] sm:$0xf] %v2913_v56  ;;  %v3860_v17 = vpack.c.bf16 %v3099_v33, %v3096_v51  ;;  %v5523_v51 = vld [vmem:[#allocation16_spill] sm:$0xff] }
 0x5f8   :  { %2968 = vst.msk [vmem:[#allocation3 + $0x100] sm:$0xf] %vm168_vm2, %v2962_v57  ;;  %v3858_v37 = vpack.c.bf16 %v3100_v54, %v3097_v20  ;;  %v5522_v57 = vld [vmem:[#allocation14_spill] sm:$0xff] }
 0x5f9   :  { %v2955_v1 = vpop.permute.xlu1 %2954  ;;  %3454 = vrot.lane.b32.xlu1 %v5520_v55, %s4072_s23  ;;  %s4094_s23 = smov 76  }
 0x5fa   :  { %3859 = vmatprep.subr.bf16.mxu0 %v3858_v37  ;;  %v3011_v15 = vpop.permute.xlu0 %3010  ;;  %v3107_v29 = vld [vmem:[#allocation3 + $0xe8] sm:$0xff]  ;;  %v2960_v34 = vsel %vm616_vm12, %v5513_v23, %v2955_v1  ;;  %v2961_v22 = vsel %vm616_vm12, %v2955_v1, %v2957_v24  ;;  %vm5519_vm12 = vcmask 367616   ;;  %v3102_v53 = vld [vmem:[#allocation3 + $0xc0] sm:$0xff] }
 0x5fb   :  { %v3016_v26 = vsel %vm5515_vm15, %v3011_v15, %v5514_v58  ;;  %3861 = vmatpush1.bf16.msra.mxu0 %v3860_v17  ;;  %v3883_v45 = vpack.c.bf16 %v3107_v29, %v3104_v8  ;;  %2966 = vst [vmem:[#allocation3 + $0xf0] sm:$0xf] %v2960_v34  ;;  %2967 = vst [vmem:[#allocation3 + $0xf8] sm:$0xf] %v2961_v22  ;;  %v3103_v18 = vld [vmem:[#allocation3 + $0xc8] sm:$0xff]  ;;  %v5524_v37 = vld [vmem:[#allocation15_spill] sm:$0xff] }
 0x5fc   :  { %3022 = vst.msk [vmem:[#allocation3 + $0x118] sm:$0xf] %vm168_vm2, %v3016_v26 }
 0x5fd   :  { %3884 = vmatpush3.bf16.msra.mxu1 %v3883_v45  ;;  %v3009_v35 = vpop.permute.xlu1 %3008 }
 0x5fe   :  { %v3038_v42 = vpop.permute.xlu0 %3037  ;;  %3885 = vmatprep.subr.bf16.mxu1 %v5458_v12  ;;  %v3014_v60 = vsel %vm5517_vm14, %v5516_v63, %v3009_v35  ;;  %v3015_v10 = vsel %vm5518_vm5, %v3009_v35, %v3011_v15  ;;  %v3106_v28 = vld [vmem:[#allocation3 + $0xe0] sm:$0xff]  ;;  %v3105_v14 = vld [vmem:[#allocation3 + $0xd8] sm:$0xff] }
 0x5ff   :  { %v3041_v39 = vsel %vm5519_vm12, %v5488_v3, %v3038_v42  ;;  %3020 = vst [vmem:[#allocation3 + $0x108] sm:$0xf] %v3014_v60  ;;  %3021 = vst [vmem:[#allocation3 + $0x110] sm:$0xf] %v3015_v10  ;;  %v3862_v49 = vpack.c.bf16 %v3106_v28, %v3103_v18  ;;  %v3864_v52 = vpack.c.bf16 %v3105_v14, %v3102_v53  ;;  %v3110_v3 = vld [vmem:[#allocation3 + $0x100] sm:$0xff] }
 0x600   :  { %3047 = vst.msk [vmem:[#allocation3 + $0x118] sm:$0xf0] %vm193_vm13, %v3041_v39 }
 0x601   :  { %v3063_v21 = vpop.permute.xlu1 %3062  ;;  %3863 = vmatprep.subr.bf16.mxu0 %v3862_v49 }
 0x602   :  { %v3065_v12 = vpop.permute.xlu0 %3064  ;;  %3865 = vmatpush1.bf16.msra.mxu0 %v3864_v52  ;;  %v3109_v2 = vld [vmem:[#allocation3 + $0xf8] sm:$0xff]  ;;  %v3108_v0 = vld [vmem:[#allocation3 + $0xf0] sm:$0xff] }
 0x603   :  { %v3069_v59 = vsel %vm728_vm8, %v3063_v21, %v3065_v12 }
 0x604   :  { %3075 = vst [vmem:[#allocation3 + $0x128] sm:$0xf] %v3069_v59 }
 0x605   :  { %v3061_v36 = vpop.permute.xlu1 %3060 }
 0x606   :  { %v3067_v11 = vpop.permute.xlu0 %3066  ;;  %v3068_v7 = vsel %vm728_vm8, %v3061_v36, %v3063_v21  ;;  %v3112_v46 = vld [vmem:[#allocation3 + $0x110] sm:$0xff]  ;;  %v3111_v30 = vld [vmem:[#allocation3 + $0x108] sm:$0xff] }
 0x607   :  { %v3070_v38 = vsel %vm728_vm8, %v3065_v12, %v3067_v11  ;;  %v3113_v4 = vld [vmem:[#allocation3 + $0x118] sm:$0xff]  ;;  %3074 = vst [vmem:[#allocation3 + $0x120] sm:$0xf] %v3068_v7  ;;  %v3866_v32 = vpack.c.bf16 %v3112_v46, %v3109_v2  ;;  %v3868_v41 = vpack.c.bf16 %v3111_v30, %v3108_v0  ;;  %vm3317_vm8 = vcmask 130048  }
 0x608   :  { %3076 = vst.msk [vmem:[#allocation3 + $0x130] sm:$0xf] %vm168_vm2, %v3070_v38  ;;  %v3886_v16 = vpack.c.bf16 %v3113_v4, %v3110_v3 }
 0x609   :  { %3867 = vmatprep.subr.bf16.mxu0 %v3866_v32  ;;  %v3322_v45 = vpop.permute.xlu1 %3321  ;;  %v3959_v32 = vld [vmem:[#allocation5] sm:$0xff] }
 0x60a   :  { %3887 = vmatpush3.bf16.msra.mxu1 %v3886_v16  ;;  %3869 = vmatpush1.bf16.msra.mxu0 %v3868_v41 }
 0x60b   :  { %v3115_v5 = vld [vmem:[#allocation3 + $0x128] sm:$0xf]  ;;  %3715 = vmatprep.subr.mxu1 %v5228_v43  ;;  %v5521_v43 = vld [vmem:[#allocation25_spill] sm:$0xff] }
 0x60c   :  { %3543 = vmatprep.subr.msk.mxu0 %vm782_vm7, %v3115_v5  ;;  %3334 = vrot.lane.b32.xlu0 %v5521_v43, %s4078_s2 }
 0x60d   :  { %v3431_v35 = vpop.permute.xlu1 %3430 }
 0x60e   :  { %v3114_v62 = vld [vmem:[#allocation3 + $0x120] sm:$0xf] }
 0x60f   :  { %v3116_v44 = vld [vmem:[#allocation3 + $0x130] sm:$0xf]  ;;  %3544 = vmatpush1.msk.msra.mxu0 %vm782_vm7, %v3114_v62 }
 0x610   :  { %3716 = vmatpush3.msk.msra.mxu1 %vm782_vm7, %v3116_v44  ;;  %3545 = vmatmul.mubr.msk.f32.vlgmr.msra.gmra.mrb[6].mxu0 %vm778_vm11, %v3077_v47 }
 0x611   :  { %3718 = vmatmul.mubr.msk.f32.vlgmr.msra.gmra.mrb[6].mxu1 %vm778_vm11, %v3077_v47  ;;  %3347 = vrot.lane.b32.xlu0 %v5521_v43, %s4079_s30  ;;  %vm3330_vm11 = vcmask 261248  }
 0x667   :  { %v3443_v18 = vpop.permute.xlu1 %3442 }
 0x668   :  { %v3419_v42 = vpop.permute.xlu0 %3418 }
 0x66b   :  { %v3455_v60 = vpop.permute.xlu1 %3454 }
 0x67e   :  { %v3335_v63 = vpop.permute.xlu0 %3334 }
 0x683   :  { %v3348_v10 = vpop.permute.xlu0 %3347 }
 0x6b9   :  { %v2511_v31 = vpop.f32.mrb[4].mxu1 }
 0x6ba   :  { %2517 = vst.msk [vmem:[#allocation4 + $0x10] sm:$0xf] %vm168_vm2, %v2511_v31  ;;  %v3690_v9 = vpop.f32.mrb[5].mxu1  ;;  %vm5525_vm2 = vcmask 523264  }
 0x6bb   :  { %v2440_v6 = vpop.f32.mrb[4].mxu0  ;;  %vm5526_vm7 = vmmov %vm5525_vm2 }
 0x6bc   :  { %2515 = vst [vmem:[#allocation4] sm:$0xf] %v2440_v6  ;;  %v2442_v13 = vpop.f32.mrb[5].mxu0 }
 0x6bd   :  { %2516 = vst [vmem:[#allocation4 + $0x8] sm:$0xf] %v2442_v13 }
 0x6e3   :  { %v3195_v40 = vpop.f32.mrb[6].mxu0 }
 0x6e4   :  { %v3266_v27 = vpop.f32.mrb[6].mxu1  ;;  %v3273_v19 = vrot.slane %v3195_v40, 4  ;;  %v3197_v24 = vpop.f32.mrb[7].mxu0 }
 0x6e5   :  { %v3275_v25 = vrot.slane %v3266_v27, 4  ;;  %v3719_v20 = vpop.f32.mrb[7].mxu1  ;;  %v3274_v61 = vrot.slane %v3197_v24, 4 }
 0x6e6   :  { %3279 = vst [vmem:[#allocation4] sm:$0xf0] %v3273_v19 }
 0x6e7   :  { %3281 = vst.msk [vmem:[#allocation4 + $0x10] sm:$0xf0] %vm193_vm13, %v3275_v25  ;;  %3280 = vst [vmem:[#allocation4 + $0x8] sm:$0xf0] %v3274_v61  ;;  %vm3343_vm13 = vcmask 392448  }
 0x6ed   :  { %v3282_v48 = vld [vmem:[#allocation4] sm:$0xff] }
 0x6ee   :  { %v5307_v56 = vld [vmem:[#allocation4 + $0x10] sm:$0xff]  ;;  %v3283_v50 = vld [vmem:[#allocation4 + $0x8] sm:$0xff]  ;;  %v3285_v54 = vmul.f32 %v3282_v48, %v5522_v57 }
 0x6ef   :  { %v3287_v33 = vmul.f32 %v5307_v56, %v5523_v51  ;;  %v3286_v17 = vmul.f32 %v3283_v50, %v5524_v37 }
 0x6f0   :  { %v3294_v1 = vmul.f32 %v3285_v54, %v3285_v54 }
 0x6f1   :  { %v3296_v15 = vmul.f32 %v3287_v33, %v3287_v33  ;;  %v3288_v8 = vadd.f32 %v3286_v17, %v3285_v54  ;;  %v3295_v29 = vmul.f32 %v3286_v17, %v3286_v17  ;;  %v3289_v23 = vsel %vm5525_vm2, %v3287_v33, 0.0 }
 0x6f3   :  { %v3290_v34 = vadd.f32 %v3289_v23, %v3288_v8  ;;  %v3297_v22 = vadd.f32 %v3295_v29, %v3294_v1  ;;  %v3298_v58 = vsel %vm5526_vm7, %v3296_v15, 0.0 }
 0x6f5   :  { %3291 = vadd.xlane.f32.xlu1 %v3290_v34  ;;  %v3299_v26 = vadd.f32 %v3298_v58, %v3297_v22 }
 0x6f7   :  { %3300 = vadd.xlane.f32.xlu0 %v3299_v26 }
 0x706   :  { %3466 = vrot.lane.b32.xlu1 %v5520_v55, %s4069_s20  ;;  %s4088_s20 = smov 92  }
 0x70a   :  { %3386 = vrot.lane.b32.xlu1 %v5521_v43, %s4080_s7 }
 0x70d   :  { %3360 = vrot.lane.b32.xlu0 %v5521_v43, %s4081_s8 }
 0x70e   :  { %3490 = vrot.lane.b32.xlu1 %v5520_v55, %s4082_s9 }
 0x711   :  { %3373 = vrot.lane.b32.xlu0 %v5521_v43, %s4083_s10 }
 0x712   :  { %3502 = vrot.lane.b32.xlu1 %v5520_v55, %s4084_s11 }
 0x715   :  { %3478 = vrot.lane.b32.xlu0 %v5520_v55, %s4085_s1 }
 0x719   :  { %3405 = vrot.lane.b32.xlu0 %v5521_v43, %s4086_s14 }
 0x782   :  { %v3292_v39 = vpop.xlane.xlu1 %3291 }
 0x783   :  { %v3293_v28 = vmul.f32 0.00390625, %v3292_v39 }
 0x784   :  { %v3301_v53 = vpop.xlane.xlu0 %3300 }
 0x785   :  { %v3303_v14 = vmul.f32 %v3293_v28, %v3293_v28  ;;  %v3302_v49 = vmul.f32 0.00390625, %v3301_v53  ;;  %v3308_v36 = vsub.f32 %v3282_v48, %v3293_v28  ;;  %v3309_v11 = vsub.f32 %v3283_v50, %v3293_v28 }
 0x786   :  { %v3467_v41 = vpop.permute.xlu1 %3466  ;;  %v3310_v61 = vsub.f32 %v5307_v56, %v3293_v28 }
 0x787   :  { %v3304_v52 = vsub.f32 %v3302_v49, %v3303_v14 }
 0x788   :  { %v3361_v5 = vpop.permute.xlu0 %3360 }
 0x789   :  { %v3305_v21 = vmax.f32 %v3304_v52, 0.0 }
 0x78a   :  { %v3387_v40 = vpop.permute.xlu1 %3386 }
 0x78b   :  { %v3306_v12 = vadd.f32 1e-05, %v3305_v21 }
 0x78c   :  { %v3374_v27 = vpop.permute.xlu0 %3373 }
 0x78d   :  { %3955 = vrsqrt.f32 %v3306_v12 }
 0x78e   :  { %v3491_v48 = vpop.permute.xlu1 %3490 }
 0x790   :  { %v3479_v57 = vpop.permute.xlu0 %3478 }
 0x792   :  { %v3503_v8 = vpop.permute.xlu1 %3502 }
 0x794   :  { %v3406_v29 = vpop.permute.xlu0 %3405 }
 0x797   :  { %v3956_v59 = vpop.eup %3955 }
 0x798   :  { %v5324_v2 = vmul.f32 %v3956_v59, %v3309_v11  ;;  %v3311_v3 = vmul.f32 %v3956_v59, %v3308_v36  ;;  %v3313_v50 = vmul.f32 %v3956_v59, %v3310_v61 }
 0x79a   :  { %v3421_v0 = vadd.f32 %v3419_v42, %v5324_v2  ;;  %v3324_v7 = vadd.f32 %v3322_v45, %v3311_v3  ;;  %v3433_v4 = vadd.f32 %v3431_v35, %v5324_v2  ;;  %v3337_v30 = vadd.f32 %v3335_v63, %v3311_v3 }
 0x79b   :  { %v3315_v16 = vadd.f32 %v3959_v32, %v3311_v3  ;;  %v3445_v47 = vadd.f32 %v3443_v18, %v5324_v2  ;;  %v3350_v55 = vadd.f32 %v3348_v10, %v3311_v3  ;;  %v3363_v31 = vadd.f32 %v3361_v5, %v3311_v3 }
 0x79c   :  { %v3422_v38 = vmax.f32 %v3421_v0, 0.0  ;;  %v3325_v46 = vmax.f32 %v3324_v7, 0.0  ;;  %v3434_v62 = vmax.f32 %v3433_v4, 0.0  ;;  %v3338_v44 = vmax.f32 %v3337_v30, 0.0 }
 0x79d   :  { %v3316_v43 = vmax.f32 %v3315_v16, 0.0  ;;  %v3446_v6 = vmax.f32 %v3445_v47, 0.0  ;;  %v3351_v9 = vmax.f32 %v3350_v55, 0.0  ;;  %v3457_v13 = vadd.f32 %v3455_v60, %v5324_v2 }
 0x79e   :  { %3424 = vrot.lane.b32.xlu0 %v3422_v38, %s4087_s18  ;;  %3327 = vrot.lane.b32.xlu1 %v3325_v46, %s4051_s27  ;;  %s4090_s27 = smov 116   ;;  %v3469_v19 = vadd.f32 %v3467_v41, %v5324_v2  ;;  %v3364_v25 = vmax.f32 %v3363_v31, 0.0  ;;  %v3376_v24 = vadd.f32 %v3374_v27, %v3311_v3  ;;  %v3389_v51 = vadd.f32 %v3387_v40, %v3311_v3 }
 0x79f   :  { %3318 = vst.msk [vmem:[#allocation10] sm:$0xff] %vm3317_vm8, %v3316_v43  ;;  %v3458_v20 = vmax.f32 %v3457_v13, 0.0  ;;  %v3390_v33 = vadd.f32 %v3387_v40, %v5324_v2  ;;  %v3493_v15 = vadd.f32 %v3491_v48, %v3313_v50  ;;  %v3481_v56 = vadd.f32 %v3479_v57, %v3313_v50 }
 0x7a0   :  { %v3470_v54 = vmax.f32 %v3469_v19, 0.0  ;;  %v3377_v37 = vmax.f32 %v3376_v24, 0.0  ;;  %v3391_v17 = vmax.f32 %v3389_v51, 0.0  ;;  %v3505_v22 = vadd.f32 %v3503_v8, %v3313_v50 }
 0x7a1   :  { %v3392_v1 = vmax.f32 %v3390_v33, 0.0  ;;  %v3494_v23 = vmax.f32 %v3493_v15, 0.0  ;;  %v3482_v34 = vmax.f32 %v3481_v56, 0.0  ;;  %v3408_v58 = vadd.f32 %v3406_v29, %v5324_v2 }
 0x7a2   :  { %3436 = vrot.lane.b32.xlu0 %v3434_v62, %s4088_s20  ;;  %3340 = vrot.lane.b32.xlu1 %v3338_v44, %s4089_s21  ;;  %v3506_v26 = vmax.f32 %v3505_v22, 0.0 }
 0x7a3   :  { %v3409_v45 = vmax.f32 %v3408_v58, 0.0 }
 0x7a6   :  { %3448 = vrot.lane.b32.xlu0 %v3446_v6, %s4055_s5  ;;  %3353 = vrot.lane.b32.xlu1 %v3351_v9, %s4090_s27  ;;  %s4092_s5 = smov 80  }
 0x7aa   :  { %3460 = vrot.lane.b32.xlu0 %v3458_v20, %s4056_s6  ;;  %3366 = vrot.lane.b32.xlu1 %v3364_v25, %s4091_s22  ;;  %s4093_s6 = smov 72  }
 0x7ae   :  { %3472 = vrot.lane.b32.xlu0 %v3470_v54, %s4092_s5  ;;  %3379 = vrot.lane.b32.xlu1 %v3377_v37, %s4061_s0  ;;  %s4095_s0 = smov 100  }
 0x7b2   :  { %3395 = vrot.lane.b32.xlu0 %v3391_v17, %s4063_s12  ;;  %3397 = vrot.lane.b32.xlu1 %v3392_v1, %s4063_s12  ;;  %s4096_s12 = smov [#allocation10]  }
 0x7b6   :  { %3496 = vrot.lane.b32.xlu1 %v3494_v23, %s4093_s6  ;;  %3484 = vrot.lane.b32.xlu0 %v3482_v34, %s4094_s23 }
 0x7ba   :  { %3508 = vrot.lane.b32.xlu1 %v3506_v26, %s4066_s17  ;;  %3411 = vrot.lane.b32.xlu0 %v3409_v45, %s4095_s0  ;;  %s3518_s17 = sshll.u32 %s4096_s12, 4  ;;  %s3519_s17 = int_to_ptr.vmem [resolvable:$true] %s3518_s17 }
 0x7bb   :  { %s4004_s24 = scalar_lea.vmem %s3519_s17, 256  ;;  %p4009_p3 = scmp.lt.s32.totalorder %s3519_s17, %s3519_s17 }
 0x7bc   :  { %p4005_p2 = scmp.ne.s32.totalorder %s3519_s17, %s4004_s24  ;;  %p4010_p4 = scmp.lt.s32.totalorder %s4004_s24, %s4004_s24 }
 0x7be   :  { %p4011_p5 = por %p4010_p4, %p4009_p3 }
 0x7c0   :  { %p4012_p6 = pnand %p4011_p5, %p4005_p2 }
 0x810   :  { %v3328_v35 = vpop.permute.xlu1 %3327  ;;  %v3425_v42 = vpop.permute.xlu0 %3424 }
 0x811   :  { %3331 = vst.msk [vmem:[#allocation10] sm:$0xff] %vm3330_vm11, %v3328_v35 }
 0x812   :  { %3427 = vst.msk [vmem:[#allocation10 + $0x8] sm:$0xff] %vm3317_vm8, %v3425_v42 }
 0x814   :  { %v3341_v18 = vpop.permute.xlu1 %3340  ;;  %v3437_v63 = vpop.permute.xlu0 %3436 }
 0x815   :  { %3344 = vst.msk [vmem:[#allocation10] sm:$0xff] %vm3343_vm13, %v3341_v18 }
 0x816   :  { %3439 = vst.msk [vmem:[#allocation10 + $0x8] sm:$0xff] %vm3330_vm11, %v3437_v63 }
 0x818   :  { %v3354_v60 = vpop.permute.xlu1 %3353  ;;  %v3449_v10 = vpop.permute.xlu0 %3448 }
 0x819   :  { %3357 = vst.msk [vmem:[#allocation10] sm:$0xff] %vm3356_vm0, %v3354_v60 }
 0x81a   :  { %3451 = vst.msk [vmem:[#allocation10 + $0x8] sm:$0xff] %vm3343_vm13, %v3449_v10 }
 0x81c   :  { %v3367_v39 = vpop.permute.xlu1 %3366  ;;  %v3461_v28 = vpop.permute.xlu0 %3460 }
 0x81d   :  { %3370 = vst.msk [vmem:[#allocation10] sm:$0xff] %vm3369_vm9, %v3367_v39 }
 0x81e   :  { %3463 = vst.msk [vmem:[#allocation10 + $0x8] sm:$0xff] %vm3356_vm0, %v3461_v28 }
 0x820   :  { %v3380_v53 = vpop.permute.xlu1 %3379  ;;  %v3473_v14 = vpop.permute.xlu0 %3472 }
 0x821   :  { %3383 = vst.msk [vmem:[#allocation10] sm:$0xff] %vm3382_vm1, %v3380_v53 }
 0x822   :  { %3475 = vst.msk [vmem:[#allocation10 + $0x8] sm:$0xff] %vm3369_vm9, %v3473_v14 }
 0x824   :  { %v3398_v49 = vpop.permute.xlu1 %3397  ;;  %v3396_v52 = vpop.permute.xlu0 %3395 }
 0x825   :  { %v3399_v21 = vsel %vm5527_vm10, %v3396_v52, %v3398_v49 }
 0x826   :  { %3402 = vst.msk [vmem:[#allocation10] sm:$0xff] %vm3401_vm3, %v3399_v21 }
 0x828   :  { %v3497_v12 = vpop.permute.xlu1 %3496  ;;  %v3485_v59 = vpop.permute.xlu0 %3484 }
 0x829   :  { %3487 = vst.msk [vmem:[#allocation10 + $0x8] sm:$0xff] %vm3382_vm1, %v3485_v59 }
 0x82a   :  { %3499 = vst.msk [vmem:[#allocation10 + $0x8] sm:$0xff] %vm3401_vm3, %v3497_v12 }
 0x82c   :  { %v3509_v36 = vpop.permute.xlu1 %3508  ;;  %v3412_v11 = vpop.permute.xlu0 %3411 }
 0x82d   :  { %3415 = vst.msk [vmem:[#allocation10] sm:$0xff] %vm3414_vm4, %v3412_v11  ;;  %3511 = vst.msk [vmem:[#allocation10 + $0x8] sm:$0xff] %vm3414_vm4, %v3509_v36 }
 0x82e   :  { %4015 = shalt.err (!%p4012_p6)
}
 0x82f   :  { %s4016_s13 = scalar_lea.hbm %s5360_s4, 256 }
 0x830   :  { %p4017_p7 = scmp.ne.s32.totalorder %s5360_s4, %s4016_s13  ;;  %p4020_p8 = scmp.lt.u32.totalorder %s4016_s13, %s5360_s4 }
 0x832   :  { %p4022_p9 = pnand %p4020_p8, %p4017_p7 }
 0x834   :  { %4025 = shalt.err (!%p4022_p9)
}
 0x835   :  { %3521 = dma.vmem_to_hbm [thread:$0]  %s3519_s17, 256, %s5360_s4, [#allocation7]  }
 0x836   :  { %4030 = dma.done.wait [#allocation7], 256  }
 0x837   :  { %4031 = vsyncadd [#allocation7], 4294967040 }
 0x838   :  { %3525 = vsyncpa [#allocation6], 1 }
 0x839   :  { %3526 = vsyncpa [#allocation9], 1 }
 0x83a   :  { %3527 = vsyncpa [#allocation7], 1 }

</bundles_post_ra>
